<compile_context>
chip_gen: v6e
topology: v6e:2x2x1
jax: 0.10.0
libtpu: 0.0.40
codegen_flags: <defaults>
</compile_context>

<pallas_src>
import functools

import jax
import jax.numpy as jnp
from jax.experimental import pallas as pl
from jax.experimental.pallas import tpu as pltpu

# ---------------- small config (structurally consistent with SwinV2-CR) ----------------
IN_CH = 1          # in_chans=1 as in the module
IMG = 16           # small spatial size (module default 256; scaled down)
PATCH = 4          # patch_size=4 as in the module
EMBED = 32         # embed dim (scaled down from 96)
DEPTHS = (1, 1)    # scaled down from (2, 2, 6, 2)
HEADS = (2, 4)
WIN = 2            # window size (scaled down)
MLP_RATIO = 4
N_CLASSES = 6      # n_classes=6 as in the module
LN_EPS = 1e-5

# Token rows processed per grid step of the Swin-block kernel.  Toy value so the grid has
# >1 step at this size; at real SwinV2-CR sizes use ~512-1024 rows on v5e/v6e (128 MiB VMEM)
# and ~256-512 on v7x (64 MiB VMEM), double-buffering included.
TOKENS_PER_STEP = 16


# ---------------- in-kernel helpers ----------------
def _bf16(x):
    return x.astype(jnp.bfloat16)


def _ln(y, g, b, eps):
    mu = jnp.mean(y, axis=-1, keepdims=True)
    yc = y - mu
    var = jnp.mean(yc * yc, axis=-1, keepdims=True)
    return yc * jax.lax.rsqrt(var + eps) * g + b


def _windows_per_step(nw, seq):
    target = max(1, TOKENS_PER_STEP // seq)
    wpb = 1
    for d in range(1, nw + 1):
        if nw % d == 0 and d <= target:
            wpb = d
    return wpb


# ---------------- Pallas kernels ----------------
def _patch_embed_kernel(x_ref, w_ref, b_ref, g_ref, bb_ref, o_ref, *, eps):
    # Conv2d(kernel=stride=PATCH) expressed as patch-matmul, fused with LayerNorm.
    y = jnp.dot(_bf16(x_ref[...]), w_ref[...], preferred_element_type=jnp.float32) + b_ref[...]
    o_ref[...] = _ln(y, g_ref[...], bb_ref[...], eps).astype(o_ref.dtype)


def _patch_merge_kernel(x_ref, g_ref, b_ref, w_ref, o_ref, *, eps):
    # PatchMerging: LayerNorm(4*dim) + Linear(4*dim -> 2*dim, bias=False), fused.
    y = _ln(x_ref[...], g_ref[...], b_ref[...], eps)
    o_ref[...] = jnp.dot(_bf16(y), w_ref[...], preferred_element_type=jnp.float32).astype(o_ref.dtype)


def _swin_block_kernel(tok_ref, qkvw_ref, qkvb_ref, projw_ref, projb_ref,
                       scale_ref, bias_ref, ln1g_ref, ln1b_ref,
                       fc1w_ref, fc1b_ref, fc2w_ref, fc2b_ref,
                       ln2g_ref, ln2b_ref, o_ref, *, heads, head_dim, eps):
    # Fused SwinV2 post-norm block; one grid step processes WPB whole windows.
    #   tok_ref : (WPB, L, C) f32, window-major tokens
    #   qkv_w   : (C, 3C) bf16   [q | k | v], each head-ordered
    #   proj_w  : (C, C)  bf16
    #   scale   : (heads, 1, 1) f32 = exp(min(logit_scale, log 100)), precomputed in wrapper
    #   bias    : (heads, L, L) f32 relative-position bias (same block for every window)
    wpb, seq, c = tok_ref.shape
    x3 = tok_ref[...]                                 # (WPB, L, C) f32
    x = x3.reshape(wpb * seq, c)                      # leading-dim collapse (free)
    xb = _bf16(x)

    # Fused QKV: one wide matmul, lane-dense (3C) output.
    qkv = jnp.dot(xb, qkvw_ref[...], preferred_element_type=jnp.float32) + qkvb_ref[...]

    # Per-head cosine attention core (score / softmax / PV), batched over the WPB windows.
    head_outs = []
    for h in range(heads):
        q = qkv[:, h * head_dim:(h + 1) * head_dim].reshape(wpb, seq, head_dim)
        k = qkv[:, c + h * head_dim:c + (h + 1) * head_dim].reshape(wpb, seq, head_dim)
        v = qkv[:, 2 * c + h * head_dim:2 * c + (h + 1) * head_dim].reshape(wpb, seq, head_dim)
        # SwinV2 cosine attention: normalize(q) . normalize(k)^T * scale + rel-pos bias.
        # (logit scale folded into the normalized q.)
        qn = q * jax.lax.rsqrt(jnp.sum(q * q, axis=-1, keepdims=True) + 1e-12) * scale_ref[h]
        kn = k * jax.lax.rsqrt(jnp.sum(k * k, axis=-1, keepdims=True) + 1e-12)
        s = jnp.einsum("wtd,wsd->wts", qn, kn, preferred_element_type=jnp.float32)
        s = s + bias_ref[h]
        s = s - jnp.max(s, axis=-1, keepdims=True)
        p = jnp.exp(s)
        p = p / jnp.sum(p, axis=-1, keepdims=True)    # exact softmax
        head_outs.append(jnp.einsum("wts,wsd->wtd", p, v, preferred_element_type=jnp.float32))

    # One fused output projection (heads * head_dim == C).
    attn = jnp.concatenate(head_outs, axis=-1).reshape(wpb * seq, c)
    proj = jnp.dot(_bf16(attn), projw_ref[...], preferred_element_type=jnp.float32) + projb_ref[...]

    # post-norm residual 1: x = x + LN(attn(x))
    x = x + _ln(proj, ln1g_ref[...], ln1b_ref[...], eps)

    # MLP with post-norm residual 2: x = x + LN(fc2(gelu(fc1(x))))
    # TODO(synk): timm Mlp uses exact (erf) GELU; tanh approximation used here.
    h1 = jnp.dot(_bf16(x), fc1w_ref[...], preferred_element_type=jnp.float32) + fc1b_ref[...]
    h1 = jax.nn.gelu(h1, approximate=True)
    h2 = jnp.dot(_bf16(h1), fc2w_ref[...], preferred_element_type=jnp.float32) + fc2b_ref[...]
    x = x + _ln(h2, ln2g_ref[...], ln2b_ref[...], eps)

    o_ref[...] = x.reshape(wpb, seq, c).astype(o_ref.dtype)


def _pool_classify_kernel(tok_ref, w_ref, b_ref, o_ref):
    # AdaptiveAvgPool2d(1) + Linear head, fused.  tok_ref is (B, HW, C) (windows of a batch
    # are contiguous, and the mean is permutation-invariant) -> in-kernel mean, bf16 matmul.
    pooled = jnp.mean(tok_ref[...], axis=1)                                   # (B, C) f32
    y = jnp.dot(_bf16(pooled), w_ref[...], preferred_element_type=jnp.float32) + b_ref[...]
    o_ref[...] = y.astype(o_ref.dtype)


# ---------------- pallas_call wrappers ----------------
def _call_patch_embed(patches, pe):
    m = patches.shape[0]
    return pl.pallas_call(
        functools.partial(_patch_embed_kernel, eps=LN_EPS),
        out_shape=jax.ShapeDtypeStruct((m, EMBED), jnp.float32),
    )(patches, pe["w"], pe["b"], pe["ln_g"], pe["ln_b"])


def _call_patch_merge(x, mp, out_dim):
    return pl.pallas_call(
        functools.partial(_patch_merge_kernel, eps=LN_EPS),
        out_shape=jax.ShapeDtypeStruct((x.shape[0], out_dim), jnp.float32),
    )(x, mp["ln_g"], mp["ln_b"], mp["red_w"])


def _call_swin_block(tok, blk, heads, head_dim, scale):
    nw, seq, c = tok.shape
    wpb = _windows_per_step(nw, seq)
    hidden = MLP_RATIO * c

    def full(*shape):
        return pl.BlockSpec(shape, lambda w: (0,) * len(shape))

    return pl.pallas_call(
        functools.partial(_swin_block_kernel, heads=heads, head_dim=head_dim, eps=LN_EPS),
        out_shape=jax.ShapeDtypeStruct((nw, seq, c), jnp.float32),
        grid=(nw // wpb,),
        in_specs=[
            pl.BlockSpec((wpb, seq, c), lambda w: (w, 0, 0)),   # token windows for this step
            full(c, 3 * c),                                     # qkv_w (fetched once)
            full(1, 3 * c),                                     # qkv_b
            full(c, c),                                         # proj_w
            full(1, c),                                         # proj_b
            full(heads, 1, 1),                                  # logit scale
            full(heads, seq, seq),                              # rel-pos bias (shared by all windows)
            full(1, c), full(1, c),                             # ln1 g, b
            full(c, hidden), full(1, hidden),                   # fc1
            full(hidden, c), full(1, c),                        # fc2
            full(1, c), full(1, c),                             # ln2 g, b
        ],
        out_specs=pl.BlockSpec((wpb, seq, c), lambda w: (w, 0, 0)),
        compiler_params=pltpu.CompilerParams(
            dimension_semantics=("parallel",),                  # split window groups across TCs (v7x)
            vmem_limit_bytes=32 * 1024 * 1024,                  # explicit; re-derive for 64 MiB v7x at scale
        ),
    )(tok, blk["qkv_w"], blk["qkv_b"], blk["proj_w"], blk["proj_b"], scale,
      blk["rel_bias"], blk["ln1_g"], blk["ln1_b"], blk["fc1_w"], blk["fc1_b"],
      blk["fc2_w"], blk["fc2_b"], blk["ln2_g"], blk["ln2_b"])


# ---------------- parameter init (deterministic, synthetic) ----------------
def init_params(key):
    keys = iter(jax.random.split(key, 64))

    def nrm(shape, std=0.02, dtype=jnp.bfloat16):
        return (std * jax.random.normal(next(keys), shape, dtype=jnp.float32)).astype(dtype)

    def zeros(shape):
        return jnp.zeros(shape, jnp.float32)

    def ones(shape):
        return jnp.ones(shape, jnp.float32)

    params = {
        "pe": dict(
            w=nrm((IN_CH * PATCH * PATCH, EMBED)),
            b=zeros((1, EMBED)),
            ln_g=ones((1, EMBED)),
            ln_b=zeros((1, EMBED)),
        )
    }
    stages, merges = [], []
    dim = EMBED
    L = WIN * WIN
    for i in range(len(DEPTHS)):
        if i > 0:
            merges.append(dict(
                ln_g=ones((1, 4 * dim)),
                ln_b=zeros((1, 4 * dim)),
                red_w=nrm((4 * dim, 2 * dim)),      # timm PatchMerging reduction: bias=False
            ))
            dim *= 2
        heads = HEADS[i]
        hidden = MLP_RATIO * dim
        blocks = []
        for _ in range(DEPTHS[i]):
            blocks.append(dict(
                qkv_w=nrm((dim, 3 * dim)),          # fused qkv Linear(dim -> 3*dim), [q|k|v]
                qkv_b=zeros((1, 3 * dim)),
                proj_w=nrm((dim, dim)),             # fused proj Linear(dim -> dim)
                proj_b=zeros((1, dim)),
                logit_scale=jnp.full((heads,), jnp.log(10.0), jnp.float32),
                # TODO(synk): SwinV2-CR derives this bias from a log-CPB meta-MLP; a directly
                # learned (heads, L, L) table is used here.
                rel_bias=nrm((heads, L, L), dtype=jnp.float32),
                ln1_g=ones((1, dim)), ln1_b=zeros((1, dim)),
                fc1_w=nrm((dim, hidden)), fc1_b=zeros((1, hidden)),
                fc2_w=nrm((hidden, dim)), fc2_b=zeros((1, dim)),
                ln2_g=ones((1, dim)), ln2_b=zeros((1, dim)),
            ))
        stages.append(blocks)
    params["stages"] = stages
    params["merge"] = merges
    params["cls"] = dict(w=nrm((dim, N_CLASSES)), b=zeros((1, N_CLASSES)))
    return params


# ---------------- forward ----------------
@jax.jit
def swinv2_classifier_forward(params, x):
    # x: (B, IN_CH, IMG, IMG), NCHW like PyTorch.
    B = x.shape[0]
    Hg, Wg = IMG // PATCH, IMG // PATCH
    nwh, nww = Hg // WIN, Wg // WIN
    L = WIN * WIN

    # Patch extraction for Conv2d(k=stride=PATCH), with the stage-0 window-major ordering
    # folded into the one unavoidable layout transpose (no separate window-partition pass).
    p = x.reshape(B, IN_CH, nwh, WIN, PATCH, nww, WIN, PATCH)
    p = p.transpose(0, 2, 5, 3, 6, 1, 4, 7)                    # (b, wh, ww, i, j, ci, ph, pw)
    p = p.reshape(B * nwh * nww * L, IN_CH * PATCH * PATCH)
    tok = _call_patch_embed(p, params["pe"])                   # rows already window-major
    dim = EMBED
    tok = tok.reshape(B * nwh * nww, L, dim)                   # (NW, L, C): free reshape

    for i in range(len(DEPTHS)):
        if i > 0:
            # WIN == 2 => each window IS the 2x2 merge neighbourhood, so the merge input is a
            # free reshape of the window-major tokens (no XLA transpose / concat pass).
            # TODO(synk): exact timm PatchMerging neighbour-concat ordering not matched
            # bit-for-bit (equivalent re-parameterization with synthetic weights).
            assert WIN == 2 and Hg // 2 == WIN and Wg // 2 == WIN, "toy-config specialisation"
            merged_in = tok.reshape(tok.shape[0], L * dim)     # (B*nWh*nWw, 4*dim)
            tok2d = _call_patch_merge(merged_in, params["merge"][i - 1], 2 * dim)
            Hg, Wg, dim = Hg // 2, Wg // 2, dim * 2
            nwh, nww = Hg // WIN, Wg // WIN                    # == 1, 1 here
            # Merged tokens come out row-major over the new grid; with a single window per
            # image this is already window-major.
            # TODO(synk): for configs with nwh,nww > 1 fold the re-window transpose into the
            # block kernel's index_map instead of an XLA pass.
            tok = tok2d.reshape(B * nwh * nww, L, dim)

        heads = HEADS[i]
        hd = dim // heads
        for d in range(DEPTHS[i]):
            # TODO(synk): shifted-window (cyclic shift + shift mask) variant for odd block
            # indices omitted — every stage here has depth 1, so block 0 is unshifted anyway.
            blk = params["stages"][i][d]
            scale = jnp.exp(jnp.minimum(blk["logit_scale"], jnp.log(100.0))).reshape(heads, 1, 1)
            tok = _call_swin_block(tok, blk, heads, hd, scale)

    # AdaptiveAvgPool2d(1) + Linear head.  Windows of a batch are contiguous, so the
    # (B, HW, C) view is a free reshape; the mean is done in-kernel (no one-hot pool matrix).
    hw = Hg * Wg
    feat = tok.reshape(B, hw, dim)
    out = pl.pallas_call(
        _pool_classify_kernel,
        out_shape=jax.ShapeDtypeStruct((B, N_CLASSES), jnp.float32),
    )(feat, params["cls"]["w"], params["cls"]["b"])
    return out


if __name__ == "__main__":
    key = jax.random.PRNGKey(0)
    pkey, xkey = jax.random.split(key)
    params = init_params(pkey)
    x = jax.random.normal(xkey, (2, IN_CH, IMG, IMG), dtype=jnp.float32)
    out = swinv2_classifier_forward(params, x)
    jax.block_until_ready(out)
    assert out.shape == (2, N_CLASSES), out.shape
    assert bool(jnp.all(jnp.isfinite(out))), "non-finite output"
    print("KERNEL_OK")
</pallas_src>

<mosaic_0001>
module attributes {stable_mosaic.version = 11 : i64} {
  func.func @_patch_embed_kernel(%arg0: memref<32x16xf32, #tpu.memory_space<vmem>>, %arg1: memref<16x32xbf16, #tpu.memory_space<vmem>>, %arg2: memref<1x32xf32, #tpu.memory_space<vmem>>, %arg3: memref<1x32xf32, #tpu.memory_space<vmem>>, %arg4: memref<1x32xf32, #tpu.memory_space<vmem>>, %arg5: memref<32x32xf32, #tpu.memory_space<vmem>>) attributes {dimension_semantics = [], scalar_prefetch = 0 : i64, scratch_operands = 0 : i64, tpu.core_type = #tpu.core_type<tc>} {
    %c0 = arith.constant 0 : index
    %c0_0 = arith.constant 0 : index
    %0 = vector.load %arg0[%c0, %c0_0] : memref<32x16xf32, #tpu.memory_space<vmem>>, vector<32x16xf32>
    %1 = arith.truncf %0 : vector<32x16xf32> to vector<32x16xbf16>
    %c0_1 = arith.constant 0 : index
    %c0_2 = arith.constant 0 : index
    %2 = vector.load %arg1[%c0_1, %c0_2] : memref<16x32xbf16, #tpu.memory_space<vmem>>, vector<16x32xbf16>
    %cst = arith.constant dense<0.000000e+00> : vector<32x32xf32>
    %3 = tpu.matmul %1, %2, %cst {dimension_numbers = #tpu.dot_dimension_numbers<[1], [0], [0], [1], [0, 0, 1, 1], [], []>} : vector<32x16xbf16>, vector<16x32xbf16>, vector<32x32xf32> -> vector<32x32xf32>
    %c0_3 = arith.constant 0 : index
    %c0_4 = arith.constant 0 : index
    %4 = vector.load %arg2[%c0_3, %c0_4] : memref<1x32xf32, #tpu.memory_space<vmem>>, vector<1x32xf32>
    %5 = vector.broadcast %4 : vector<1x32xf32> to vector<32x32xf32>
    %6 = arith.addf %3, %5 : vector<32x32xf32>
    %c0_5 = arith.constant 0 : index
    %c0_6 = arith.constant 0 : index
    %7 = vector.load %arg3[%c0_5, %c0_6] : memref<1x32xf32, #tpu.memory_space<vmem>>, vector<1x32xf32>
    %c0_7 = arith.constant 0 : index
    %c0_8 = arith.constant 0 : index
    %8 = vector.load %arg4[%c0_7, %c0_8] : memref<1x32xf32, #tpu.memory_space<vmem>>, vector<1x32xf32>
    %cst_9 = arith.constant dense<0.000000e+00> : vector<32xf32>
    %9 = vector.multi_reduction <add>, %6, %cst_9 [1] : vector<32x32xf32> to vector<32xf32>
    %10 = vector.shape_cast %9 : vector<32xf32> to vector<32x1xf32>
    %cst_10 = arith.constant 3.200000e+01 : f32
    %11 = vector.broadcast %cst_10 : f32 to vector<32x1xf32>
    %12 = arith.divf %10, %11 : vector<32x1xf32>
    %13 = vector.broadcast %12 : vector<32x1xf32> to vector<32x32xf32>
    %14 = arith.subf %6, %13 : vector<32x32xf32>
    %15 = arith.mulf %14, %14 : vector<32x32xf32>
    %cst_11 = arith.constant dense<0.000000e+00> : vector<32xf32>
    %16 = vector.multi_reduction <add>, %15, %cst_11 [1] : vector<32x32xf32> to vector<32xf32>
    %17 = vector.shape_cast %16 : vector<32xf32> to vector<32x1xf32>
    %cst_12 = arith.constant 3.200000e+01 : f32
    %18 = vector.broadcast %cst_12 : f32 to vector<32x1xf32>
    %19 = arith.divf %17, %18 : vector<32x1xf32>
    %cst_13 = arith.constant 9.99999974E-6 : f32
    %20 = vector.broadcast %cst_13 : f32 to vector<32x1xf32>
    %21 = arith.addf %19, %20 : vector<32x1xf32>
    %22 = math.rsqrt %21 : vector<32x1xf32>
    %23 = vector.broadcast %22 : vector<32x1xf32> to vector<32x32xf32>
    %24 = arith.mulf %14, %23 : vector<32x32xf32>
    %25 = vector.broadcast %7 : vector<1x32xf32> to vector<32x32xf32>
    %26 = arith.mulf %24, %25 : vector<32x32xf32>
    %27 = vector.broadcast %8 : vector<1x32xf32> to vector<32x32xf32>
    %28 = arith.addf %26, %27 : vector<32x32xf32>
    %c0_14 = arith.constant 0 : index
    %c0_15 = arith.constant 0 : index
    %29 = vector.load %arg5[%c0_14, %c0_15] : memref<32x32xf32, #tpu.memory_space<vmem>>, vector<32x32xf32>
    tpu.vector_store %arg5[%c0_14, %c0_15], %28 {strides = array<i32>} : memref<32x32xf32, #tpu.memory_space<vmem>>, vector<32x32xf32>,
    return
  }
}

module attributes {stable_mosaic.version = 11 : i64} {
  func.func @_swin_block_kernel(%arg0: i32, %arg1: memref<4x4x32xf32, #tpu.memory_space<vmem>>, %arg2: memref<32x96xbf16, #tpu.memory_space<vmem>>, %arg3: memref<1x96xf32, #tpu.memory_space<vmem>>, %arg4: memref<32x32xbf16, #tpu.memory_space<vmem>>, %arg5: memref<1x32xf32, #tpu.memory_space<vmem>>, %arg6: memref<2x1x1xf32, #tpu.memory_space<vmem>>, %arg7: memref<2x4x4xf32, #tpu.memory_space<vmem>>, %arg8: memref<1x32xf32, #tpu.memory_space<vmem>>, %arg9: memref<1x32xf32, #tpu.memory_space<vmem>>, %arg10: memref<32x128xbf16, #tpu.memory_space<vmem>>, %arg11: memref<1x128xf32, #tpu.memory_space<vmem>>, %arg12: memref<128x32xbf16, #tpu.memory_space<vmem>>, %arg13: memref<1x32xf32, #tpu.memory_space<vmem>>, %arg14: memref<1x32xf32, #tpu.memory_space<vmem>>, %arg15: memref<1x32xf32, #tpu.memory_space<vmem>>, %arg16: memref<4x4x32xf32, #tpu.memory_space<vmem>>) attributes {dimension_semantics = [#tpu.dimension_semantics<parallel>], iteration_bounds = array<i64: 2>, scalar_prefetch = 0 : i64, scratch_operands = 0 : i64, tpu.core_type = #tpu.core_type<tc>, window_params = [{transform_indices = @transform_0, window_bounds = array<i64: 4, 4, 32>}, {pipeline_mode = #tpu.pipeline_mode<synchronous>, transform_indices = @transform_1, window_bounds = array<i64: 32, 96>}, {pipeline_mode = #tpu.pipeline_mode<synchronous>, transform_indices = @transform_2, window_bounds = array<i64: 1, 96>}, {pipeline_mode = #tpu.pipeline_mode<synchronous>, transform_indices = @transform_3, window_bounds = array<i64: 32, 32>}, {pipeline_mode = #tpu.pipeline_mode<synchronous>, transform_indices = @transform_4, window_bounds = array<i64: 1, 32>}, {pipeline_mode = #tpu.pipeline_mode<synchronous>, transform_indices = @transform_5, window_bounds = array<i64: 2, 1, 1>}, {pipeline_mode = #tpu.pipeline_mode<synchronous>, transform_indices = @transform_6, window_bounds = array<i64: 2, 4, 4>}, {pipeline_mode = #tpu.pipeline_mode<synchronous>, transform_indices = @transform_7, window_bounds = array<i64: 1, 32>}, {pipeline_mode = #tpu.pipeline_mode<synchronous>, transform_indices = @transform_8, window_bounds = array<i64: 1, 32>}, {pipeline_mode = #tpu.pipeline_mode<synchronous>, transform_indices = @transform_9, window_bounds = array<i64: 32, 128>}, {pipeline_mode = #tpu.pipeline_mode<synchronous>, transform_indices = @transform_10, window_bounds = array<i64: 1, 128>}, {pipeline_mode = #tpu.pipeline_mode<synchronous>, transform_indices = @transform_11, window_bounds = array<i64: 128, 32>}, {pipeline_mode = #tpu.pipeline_mode<synchronous>, transform_indices = @transform_12, window_bounds = array<i64: 1, 32>}, {pipeline_mode = #tpu.pipeline_mode<synchronous>, transform_indices = @transform_13, window_bounds = array<i64: 1, 32>}, {pipeline_mode = #tpu.pipeline_mode<synchronous>, transform_indices = @transform_14, window_bounds = array<i64: 1, 32>}, {transform_indices = @transform_15, window_bounds = array<i64: 4, 4, 32>}]} {
    %c0 = arith.constant 0 : index
    %c0_0 = arith.constant 0 : index
    %c0_1 = arith.constant 0 : index
    %0 = vector.load %arg1[%c0, %c0_0, %c0_1] : memref<4x4x32xf32, #tpu.memory_space<vmem>>, vector<4x4x32xf32>
    %1 = vector.shape_cast %0 : vector<4x4x32xf32> to vector<16x32xf32>
    %2 = arith.truncf %1 : vector<16x32xf32> to vector<16x32xbf16>
    %c0_2 = arith.constant 0 : index
    %c0_3 = arith.constant 0 : index
    %3 = vector.load %arg2[%c0_2, %c0_3] : memref<32x96xbf16, #tpu.memory_space<vmem>>, vector<32x96xbf16>
    %cst = arith.constant dense<0.000000e+00> : vector<16x96xf32>
    %4 = tpu.matmul %2, %3, %cst {dimension_numbers = #tpu.dot_dimension_numbers<[1], [0], [0], [1], [0, 0, 1, 1], [], []>} : vector<16x32xbf16>, vector<32x96xbf16>, vector<16x96xf32> -> vector<16x96xf32>
    %c0_4 = arith.constant 0 : index
    %c0_5 = arith.constant 0 : index
    %5 = vector.load %arg3[%c0_4, %c0_5] : memref<1x96xf32, #tpu.memory_space<vmem>>, vector<1x96xf32>
    %6 = vector.broadcast %5 : vector<1x96xf32> to vector<16x96xf32>
    %7 = arith.addf %4, %6 : vector<16x96xf32>
    %8 = vector.extract_strided_slice %7 {offsets = [0, 0], sizes = [16, 16], strides = [1, 1]} : vector<16x96xf32> to vector<16x16xf32>
    %9 = vector.shape_cast %8 : vector<16x16xf32> to vector<4x4x16xf32>
    %10 = vector.extract_strided_slice %7 {offsets = [0, 32], sizes = [16, 16], strides = [1, 1]} : vector<16x96xf32> to vector<16x16xf32>
    %11 = vector.shape_cast %10 : vector<16x16xf32> to vector<4x4x16xf32>
    %12 = vector.extract_strided_slice %7 {offsets = [0, 64], sizes = [16, 16], strides = [1, 1]} : vector<16x96xf32> to vector<16x16xf32>
    %13 = vector.shape_cast %12 : vector<16x16xf32> to vector<4x4x16xf32>
    %14 = arith.mulf %9, %9 : vector<4x4x16xf32>
    %cst_6 = arith.constant dense<0.000000e+00> : vector<4x4xf32>
    %15 = vector.multi_reduction <add>, %14, %cst_6 [2] : vector<4x4x16xf32> to vector<4x4xf32>
    %16 = vector.shape_cast %15 : vector<4x4xf32> to vector<4x4x1xf32>
    %cst_7 = arith.constant 9.99999996E-13 : f32
    %17 = vector.broadcast %cst_7 : f32 to vector<4x4x1xf32>
    %18 = arith.addf %16, %17 : vector<4x4x1xf32>
    %19 = math.rsqrt %18 : vector<4x4x1xf32>
    %20 = vector.broadcast %19 : vector<4x4x1xf32> to vector<4x4x16xf32>
    %21 = arith.mulf %9, %20 : vector<4x4x16xf32>
    %c0_8 = arith.constant 0 : index
    %c0_9 = arith.constant 0 : index
    %c0_10 = arith.constant 0 : index
    %22 = vector.load %arg6[%c0_8, %c0_9, %c0_10] : memref<2x1x1xf32, #tpu.memory_space<vmem>>, vector<1x1x1xf32>
    %23 = vector.shape_cast %22 : vector<1x1x1xf32> to vector<1x1xf32>
    %24 = vector.shape_cast %23 : vector<1x1xf32> to vector<1x1x1xf32>
    %25 = vector.broadcast %24 : vector<1x1x1xf32> to vector<4x4x16xf32>
    %26 = arith.mulf %21, %25 : vector<4x4x16xf32>
    %27 = arith.mulf %11, %11 : vector<4x4x16xf32>
    %cst_11 = arith.constant dense<0.000000e+00> : vector<4x4xf32>
    %28 = vector.multi_reduction <add>, %27, %cst_11 [2] : vector<4x4x16xf32> to vector<4x4xf32>
    %29 = vector.shape_cast %28 : vector<4x4xf32> to vector<4x4x1xf32>
    %cst_12 = arith.constant 9.99999996E-13 : f32
    %30 = vector.broadcast %cst_12 : f32 to vector<4x4x1xf32>
    %31 = arith.addf %29, %30 : vector<4x4x1xf32>
    %32 = math.rsqrt %31 : vector<4x4x1xf32>
    %33 = vector.broadcast %32 : vector<4x4x1xf32> to vector<4x4x16xf32>
    %34 = arith.mulf %11, %33 : vector<4x4x16xf32>
    "tpu.trace_start"() <{level = 10 : i32, message = "wtd,wsd->wts"}> : () -> ()
    %cst_13 = arith.constant dense<0.000000e+00> : vector<4x4x4xf32>
    %35 = tpu.matmul %26, %34, %cst_13 {dimension_numbers = #tpu.dot_dimension_numbers<[2], [2], [1], [1], [0, 0, 0, 1, 1, 1], [0], [0]>} : vector<4x4x16xf32>, vector<4x4x16xf32>, vector<4x4x4xf32> -> vector<4x4x4xf32>
    "tpu.trace_stop"() : () -> ()
    %c0_14 = arith.constant 0 : index
    %c0_15 = arith.constant 0 : index
    %c0_16 = arith.constant 0 : index
    %36 = vector.load %arg7[%c0_14, %c0_15, %c0_16] : memref<2x4x4xf32, #tpu.memory_space<vmem>>, vector<1x4x4xf32>
    %37 = vector.shape_cast %36 : vector<1x4x4xf32> to vector<4x4xf32>
    %38 = vector.shape_cast %37 : vector<4x4xf32> to vector<1x4x4xf32>
    %39 = vector.broadcast %38 : vector<1x4x4xf32> to vector<4x4x4xf32>
    %40 = arith.addf %35, %39 : vector<4x4x4xf32>
    %cst_17 = arith.constant dense<0xFF800000> : vector<4x4xf32>
    %41 = vector.multi_reduction <maximumf>, %40, %cst_17 [2] : vector<4x4x4xf32> to vector<4x4xf32>
    %42 = vector.shape_cast %41 : vector<4x4xf32> to vector<4x4x1xf32>
    %43 = vector.broadcast %42 : vector<4x4x1xf32> to vector<4x4x4xf32>
    %44 = arith.subf %40, %43 : vector<4x4x4xf32>
    %45 = math.exp %44 : vector<4x4x4xf32>
    %cst_18 = arith.constant dense<0.000000e+00> : vector<4x4xf32>
    %46 = vector.multi_reduction <add>, %45, %cst_18 [2] : vector<4x4x4xf32> to vector<4x4xf32>
    %47 = vector.shape_cast %46 : vector<4x4xf32> to vector<4x4x1xf32>
    %48 = vector.broadcast %47 : vector<4x4x1xf32> to vector<4x4x4xf32>
    %49 = arith.divf %45, %48 : vector<4x4x4xf32>
    "tpu.trace_start"() <{level = 10 : i32, message = "wts,wsd->wtd"}> : () -> ()
    %cst_19 = arith.constant dense<0.000000e+00> : vector<4x4x16xf32>
    %50 = tpu.matmul %49, %13, %cst_19 {dimension_numbers = #tpu.dot_dimension_numbers<[2], [1], [1], [2], [0, 0, 0, 1, 1, 2], [0], [0]>} : vector<4x4x4xf32>, vector<4x4x16xf32>, vector<4x4x16xf32> -> vector<4x4x16xf32>
    "tpu.trace_stop"() : () -> ()
    %51 = vector.extract_strided_slice %7 {offsets = [0, 16], sizes = [16, 16], strides = [1, 1]} : vector<16x96xf32> to vector<16x16xf32>
    %52 = vector.shape_cast %51 : vector<16x16xf32> to vector<4x4x16xf32>
    %53 = vector.extract_strided_slice %7 {offsets = [0, 48], sizes = [16, 16], strides = [1, 1]} : vector<16x96xf32> to vector<16x16xf32>
    %54 = vector.shape_cast %53 : vector<16x16xf32> to vector<4x4x16xf32>
    %55 = vector.extract_strided_slice %7 {offsets = [0, 80], sizes = [16, 16], strides = [1, 1]} : vector<16x96xf32> to vector<16x16xf32>
    %56 = vector.shape_cast %55 : vector<16x16xf32> to vector<4x4x16xf32>
    %57 = arith.mulf %52, %52 : vector<4x4x16xf32>
    %cst_20 = arith.constant dense<0.000000e+00> : vector<4x4xf32>
    %58 = vector.multi_reduction <add>, %57, %cst_20 [2] : vector<4x4x16xf32> to vector<4x4xf32>
    %59 = vector.shape_cast %58 : vector<4x4xf32> to vector<4x4x1xf32>
    %cst_21 = arith.constant 9.99999996E-13 : f32
    %60 = vector.broadcast %cst_21 : f32 to vector<4x4x1xf32>
    %61 = arith.addf %59, %60 : vector<4x4x1xf32>
    %62 = math.rsqrt %61 : vector<4x4x1xf32>
    %63 = vector.broadcast %62 : vector<4x4x1xf32> to vector<4x4x16xf32>
    %64 = arith.mulf %52, %63 : vector<4x4x16xf32>
    %c1 = arith.constant 1 : index
    %c0_22 = arith.constant 0 : index
    %c0_23 = arith.constant 0 : index
    %65 = vector.load %arg6[%c1, %c0_22, %c0_23] : memref<2x1x1xf32, #tpu.memory_space<vmem>>, vector<1x1x1xf32>
    %66 = vector.shape_cast %65 : vector<1x1x1xf32> to vector<1x1xf32>
    %67 = vector.shape_cast %66 : vector<1x1xf32> to vector<1x1x1xf32>
    %68 = vector.broadcast %67 : vector<1x1x1xf32> to vector<4x4x16xf32>
    %69 = arith.mulf %64, %68 : vector<4x4x16xf32>
    %70 = arith.mulf %54, %54 : vector<4x4x16xf32>
    %cst_24 = arith.constant dense<0.000000e+00> : vector<4x4xf32>
    %71 = vector.multi_reduction <add>, %70, %cst_24 [2] : vector<4x4x16xf32> to vector<4x4xf32>
    %72 = vector.shape_cast %71 : vector<4x4xf32> to vector<4x4x1xf32>
    %cst_25 = arith.constant 9.99999996E-13 : f32
    %73 = vector.broadcast %cst_25 : f32 to vector<4x4x1xf32>
    %74 = arith.addf %72, %73 : vector<4x4x1xf32>
    %75 = math.rsqrt %74 : vector<4x4x1xf32>
    %76 = vector.broadcast %75 : vector<4x4x1xf32> to vector<4x4x16xf32>
    %77 = arith.mulf %54, %76 : vector<4x4x16xf32>
    "tpu.trace_start"() <{level = 10 : i32, message = "wtd,wsd->wts"}> : () -> ()
    %cst_26 = arith.constant dense<0.000000e+00> : vector<4x4x4xf32>
    %78 = tpu.matmul %69, %77, %cst_26 {dimension_numbers = #tpu.dot_dimension_numbers<[2], [2], [1], [1], [0, 0, 0, 1, 1, 1], [0], [0]>} : vector<4x4x16xf32>, vector<4x4x16xf32>, vector<4x4x4xf32> -> vector<4x4x4xf32>
    "tpu.trace_stop"() : () -> ()
    %c1_27 = arith.constant 1 : index
    %c0_28 = arith.constant 0 : index
    %c0_29 = arith.constant 0 : index
    %79 = vector.load %arg7[%c1_27, %c0_28, %c0_29] : memref<2x4x4xf32, #tpu.memory_space<vmem>>, vector<1x4x4xf32>
    %80 = vector.shape_cast %79 : vector<1x4x4xf32> to vector<4x4xf32>
    %81 = vector.shape_cast %80 : vector<4x4xf32> to vector<1x4x4xf32>
    %82 = vector.broadcast %81 : vector<1x4x4xf32> to vector<4x4x4xf32>
    %83 = arith.addf %78, %82 : vector<4x4x4xf32>
    %cst_30 = arith.constant dense<0xFF800000> : vector<4x4xf32>
    %84 = vector.multi_reduction <maximumf>, %83, %cst_30 [2] : vector<4x4x4xf32> to vector<4x4xf32>
    %85 = vector.shape_cast %84 : vector<4x4xf32> to vector<4x4x1xf32>
    %86 = vector.broadcast %85 : vector<4x4x1xf32> to vector<4x4x4xf32>
    %87 = arith.subf %83, %86 : vector<4x4x4xf32>
    %88 = math.exp %87 : vector<4x4x4xf32>
    %cst_31 = arith.constant dense<0.000000e+00> : vector<4x4xf32>
    %89 = vector.multi_reduction <add>, %88, %cst_31 [2] : vector<4x4x4xf32> to vector<4x4xf32>
    %90 = vector.shape_cast %89 : vector<4x4xf32> to vector<4x4x1xf32>
    %91 = vector.broadcast %90 : vector<4x4x1xf32> to vector<4x4x4xf32>
    %92 = arith.divf %88, %91 : vector<4x4x4xf32>
    "tpu.trace_start"() <{level = 10 : i32, message = "wts,wsd->wtd"}> : () -> ()
    %cst_32 = arith.constant dense<0.000000e+00> : vector<4x4x16xf32>
    %93 = tpu.matmul %92, %56, %cst_32 {dimension_numbers = #tpu.dot_dimension_numbers<[2], [1], [1], [2], [0, 0, 0, 1, 1, 2], [0], [0]>} : vector<4x4x4xf32>, vector<4x4x16xf32>, vector<4x4x16xf32> -> vector<4x4x16xf32>
    "tpu.trace_stop"() : () -> ()
    %94 = tpu.concatenate %50, %93 in 2 : vector<4x4x16xf32>, vector<4x4x16xf32> -> vector<4x4x32xf32>
    %95 = vector.shape_cast %94 : vector<4x4x32xf32> to vector<16x32xf32>
    %96 = arith.truncf %95 : vector<16x32xf32> to vector<16x32xbf16>
    %c0_33 = arith.constant 0 : index
    %c0_34 = arith.constant 0 : index
    %97 = vector.load %arg4[%c0_33, %c0_34] : memref<32x32xbf16, #tpu.memory_space<vmem>>, vector<32x32xbf16>
    %cst_35 = arith.constant dense<0.000000e+00> : vector<16x32xf32>
    %98 = tpu.matmul %96, %97, %cst_35 {dimension_numbers = #tpu.dot_dimension_numbers<[1], [0], [0], [1], [0, 0, 1, 1], [], []>} : vector<16x32xbf16>, vector<32x32xbf16>, vector<16x32xf32> -> vector<16x32xf32>
    %c0_36 = arith.constant 0 : index
    %c0_37 = arith.constant 0 : index
    %99 = vector.load %arg5[%c0_36, %c0_37] : memref<1x32xf32, #tpu.memory_space<vmem>>, vector<1x32xf32>
    %100 = vector.broadcast %99 : vector<1x32xf32> to vector<16x32xf32>
    %101 = arith.addf %98, %100 : vector<16x32xf32>
    %c0_38 = arith.constant 0 : index
    %c0_39 = arith.constant 0 : index
    %102 = vector.load %arg8[%c0_38, %c0_39] : memref<1x32xf32, #tpu.memory_space<vmem>>, vector<1x32xf32>
    %c0_40 = arith.constant 0 : index
    %c0_41 = arith.constant 0 : index
    %103 = vector.load %arg9[%c0_40, %c0_41] : memref<1x32xf32, #tpu.memory_space<vmem>>, vector<1x32xf32>
    %cst_42 = arith.constant dense<0.000000e+00> : vector<16xf32>
    %104 = vector.multi_reduction <add>, %101, %cst_42 [1] : vector<16x32xf32> to vector<16xf32>
    %105 = vector.shape_cast %104 : vector<16xf32> to vector<16x1xf32>
    %cst_43 = arith.constant 3.200000e+01 : f32
    %106 = vector.broadcast %cst_43 : f32 to vector<16x1xf32>
    %107 = arith.divf %105, %106 : vector<16x1xf32>
    %108 = vector.broadcast %107 : vector<16x1xf32> to vector<16x32xf32>
    %109 = arith.subf %101, %108 : vector<16x32xf32>
    %110 = arith.mulf %109, %109 : vector<16x32xf32>
    %cst_44 = arith.constant dense<0.000000e+00> : vector<16xf32>
    %111 = vector.multi_reduction <add>, %110, %cst_44 [1] : vector<16x32xf32> to vector<16xf32>
    %112 = vector.shape_cast %111 : vector<16xf32> to vector<16x1xf32>
    %cst_45 = arith.constant 3.200000e+01 : f32
    %113 = vector.broadcast %cst_45 : f32 to vector<16x1xf32>
    %114 = arith.divf %112, %113 : vector<16x1xf32>
    %cst_46 = arith.constant 9.99999974E-6 : f32
    %115 = vector.broadcast %cst_46 : f32 to vector<16x1xf32>
    %116 = arith.addf %114, %115 : vector<16x1xf32>
    %117 = math.rsqrt %116 : vector<16x1xf32>
    %118 = vector.broadcast %117 : vector<16x1xf32> to vector<16x32xf32>
    %119 = arith.mulf %109, %118 : vector<16x32xf32>
    %120 = vector.broadcast %102 : vector<1x32xf32> to vector<16x32xf32>
    %121 = arith.mulf %119, %120 : vector<16x32xf32>
    %122 = vector.broadcast %103 : vector<1x32xf32> to vector<16x32xf32>
    %123 = arith.addf %121, %122 : vector<16x32xf32>
    %124 = arith.addf %1, %123 : vector<16x32xf32>
    %125 = arith.truncf %124 : vector<16x32xf32> to vector<16x32xbf16>
    %c0_47 = arith.constant 0 : index
    %c0_48 = arith.constant 0 : index
    %126 = vector.load %arg10[%c0_47, %c0_48] : memref<32x128xbf16, #tpu.memory_space<vmem>>, vector<32x128xbf16>
    %cst_49 = arith.constant dense<0.000000e+00> : vector<16x128xf32>
    %127 = tpu.matmul %125, %126, %cst_49 {dimension_numbers = #tpu.dot_dimension_numbers<[1], [0], [0], [1], [0, 0, 1, 1], [], []>} : vector<16x32xbf16>, vector<32x128xbf16>, vector<16x128xf32> -> vector<16x128xf32>
    %c0_50 = arith.constant 0 : index
    %c0_51 = arith.constant 0 : index
    %128 = vector.load %arg11[%c0_50, %c0_51] : memref<1x128xf32, #tpu.memory_space<vmem>>, vector<1x128xf32>
    %129 = vector.broadcast %128 : vector<1x128xf32> to vector<16x128xf32>
    %130 = arith.addf %127, %129 : vector<16x128xf32>
    %131 = arith.mulf %130, %130 : vector<16x128xf32>
    %132 = arith.mulf %130, %131 : vector<16x128xf32>
    %cst_52 = arith.constant 4.471500e-02 : f32
    %133 = vector.broadcast %cst_52 : f32 to vector<16x128xf32>
    %134 = arith.mulf %133, %132 : vector<16x128xf32>
    %135 = arith.addf %130, %134 : vector<16x128xf32>
    %cst_53 = arith.constant 0.797884583 : f32
    %136 = vector.broadcast %cst_53 : f32 to vector<16x128xf32>
    %137 = arith.mulf %136, %135 : vector<16x128xf32>
    %138 = math.tanh %137 : vector<16x128xf32>
    %cst_54 = arith.constant 1.000000e+00 : f32
    %139 = vector.broadcast %cst_54 : f32 to vector<16x128xf32>
    %140 = arith.addf %139, %138 : vector<16x128xf32>
    %cst_55 = arith.constant 5.000000e-01 : f32
    %141 = vector.broadcast %cst_55 : f32 to vector<16x128xf32>
    %142 = arith.mulf %141, %140 : vector<16x128xf32>
    %143 = arith.mulf %130, %142 : vector<16x128xf32>
    %144 = arith.truncf %143 : vector<16x128xf32> to vector<16x128xbf16>
    %c0_56 = arith.constant 0 : index
    %c0_57 = arith.constant 0 : index
    %145 = vector.load %arg12[%c0_56, %c0_57] : memref<128x32xbf16, #tpu.memory_space<vmem>>, vector<128x32xbf16>
    %cst_58 = arith.constant dense<0.000000e+00> : vector<16x32xf32>
    %146 = tpu.matmul %144, %145, %cst_58 {dimension_numbers = #tpu.dot_dimension_numbers<[1], [0], [0], [1], [0, 0, 1, 1], [], []>} : vector<16x128xbf16>, vector<128x32xbf16>, vector<16x32xf32> -> vector<16x32xf32>
    %c0_59 = arith.constant 0 : index
    %c0_60 = arith.constant 0 : index
    %147 = vector.load %arg13[%c0_59, %c0_60] : memref<1x32xf32, #tpu.memory_space<vmem>>, vector<1x32xf32>
    %148 = vector.broadcast %147 : vector<1x32xf32> to vector<16x32xf32>
    %149 = arith.addf %146, %148 : vector<16x32xf32>
    %c0_61 = arith.constant 0 : index
    %c0_62 = arith.constant 0 : index
    %150 = vector.load %arg14[%c0_61, %c0_62] : memref<1x32xf32, #tpu.memory_space<vmem>>, vector<1x32xf32>
    %c0_63 = arith.constant 0 : index
    %c0_64 = arith.constant 0 : index
    %151 = vector.load %arg15[%c0_63, %c0_64] : memref<1x32xf32, #tpu.memory_space<vmem>>, vector<1x32xf32>
    %cst_65 = arith.constant dense<0.000000e+00> : vector<16xf32>
    %152 = vector.multi_reduction <add>, %149, %cst_65 [1] : vector<16x32xf32> to vector<16xf32>
    %153 = vector.shape_cast %152 : vector<16xf32> to vector<16x1xf32>
    %cst_66 = arith.constant 3.200000e+01 : f32
    %154 = vector.broadcast %cst_66 : f32 to vector<16x1xf32>
    %155 = arith.divf %153, %154 : vector<16x1xf32>
    %156 = vector.broadcast %155 : vector<16x1xf32> to vector<16x32xf32>
    %157 = arith.subf %149, %156 : vector<16x32xf32>
    %158 = arith.mulf %157, %157 : vector<16x32xf32>
    %cst_67 = arith.constant dense<0.000000e+00> : vector<16xf32>
    %159 = vector.multi_reduction <add>, %158, %cst_67 [1] : vector<16x32xf32> to vector<16xf32>
    %160 = vector.shape_cast %159 : vector<16xf32> to vector<16x1xf32>
    %cst_68 = arith.constant 3.200000e+01 : f32
    %161 = vector.broadcast %cst_68 : f32 to vector<16x1xf32>
    %162 = arith.divf %160, %161 : vector<16x1xf32>
    %cst_69 = arith.constant 9.99999974E-6 : f32
    %163 = vector.broadcast %cst_69 : f32 to vector<16x1xf32>
    %164 = arith.addf %162, %163 : vector<16x1xf32>
    %165 = math.rsqrt %164 : vector<16x1xf32>
    %166 = vector.broadcast %165 : vector<16x1xf32> to vector<16x32xf32>
    %167 = arith.mulf %157, %166 : vector<16x32xf32>
    %168 = vector.broadcast %150 : vector<1x32xf32> to vector<16x32xf32>
    %169 = arith.mulf %167, %168 : vector<16x32xf32>
    %170 = vector.broadcast %151 : vector<1x32xf32> to vector<16x32xf32>
    %171 = arith.addf %169, %170 : vector<16x32xf32>
    %172 = arith.addf %124, %171 : vector<16x32xf32>
    %173 = vector.shape_cast %172 : vector<16x32xf32> to vector<4x4x32xf32>
    %c0_70 = arith.constant 0 : index
    %c0_71 = arith.constant 0 : index
    %c0_72 = arith.constant 0 : index
    %174 = vector.load %arg16[%c0_70, %c0_71, %c0_72] : memref<4x4x32xf32, #tpu.memory_space<vmem>>, vector<4x4x32xf32>
    tpu.vector_store %arg16[%c0_70, %c0_71, %c0_72], %173 {strides = array<i32>} : memref<4x4x32xf32, #tpu.memory_space<vmem>>, vector<4x4x32xf32>,
    return
  }
  func.func @transform_0(%arg0: i32) -> (i32, i32, i32) {
    %c0_i32 = arith.constant 0 : i32
    %c0_i32_0 = arith.constant 0 : i32
    %c0_i32_1 = arith.constant 0 : i32
    return %arg0, %c0_i32, %c0_i32_0 : i32, i32, i32
  }
  func.func @transform_1(%arg0: i32) -> (i32, i32) {
    %c0_i32 = arith.constant 0 : i32
    %c0_i32_0 = arith.constant 0 : i32
    %c0_i32_1 = arith.constant 0 : i32
    return %c0_i32, %c0_i32_0 : i32, i32
  }
  func.func @transform_2(%arg0: i32) -> (i32, i32) {
    %c0_i32 = arith.constant 0 : i32
    %c0_i32_0 = arith.constant 0 : i32
    %c0_i32_1 = arith.constant 0 : i32
    return %c0_i32, %c0_i32_0 : i32, i32
  }
  func.func @transform_3(%arg0: i32) -> (i32, i32) {
    %c0_i32 = arith.constant 0 : i32
    %c0_i32_0 = arith.constant 0 : i32
    %c0_i32_1 = arith.constant 0 : i32
    return %c0_i32, %c0_i32_0 : i32, i32
  }
  func.func @transform_4(%arg0: i32) -> (i32, i32) {
    %c0_i32 = arith.constant 0 : i32
    %c0_i32_0 = arith.constant 0 : i32
    %c0_i32_1 = arith.constant 0 : i32
    return %c0_i32, %c0_i32_0 : i32, i32
  }
  func.func @transform_5(%arg0: i32) -> (i32, i32, i32) {
    %c0_i32 = arith.constant 0 : i32
    %c0_i32_0 = arith.constant 0 : i32
    %c0_i32_1 = arith.constant 0 : i32
    %c0_i32_2 = arith.constant 0 : i32
    return %c0_i32, %c0_i32_0, %c0_i32_1 : i32, i32, i32
  }
  func.func @transform_6(%arg0: i32) -> (i32, i32, i32) {
    %c0_i32 = arith.constant 0 : i32
    %c0_i32_0 = arith.constant 0 : i32
    %c0_i32_1 = arith.constant 0 : i32
    %c0_i32_2 = arith.constant 0 : i32
    return %c0_i32, %c0_i32_0, %c0_i32_1 : i32, i32, i32
  }
  func.func @transform_7(%arg0: i32) -> (i32, i32) {
    %c0_i32 = arith.constant 0 : i32
    %c0_i32_0 = arith.constant 0 : i32
    %c0_i32_1 = arith.constant 0 : i32
    return %c0_i32, %c0_i32_0 : i32, i32
  }
  func.func @transform_8(%arg0: i32) -> (i32, i32) {
    %c0_i32 = arith.constant 0 : i32
    %c0_i32_0 = arith.constant 0 : i32
    %c0_i32_1 = arith.constant 0 : i32
    return %c0_i32, %c0_i32_0 : i32, i32
  }
  func.func @transform_9(%arg0: i32) -> (i32, i32) {
    %c0_i32 = arith.constant 0 : i32
    %c0_i32_0 = arith.constant 0 : i32
    %c0_i32_1 = arith.constant 0 : i32
    return %c0_i32, %c0_i32_0 : i32, i32
  }
  func.func @transform_10(%arg0: i32) -> (i32, i32) {
    %c0_i32 = arith.constant 0 : i32
    %c0_i32_0 = arith.constant 0 : i32
    %c0_i32_1 = arith.constant 0 : i32
    return %c0_i32, %c0_i32_0 : i32, i32
  }
  func.func @transform_11(%arg0: i32) -> (i32, i32) {
    %c0_i32 = arith.constant 0 : i32
    %c0_i32_0 = arith.constant 0 : i32
    %c0_i32_1 = arith.constant 0 : i32
    return %c0_i32, %c0_i32_0 : i32, i32
  }
  func.func @transform_12(%arg0: i32) -> (i32, i32) {
    %c0_i32 = arith.constant 0 : i32
    %c0_i32_0 = arith.constant 0 : i32
    %c0_i32_1 = arith.constant 0 : i32
    return %c0_i32, %c0_i32_0 : i32, i32
  }
  func.func @transform_13(%arg0: i32) -> (i32, i32) {
    %c0_i32 = arith.constant 0 : i32
    %c0_i32_0 = arith.constant 0 : i32
    %c0_i32_1 = arith.constant 0 : i32
    return %c0_i32, %c0_i32_0 : i32, i32
  }
  func.func @transform_14(%arg0: i32) -> (i32, i32) {
    %c0_i32 = arith.constant 0 : i32
    %c0_i32_0 = arith.constant 0 : i32
    %c0_i32_1 = arith.constant 0 : i32
    return %c0_i32, %c0_i32_0 : i32, i32
  }
  func.func @transform_15(%arg0: i32) -> (i32, i32, i32) {
    %c0_i32 = arith.constant 0 : i32
    %c0_i32_0 = arith.constant 0 : i32
    %c0_i32_1 = arith.constant 0 : i32
    return %arg0, %c0_i32, %c0_i32_0 : i32, i32, i32
  }
}

module attributes {stable_mosaic.version = 11 : i64} {
  func.func @_patch_merge_kernel(%arg0: memref<8x128xf32, #tpu.memory_space<vmem>>, %arg1: memref<1x128xf32, #tpu.memory_space<vmem>>, %arg2: memref<1x128xf32, #tpu.memory_space<vmem>>, %arg3: memref<128x64xbf16, #tpu.memory_space<vmem>>, %arg4: memref<8x64xf32, #tpu.memory_space<vmem>>) attributes {dimension_semantics = [], scalar_prefetch = 0 : i64, scratch_operands = 0 : i64, tpu.core_type = #tpu.core_type<tc>} {
    %c0 = arith.constant 0 : index
    %c0_0 = arith.constant 0 : index
    %0 = vector.load %arg0[%c0, %c0_0] : memref<8x128xf32, #tpu.memory_space<vmem>>, vector<8x128xf32>
    %c0_1 = arith.constant 0 : index
    %c0_2 = arith.constant 0 : index
    %1 = vector.load %arg1[%c0_1, %c0_2] : memref<1x128xf32, #tpu.memory_space<vmem>>, vector<1x128xf32>
    %c0_3 = arith.constant 0 : index
    %c0_4 = arith.constant 0 : index
    %2 = vector.load %arg2[%c0_3, %c0_4] : memref<1x128xf32, #tpu.memory_space<vmem>>, vector<1x128xf32>
    %cst = arith.constant dense<0.000000e+00> : vector<8xf32>
    %3 = vector.multi_reduction <add>, %0, %cst [1] : vector<8x128xf32> to vector<8xf32>
    %4 = vector.shape_cast %3 : vector<8xf32> to vector<8x1xf32>
    %cst_5 = arith.constant 1.280000e+02 : f32
    %5 = vector.broadcast %cst_5 : f32 to vector<8x1xf32>
    %6 = arith.divf %4, %5 : vector<8x1xf32>
    %7 = vector.broadcast %6 : vector<8x1xf32> to vector<8x128xf32>
    %8 = arith.subf %0, %7 : vector<8x128xf32>
    %9 = arith.mulf %8, %8 : vector<8x128xf32>
    %cst_6 = arith.constant dense<0.000000e+00> : vector<8xf32>
    %10 = vector.multi_reduction <add>, %9, %cst_6 [1] : vector<8x128xf32> to vector<8xf32>
    %11 = vector.shape_cast %10 : vector<8xf32> to vector<8x1xf32>
    %cst_7 = arith.constant 1.280000e+02 : f32
    %12 = vector.broadcast %cst_7 : f32 to vector<8x1xf32>
    %13 = arith.divf %11, %12 : vector<8x1xf32>
    %cst_8 = arith.constant 9.99999974E-6 : f32
    %14 = vector.broadcast %cst_8 : f32 to vector<8x1xf32>
    %15 = arith.addf %13, %14 : vector<8x1xf32>
    %16 = math.rsqrt %15 : vector<8x1xf32>
    %17 = vector.broadcast %16 : vector<8x1xf32> to vector<8x128xf32>
    %18 = arith.mulf %8, %17 : vector<8x128xf32>
    %19 = vector.broadcast %1 : vector<1x128xf32> to vector<8x128xf32>
    %20 = arith.mulf %18, %19 : vector<8x128xf32>
    %21 = vector.broadcast %2 : vector<1x128xf32> to vector<8x128xf32>
    %22 = arith.addf %20, %21 : vector<8x128xf32>
    %23 = arith.truncf %22 : vector<8x128xf32> to vector<8x128xbf16>
    %c0_9 = arith.constant 0 : index
    %c0_10 = arith.constant 0 : index
    %24 = vector.load %arg3[%c0_9, %c0_10] : memref<128x64xbf16, #tpu.memory_space<vmem>>, vector<128x64xbf16>
    %cst_11 = arith.constant dense<0.000000e+00> : vector<8x64xf32>
    %25 = tpu.matmul %23, %24, %cst_11 {dimension_numbers = #tpu.dot_dimension_numbers<[1], [0], [0], [1], [0, 0, 1, 1], [], []>} : vector<8x128xbf16>, vector<128x64xbf16>, vector<8x64xf32> -> vector<8x64xf32>
    %c0_12 = arith.constant 0 : index
    %c0_13 = arith.constant 0 : index
    %26 = vector.load %arg4[%c0_12, %c0_13] : memref<8x64xf32, #tpu.memory_space<vmem>>, vector<8x64xf32>
    tpu.vector_store %arg4[%c0_12, %c0_13], %25 {strides = array<i32>} : memref<8x64xf32, #tpu.memory_space<vmem>>, vector<8x64xf32>,
    return
  }
}

module attributes {stable_mosaic.version = 11 : i64} {
  func.func @_swin_block_kernel(%arg0: i32, %arg1: memref<2x4x64xf32, #tpu.memory_space<vmem>>, %arg2: memref<64x192xbf16, #tpu.memory_space<vmem>>, %arg3: memref<1x192xf32, #tpu.memory_space<vmem>>, %arg4: memref<64x64xbf16, #tpu.memory_space<vmem>>, %arg5: memref<1x64xf32, #tpu.memory_space<vmem>>, %arg6: memref<4x1x1xf32, #tpu.memory_space<vmem>>, %arg7: memref<4x4x4xf32, #tpu.memory_space<vmem>>, %arg8: memref<1x64xf32, #tpu.memory_space<vmem>>, %arg9: memref<1x64xf32, #tpu.memory_space<vmem>>, %arg10: memref<64x256xbf16, #tpu.memory_space<vmem>>, %arg11: memref<1x256xf32, #tpu.memory_space<vmem>>, %arg12: memref<256x64xbf16, #tpu.memory_space<vmem>>, %arg13: memref<1x64xf32, #tpu.memory_space<vmem>>, %arg14: memref<1x64xf32, #tpu.memory_space<vmem>>, %arg15: memref<1x64xf32, #tpu.memory_space<vmem>>, %arg16: memref<2x4x64xf32, #tpu.memory_space<vmem>>) attributes {dimension_semantics = [#tpu.dimension_semantics<parallel>], iteration_bounds = array<i64: 1>, scalar_prefetch = 0 : i64, scratch_operands = 0 : i64, tpu.core_type = #tpu.core_type<tc>, window_params = [{transform_indices = @transform_0, window_bounds = array<i64: 2, 4, 64>}, {pipeline_mode = #tpu.pipeline_mode<synchronous>, transform_indices = @transform_1, window_bounds = array<i64: 64, 192>}, {pipeline_mode = #tpu.pipeline_mode<synchronous>, transform_indices = @transform_2, window_bounds = array<i64: 1, 192>}, {pipeline_mode = #tpu.pipeline_mode<synchronous>, transform_indices = @transform_3, window_bounds = array<i64: 64, 64>}, {pipeline_mode = #tpu.pipeline_mode<synchronous>, transform_indices = @transform_4, window_bounds = array<i64: 1, 64>}, {pipeline_mode = #tpu.pipeline_mode<synchronous>, transform_indices = @transform_5, window_bounds = array<i64: 4, 1, 1>}, {pipeline_mode = #tpu.pipeline_mode<synchronous>, transform_indices = @transform_6, window_bounds = array<i64: 4, 4, 4>}, {pipeline_mode = #tpu.pipeline_mode<synchronous>, transform_indices = @transform_7, window_bounds = array<i64: 1, 64>}, {pipeline_mode = #tpu.pipeline_mode<synchronous>, transform_indices = @transform_8, window_bounds = array<i64: 1, 64>}, {pipeline_mode = #tpu.pipeline_mode<synchronous>, transform_indices = @transform_9, window_bounds = array<i64: 64, 256>}, {pipeline_mode = #tpu.pipeline_mode<synchronous>, transform_indices = @transform_10, window_bounds = array<i64: 1, 256>}, {pipeline_mode = #tpu.pipeline_mode<synchronous>, transform_indices = @transform_11, window_bounds = array<i64: 256, 64>}, {pipeline_mode = #tpu.pipeline_mode<synchronous>, transform_indices = @transform_12, window_bounds = array<i64: 1, 64>}, {pipeline_mode = #tpu.pipeline_mode<synchronous>, transform_indices = @transform_13, window_bounds = array<i64: 1, 64>}, {pipeline_mode = #tpu.pipeline_mode<synchronous>, transform_indices = @transform_14, window_bounds = array<i64: 1, 64>}, {transform_indices = @transform_15, window_bounds = array<i64: 2, 4, 64>}]} {
    %c0 = arith.constant 0 : index
    %c0_0 = arith.constant 0 : index
    %c0_1 = arith.constant 0 : index
    %0 = vector.load %arg1[%c0, %c0_0, %c0_1] : memref<2x4x64xf32, #tpu.memory_space<vmem>>, vector<2x4x64xf32>
    %1 = vector.shape_cast %0 : vector<2x4x64xf32> to vector<8x64xf32>
    %2 = arith.truncf %1 : vector<8x64xf32> to vector<8x64xbf16>
    %c0_2 = arith.constant 0 : index
    %c0_3 = arith.constant 0 : index
    %3 = vector.load %arg2[%c0_2, %c0_3] : memref<64x192xbf16, #tpu.memory_space<vmem>>, vector<64x192xbf16>
    %cst = arith.constant dense<0.000000e+00> : vector<8x192xf32>
    %4 = tpu.matmul %2, %3, %cst {dimension_numbers = #tpu.dot_dimension_numbers<[1], [0], [0], [1], [0, 0, 1, 1], [], []>} : vector<8x64xbf16>, vector<64x192xbf16>, vector<8x192xf32> -> vector<8x192xf32>
    %c0_4 = arith.constant 0 : index
    %c0_5 = arith.constant 0 : index
    %5 = vector.load %arg3[%c0_4, %c0_5] : memref<1x192xf32, #tpu.memory_space<vmem>>, vector<1x192xf32>
    %6 = vector.broadcast %5 : vector<1x192xf32> to vector<8x192xf32>
    %7 = arith.addf %4, %6 : vector<8x192xf32>
    %8 = vector.extract_strided_slice %7 {offsets = [0, 0], sizes = [8, 16], strides = [1, 1]} : vector<8x192xf32> to vector<8x16xf32>
    %9 = vector.shape_cast %8 : vector<8x16xf32> to vector<2x4x16xf32>
    %10 = vector.extract_strided_slice %7 {offsets = [0, 64], sizes = [8, 16], strides = [1, 1]} : vector<8x192xf32> to vector<8x16xf32>
    %11 = vector.shape_cast %10 : vector<8x16xf32> to vector<2x4x16xf32>
    %12 = vector.extract_strided_slice %7 {offsets = [0, 128], sizes = [8, 16], strides = [1, 1]} : vector<8x192xf32> to vector<8x16xf32>
    %13 = vector.shape_cast %12 : vector<8x16xf32> to vector<2x4x16xf32>
    %14 = arith.mulf %9, %9 : vector<2x4x16xf32>
    %cst_6 = arith.constant dense<0.000000e+00> : vector<2x4xf32>
    %15 = vector.multi_reduction <add>, %14, %cst_6 [2] : vector<2x4x16xf32> to vector<2x4xf32>
    %16 = vector.shape_cast %15 : vector<2x4xf32> to vector<2x4x1xf32>
    %cst_7 = arith.constant 9.99999996E-13 : f32
    %17 = vector.broadcast %cst_7 : f32 to vector<2x4x1xf32>
    %18 = arith.addf %16, %17 : vector<2x4x1xf32>
    %19 = math.rsqrt %18 : vector<2x4x1xf32>
    %20 = vector.broadcast %19 : vector<2x4x1xf32> to vector<2x4x16xf32>
    %21 = arith.mulf %9, %20 : vector<2x4x16xf32>
    %c0_8 = arith.constant 0 : index
    %c0_9 = arith.constant 0 : index
    %c0_10 = arith.constant 0 : index
    %22 = vector.load %arg6[%c0_8, %c0_9, %c0_10] : memref<4x1x1xf32, #tpu.memory_space<vmem>>, vector<1x1x1xf32>
    %23 = vector.shape_cast %22 : vector<1x1x1xf32> to vector<1x1xf32>
    %24 = vector.shape_cast %23 : vector<1x1xf32> to vector<1x1x1xf32>
    %25 = vector.broadcast %24 : vector<1x1x1xf32> to vector<2x4x16xf32>
    %26 = arith.mulf %21, %25 : vector<2x4x16xf32>
    %27 = arith.mulf %11, %11 : vector<2x4x16xf32>
    %cst_11 = arith.constant dense<0.000000e+00> : vector<2x4xf32>
    %28 = vector.multi_reduction <add>, %27, %cst_11 [2] : vector<2x4x16xf32> to vector<2x4xf32>
    %29 = vector.shape_cast %28 : vector<2x4xf32> to vector<2x4x1xf32>
    %cst_12 = arith.constant 9.99999996E-13 : f32
    %30 = vector.broadcast %cst_12 : f32 to vector<2x4x1xf32>
    %31 = arith.addf %29, %30 : vector<2x4x1xf32>
    %32 = math.rsqrt %31 : vector<2x4x1xf32>
    %33 = vector.broadcast %32 : vector<2x4x1xf32> to vector<2x4x16xf32>
    %34 = arith.mulf %11, %33 : vector<2x4x16xf32>
    "tpu.trace_start"() <{level = 10 : i32, message = "wtd,wsd->wts"}> : () -> ()
    %cst_13 = arith.constant dense<0.000000e+00> : vector<2x4x4xf32>
    %35 = tpu.matmul %26, %34, %cst_13 {dimension_numbers = #tpu.dot_dimension_numbers<[2], [2], [1], [1], [0, 0, 0, 1, 1, 1], [0], [0]>} : vector<2x4x16xf32>, vector<2x4x16xf32>, vector<2x4x4xf32> -> vector<2x4x4xf32>
    "tpu.trace_stop"() : () -> ()
    %c0_14 = arith.constant 0 : index
    %c0_15 = arith.constant 0 : index
    %c0_16 = arith.constant 0 : index
    %36 = vector.load %arg7[%c0_14, %c0_15, %c0_16] : memref<4x4x4xf32, #tpu.memory_space<vmem>>, vector<1x4x4xf32>
    %37 = vector.shape_cast %36 : vector<1x4x4xf32> to vector<4x4xf32>
    %38 = vector.shape_cast %37 : vector<4x4xf32> to vector<1x4x4xf32>
    %39 = vector.broadcast %38 : vector<1x4x4xf32> to vector<2x4x4xf32>
    %40 = arith.addf %35, %39 : vector<2x4x4xf32>
    %cst_17 = arith.constant dense<0xFF800000> : vector<2x4xf32>
    %41 = vector.multi_reduction <maximumf>, %40, %cst_17 [2] : vector<2x4x4xf32> to vector<2x4xf32>
    %42 = vector.shape_cast %41 : vector<2x4xf32> to vector<2x4x1xf32>
    %43 = vector.broadcast %42 : vector<2x4x1xf32> to vector<2x4x4xf32>
    %44 = arith.subf %40, %43 : vector<2x4x4xf32>
    %45 = math.exp %44 : vector<2x4x4xf32>
    %cst_18 = arith.constant dense<0.000000e+00> : vector<2x4xf32>
    %46 = vector.multi_reduction <add>, %45, %cst_18 [2] : vector<2x4x4xf32> to vector<2x4xf32>
    %47 = vector.shape_cast %46 : vector<2x4xf32> to vector<2x4x1xf32>
    %48 = vector.broadcast %47 : vector<2x4x1xf32> to vector<2x4x4xf32>
    %49 = arith.divf %45, %48 : vector<2x4x4xf32>
    "tpu.trace_start"() <{level = 10 : i32, message = "wts,wsd->wtd"}> : () -> ()
    %cst_19 = arith.constant dense<0.000000e+00> : vector<2x4x16xf32>
    %50 = tpu.matmul %49, %13, %cst_19 {dimension_numbers = #tpu.dot_dimension_numbers<[2], [1], [1], [2], [0, 0, 0, 1, 1, 2], [0], [0]>} : vector<2x4x4xf32>, vector<2x4x16xf32>, vector<2x4x16xf32> -> vector<2x4x16xf32>
    "tpu.trace_stop"() : () -> ()
    %51 = vector.extract_strided_slice %7 {offsets = [0, 16], sizes = [8, 16], strides = [1, 1]} : vector<8x192xf32> to vector<8x16xf32>
    %52 = vector.shape_cast %51 : vector<8x16xf32> to vector<2x4x16xf32>
    %53 = vector.extract_strided_slice %7 {offsets = [0, 80], sizes = [8, 16], strides = [1, 1]} : vector<8x192xf32> to vector<8x16xf32>
    %54 = vector.shape_cast %53 : vector<8x16xf32> to vector<2x4x16xf32>
    %55 = vector.extract_strided_slice %7 {offsets = [0, 144], sizes = [8, 16], strides = [1, 1]} : vector<8x192xf32> to vector<8x16xf32>
    %56 = vector.shape_cast %55 : vector<8x16xf32> to vector<2x4x16xf32>
    %57 = arith.mulf %52, %52 : vector<2x4x16xf32>
    %cst_20 = arith.constant dense<0.000000e+00> : vector<2x4xf32>
    %58 = vector.multi_reduction <add>, %57, %cst_20 [2] : vector<2x4x16xf32> to vector<2x4xf32>
    %59 = vector.shape_cast %58 : vector<2x4xf32> to vector<2x4x1xf32>
    %cst_21 = arith.constant 9.99999996E-13 : f32
    %60 = vector.broadcast %cst_21 : f32 to vector<2x4x1xf32>
    %61 = arith.addf %59, %60 : vector<2x4x1xf32>
    %62 = math.rsqrt %61 : vector<2x4x1xf32>
    %63 = vector.broadcast %62 : vector<2x4x1xf32> to vector<2x4x16xf32>
    %64 = arith.mulf %52, %63 : vector<2x4x16xf32>
    %c1 = arith.constant 1 : index
    %c0_22 = arith.constant 0 : index
    %c0_23 = arith.constant 0 : index
    %65 = vector.load %arg6[%c1, %c0_22, %c0_23] : memref<4x1x1xf32, #tpu.memory_space<vmem>>, vector<1x1x1xf32>
    %66 = vector.shape_cast %65 : vector<1x1x1xf32> to vector<1x1xf32>
    %67 = vector.shape_cast %66 : vector<1x1xf32> to vector<1x1x1xf32>
    %68 = vector.broadcast %67 : vector<1x1x1xf32> to vector<2x4x16xf32>
    %69 = arith.mulf %64, %68 : vector<2x4x16xf32>
    %70 = arith.mulf %54, %54 : vector<2x4x16xf32>
    %cst_24 = arith.constant dense<0.000000e+00> : vector<2x4xf32>
    %71 = vector.multi_reduction <add>, %70, %cst_24 [2] : vector<2x4x16xf32> to vector<2x4xf32>
    %72 = vector.shape_cast %71 : vector<2x4xf32> to vector<2x4x1xf32>
    %cst_25 = arith.constant 9.99999996E-13 : f32
    %73 = vector.broadcast %cst_25 : f32 to vector<2x4x1xf32>
    %74 = arith.addf %72, %73 : vector<2x4x1xf32>
    %75 = math.rsqrt %74 : vector<2x4x1xf32>
    %76 = vector.broadcast %75 : vector<2x4x1xf32> to vector<2x4x16xf32>
    %77 = arith.mulf %54, %76 : vector<2x4x16xf32>
    "tpu.trace_start"() <{level = 10 : i32, message = "wtd,wsd->wts"}> : () -> ()
    %cst_26 = arith.constant dense<0.000000e+00> : vector<2x4x4xf32>
    %78 = tpu.matmul %69, %77, %cst_26 {dimension_numbers = #tpu.dot_dimension_numbers<[2], [2], [1], [1], [0, 0, 0, 1, 1, 1], [0], [0]>} : vector<2x4x16xf32>, vector<2x4x16xf32>, vector<2x4x4xf32> -> vector<2x4x4xf32>
    "tpu.trace_stop"() : () -> ()
    %c1_27 = arith.constant 1 : index
    %c0_28 = arith.constant 0 : index
    %c0_29 = arith.constant 0 : index
    %79 = vector.load %arg7[%c1_27, %c0_28, %c0_29] : memref<4x4x4xf32, #tpu.memory_space<vmem>>, vector<1x4x4xf32>
    %80 = vector.shape_cast %79 : vector<1x4x4xf32> to vector<4x4xf32>
    %81 = vector.shape_cast %80 : vector<4x4xf32> to vector<1x4x4xf32>
    %82 = vector.broadcast %81 : vector<1x4x4xf32> to vector<2x4x4xf32>
    %83 = arith.addf %78, %82 : vector<2x4x4xf32>
    %cst_30 = arith.constant dense<0xFF800000> : vector<2x4xf32>
    %84 = vector.multi_reduction <maximumf>, %83, %cst_30 [2] : vector<2x4x4xf32> to vector<2x4xf32>
    %85 = vector.shape_cast %84 : vector<2x4xf32> to vector<2x4x1xf32>
    %86 = vector.broadcast %85 : vector<2x4x1xf32> to vector<2x4x4xf32>
    %87 = arith.subf %83, %86 : vector<2x4x4xf32>
    %88 = math.exp %87 : vector<2x4x4xf32>
    %cst_31 = arith.constant dense<0.000000e+00> : vector<2x4xf32>
    %89 = vector.multi_reduction <add>, %88, %cst_31 [2] : vector<2x4x4xf32> to vector<2x4xf32>
    %90 = vector.shape_cast %89 : vector<2x4xf32> to vector<2x4x1xf32>
    %91 = vector.broadcast %90 : vector<2x4x1xf32> to vector<2x4x4xf32>
    %92 = arith.divf %88, %91 : vector<2x4x4xf32>
    "tpu.trace_start"() <{level = 10 : i32, message = "wts,wsd->wtd"}> : () -> ()
    %cst_32 = arith.constant dense<0.000000e+00> : vector<2x4x16xf32>
    %93 = tpu.matmul %92, %56, %cst_32 {dimension_numbers = #tpu.dot_dimension_numbers<[2], [1], [1], [2], [0, 0, 0, 1, 1, 2], [0], [0]>} : vector<2x4x4xf32>, vector<2x4x16xf32>, vector<2x4x16xf32> -> vector<2x4x16xf32>
    "tpu.trace_stop"() : () -> ()
    %94 = vector.extract_strided_slice %7 {offsets = [0, 32], sizes = [8, 16], strides = [1, 1]} : vector<8x192xf32> to vector<8x16xf32>
    %95 = vector.shape_cast %94 : vector<8x16xf32> to vector<2x4x16xf32>
    %96 = vector.extract_strided_slice %7 {offsets = [0, 96], sizes = [8, 16], strides = [1, 1]} : vector<8x192xf32> to vector<8x16xf32>
    %97 = vector.shape_cast %96 : vector<8x16xf32> to vector<2x4x16xf32>
    %98 = vector.extract_strided_slice %7 {offsets = [0, 160], sizes = [8, 16], strides = [1, 1]} : vector<8x192xf32> to vector<8x16xf32>
    %99 = vector.shape_cast %98 : vector<8x16xf32> to vector<2x4x16xf32>
    %100 = arith.mulf %95, %95 : vector<2x4x16xf32>
    %cst_33 = arith.constant dense<0.000000e+00> : vector<2x4xf32>
    %101 = vector.multi_reduction <add>, %100, %cst_33 [2] : vector<2x4x16xf32> to vector<2x4xf32>
    %102 = vector.shape_cast %101 : vector<2x4xf32> to vector<2x4x1xf32>
    %cst_34 = arith.constant 9.99999996E-13 : f32
    %103 = vector.broadcast %cst_34 : f32 to vector<2x4x1xf32>
    %104 = arith.addf %102, %103 : vector<2x4x1xf32>
    %105 = math.rsqrt %104 : vector<2x4x1xf32>
    %106 = vector.broadcast %105 : vector<2x4x1xf32> to vector<2x4x16xf32>
    %107 = arith.mulf %95, %106 : vector<2x4x16xf32>
    %c2 = arith.constant 2 : index
    %c0_35 = arith.constant 0 : index
    %c0_36 = arith.constant 0 : index
    %108 = vector.load %arg6[%c2, %c0_35, %c0_36] : memref<4x1x1xf32, #tpu.memory_space<vmem>>, vector<1x1x1xf32>
    %109 = vector.shape_cast %108 : vector<1x1x1xf32> to vector<1x1xf32>
    %110 = vector.shape_cast %109 : vector<1x1xf32> to vector<1x1x1xf32>
    %111 = vector.broadcast %110 : vector<1x1x1xf32> to vector<2x4x16xf32>
    %112 = arith.mulf %107, %111 : vector<2x4x16xf32>
    %113 = arith.mulf %97, %97 : vector<2x4x16xf32>
    %cst_37 = arith.constant dense<0.000000e+00> : vector<2x4xf32>
    %114 = vector.multi_reduction <add>, %113, %cst_37 [2] : vector<2x4x16xf32> to vector<2x4xf32>
    %115 = vector.shape_cast %114 : vector<2x4xf32> to vector<2x4x1xf32>
    %cst_38 = arith.constant 9.99999996E-13 : f32
    %116 = vector.broadcast %cst_38 : f32 to vector<2x4x1xf32>
    %117 = arith.addf %115, %116 : vector<2x4x1xf32>
    %118 = math.rsqrt %117 : vector<2x4x1xf32>
    %119 = vector.broadcast %118 : vector<2x4x1xf32> to vector<2x4x16xf32>
    %120 = arith.mulf %97, %119 : vector<2x4x16xf32>
    "tpu.trace_start"() <{level = 10 : i32, message = "wtd,wsd->wts"}> : () -> ()
    %cst_39 = arith.constant dense<0.000000e+00> : vector<2x4x4xf32>
    %121 = tpu.matmul %112, %120, %cst_39 {dimension_numbers = #tpu.dot_dimension_numbers<[2], [2], [1], [1], [0, 0, 0, 1, 1, 1], [0], [0]>} : vector<2x4x16xf32>, vector<2x4x16xf32>, vector<2x4x4xf32> -> vector<2x4x4xf32>
    "tpu.trace_stop"() : () -> ()
    %c2_40 = arith.constant 2 : index
    %c0_41 = arith.constant 0 : index
    %c0_42 = arith.constant 0 : index
    %122 = vector.load %arg7[%c2_40, %c0_41, %c0_42] : memref<4x4x4xf32, #tpu.memory_space<vmem>>, vector<1x4x4xf32>
    %123 = vector.shape_cast %122 : vector<1x4x4xf32> to vector<4x4xf32>
    %124 = vector.shape_cast %123 : vector<4x4xf32> to vector<1x4x4xf32>
    %125 = vector.broadcast %124 : vector<1x4x4xf32> to vector<2x4x4xf32>
    %126 = arith.addf %121, %125 : vector<2x4x4xf32>
    %cst_43 = arith.constant dense<0xFF800000> : vector<2x4xf32>
    %127 = vector.multi_reduction <maximumf>, %126, %cst_43 [2] : vector<2x4x4xf32> to vector<2x4xf32>
    %128 = vector.shape_cast %127 : vector<2x4xf32> to vector<2x4x1xf32>
    %129 = vector.broadcast %128 : vector<2x4x1xf32> to vector<2x4x4xf32>
    %130 = arith.subf %126, %129 : vector<2x4x4xf32>
    %131 = math.exp %130 : vector<2x4x4xf32>
    %cst_44 = arith.constant dense<0.000000e+00> : vector<2x4xf32>
    %132 = vector.multi_reduction <add>, %131, %cst_44 [2] : vector<2x4x4xf32> to vector<2x4xf32>
    %133 = vector.shape_cast %132 : vector<2x4xf32> to vector<2x4x1xf32>
    %134 = vector.broadcast %133 : vector<2x4x1xf32> to vector<2x4x4xf32>
    %135 = arith.divf %131, %134 : vector<2x4x4xf32>
    "tpu.trace_start"() <{level = 10 : i32, message = "wts,wsd->wtd"}> : () -> ()
    %cst_45 = arith.constant dense<0.000000e+00> : vector<2x4x16xf32>
    %136 = tpu.matmul %135, %99, %cst_45 {dimension_numbers = #tpu.dot_dimension_numbers<[2], [1], [1], [2], [0, 0, 0, 1, 1, 2], [0], [0]>} : vector<2x4x4xf32>, vector<2x4x16xf32>, vector<2x4x16xf32> -> vector<2x4x16xf32>
    "tpu.trace_stop"() : () -> ()
    %137 = vector.extract_strided_slice %7 {offsets = [0, 48], sizes = [8, 16], strides = [1, 1]} : vector<8x192xf32> to vector<8x16xf32>
    %138 = vector.shape_cast %137 : vector<8x16xf32> to vector<2x4x16xf32>
    %139 = vector.extract_strided_slice %7 {offsets = [0, 112], sizes = [8, 16], strides = [1, 1]} : vector<8x192xf32> to vector<8x16xf32>
    %140 = vector.shape_cast %139 : vector<8x16xf32> to vector<2x4x16xf32>
    %141 = vector.extract_strided_slice %7 {offsets = [0, 176], sizes = [8, 16], strides = [1, 1]} : vector<8x192xf32> to vector<8x16xf32>
    %142 = vector.shape_cast %141 : vector<8x16xf32> to vector<2x4x16xf32>
    %143 = arith.mulf %138, %138 : vector<2x4x16xf32>
    %cst_46 = arith.constant dense<0.000000e+00> : vector<2x4xf32>
    %144 = vector.multi_reduction <add>, %143, %cst_46 [2] : vector<2x4x16xf32> to vector<2x4xf32>
    %145 = vector.shape_cast %144 : vector<2x4xf32> to vector<2x4x1xf32>
    %cst_47 = arith.constant 9.99999996E-13 : f32
    %146 = vector.broadcast %cst_47 : f32 to vector<2x4x1xf32>
    %147 = arith.addf %145, %146 : vector<2x4x1xf32>
    %148 = math.rsqrt %147 : vector<2x4x1xf32>
    %149 = vector.broadcast %148 : vector<2x4x1xf32> to vector<2x4x16xf32>
    %150 = arith.mulf %138, %149 : vector<2x4x16xf32>
    %c3 = arith.constant 3 : index
    %c0_48 = arith.constant 0 : index
    %c0_49 = arith.constant 0 : index
    %151 = vector.load %arg6[%c3, %c0_48, %c0_49] : memref<4x1x1xf32, #tpu.memory_space<vmem>>, vector<1x1x1xf32>
    %152 = vector.shape_cast %151 : vector<1x1x1xf32> to vector<1x1xf32>
    %153 = vector.shape_cast %152 : vector<1x1xf32> to vector<1x1x1xf32>
    %154 = vector.broadcast %153 : vector<1x1x1xf32> to vector<2x4x16xf32>
    %155 = arith.mulf %150, %154 : vector<2x4x16xf32>
    %156 = arith.mulf %140, %140 : vector<2x4x16xf32>
    %cst_50 = arith.constant dense<0.000000e+00> : vector<2x4xf32>
    %157 = vector.multi_reduction <add>, %156, %cst_50 [2] : vector<2x4x16xf32> to vector<2x4xf32>
    %158 = vector.shape_cast %157 : vector<2x4xf32> to vector<2x4x1xf32>
    %cst_51 = arith.constant 9.99999996E-13 : f32
    %159 = vector.broadcast %cst_51 : f32 to vector<2x4x1xf32>
    %160 = arith.addf %158, %159 : vector<2x4x1xf32>
    %161 = math.rsqrt %160 : vector<2x4x1xf32>
    %162 = vector.broadcast %161 : vector<2x4x1xf32> to vector<2x4x16xf32>
    %163 = arith.mulf %140, %162 : vector<2x4x16xf32>
    "tpu.trace_start"() <{level = 10 : i32, message = "wtd,wsd->wts"}> : () -> ()
    %cst_52 = arith.constant dense<0.000000e+00> : vector<2x4x4xf32>
    %164 = tpu.matmul %155, %163, %cst_52 {dimension_numbers = #tpu.dot_dimension_numbers<[2], [2], [1], [1], [0, 0, 0, 1, 1, 1], [0], [0]>} : vector<2x4x16xf32>, vector<2x4x16xf32>, vector<2x4x4xf32> -> vector<2x4x4xf32>
    "tpu.trace_stop"() : () -> ()
    %c3_53 = arith.constant 3 : index
    %c0_54 = arith.constant 0 : index
    %c0_55 = arith.constant 0 : index
    %165 = vector.load %arg7[%c3_53, %c0_54, %c0_55] : memref<4x4x4xf32, #tpu.memory_space<vmem>>, vector<1x4x4xf32>
    %166 = vector.shape_cast %165 : vector<1x4x4xf32> to vector<4x4xf32>
    %167 = vector.shape_cast %166 : vector<4x4xf32> to vector<1x4x4xf32>
    %168 = vector.broadcast %167 : vector<1x4x4xf32> to vector<2x4x4xf32>
    %169 = arith.addf %164, %168 : vector<2x4x4xf32>
    %cst_56 = arith.constant dense<0xFF800000> : vector<2x4xf32>
    %170 = vector.multi_reduction <maximumf>, %169, %cst_56 [2] : vector<2x4x4xf32> to vector<2x4xf32>
    %171 = vector.shape_cast %170 : vector<2x4xf32> to vector<2x4x1xf32>
    %172 = vector.broadcast %171 : vector<2x4x1xf32> to vector<2x4x4xf32>
    %173 = arith.subf %169, %172 : vector<2x4x4xf32>
    %174 = math.exp %173 : vector<2x4x4xf32>
    %cst_57 = arith.constant dense<0.000000e+00> : vector<2x4xf32>
    %175 = vector.multi_reduction <add>, %174, %cst_57 [2] : vector<2x4x4xf32> to vector<2x4xf32>
    %176 = vector.shape_cast %175 : vector<2x4xf32> to vector<2x4x1xf32>
    %177 = vector.broadcast %176 : vector<2x4x1xf32> to vector<2x4x4xf32>
    %178 = arith.divf %174, %177 : vector<2x4x4xf32>
    "tpu.trace_start"() <{level = 10 : i32, message = "wts,wsd->wtd"}> : () -> ()
    %cst_58 = arith.constant dense<0.000000e+00> : vector<2x4x16xf32>
    %179 = tpu.matmul %178, %142, %cst_58 {dimension_numbers = #tpu.dot_dimension_numbers<[2], [1], [1], [2], [0, 0, 0, 1, 1, 2], [0], [0]>} : vector<2x4x4xf32>, vector<2x4x16xf32>, vector<2x4x16xf32> -> vector<2x4x16xf32>
    "tpu.trace_stop"() : () -> ()
    %180 = tpu.concatenate %50, %93, %136, %179 in 2 : vector<2x4x16xf32>, vector<2x4x16xf32>, vector<2x4x16xf32>, vector<2x4x16xf32> -> vector<2x4x64xf32>
    %181 = vector.shape_cast %180 : vector<2x4x64xf32> to vector<8x64xf32>
    %182 = arith.truncf %181 : vector<8x64xf32> to vector<8x64xbf16>
    %c0_59 = arith.constant 0 : index
    %c0_60 = arith.constant 0 : index
    %183 = vector.load %arg4[%c0_59, %c0_60] : memref<64x64xbf16, #tpu.memory_space<vmem>>, vector<64x64xbf16>
    %cst_61 = arith.constant dense<0.000000e+00> : vector<8x64xf32>
    %184 = tpu.matmul %182, %183, %cst_61 {dimension_numbers = #tpu.dot_dimension_numbers<[1], [0], [0], [1], [0, 0, 1, 1], [], []>} : vector<8x64xbf16>, vector<64x64xbf16>, vector<8x64xf32> -> vector<8x64xf32>
    %c0_62 = arith.constant 0 : index
    %c0_63 = arith.constant 0 : index
    %185 = vector.load %arg5[%c0_62, %c0_63] : memref<1x64xf32, #tpu.memory_space<vmem>>, vector<1x64xf32>
    %186 = vector.broadcast %185 : vector<1x64xf32> to vector<8x64xf32>
    %187 = arith.addf %184, %186 : vector<8x64xf32>
    %c0_64 = arith.constant 0 : index
    %c0_65 = arith.constant 0 : index
    %188 = vector.load %arg8[%c0_64, %c0_65] : memref<1x64xf32, #tpu.memory_space<vmem>>, vector<1x64xf32>
    %c0_66 = arith.constant 0 : index
    %c0_67 = arith.constant 0 : index
    %189 = vector.load %arg9[%c0_66, %c0_67] : memref<1x64xf32, #tpu.memory_space<vmem>>, vector<1x64xf32>
    %cst_68 = arith.constant dense<0.000000e+00> : vector<8xf32>
    %190 = vector.multi_reduction <add>, %187, %cst_68 [1] : vector<8x64xf32> to vector<8xf32>
    %191 = vector.shape_cast %190 : vector<8xf32> to vector<8x1xf32>
    %cst_69 = arith.constant 6.400000e+01 : f32
    %192 = vector.broadcast %cst_69 : f32 to vector<8x1xf32>
    %193 = arith.divf %191, %192 : vector<8x1xf32>
    %194 = vector.broadcast %193 : vector<8x1xf32> to vector<8x64xf32>
    %195 = arith.subf %187, %194 : vector<8x64xf32>
    %196 = arith.mulf %195, %195 : vector<8x64xf32>
    %cst_70 = arith.constant dense<0.000000e+00> : vector<8xf32>
    %197 = vector.multi_reduction <add>, %196, %cst_70 [1] : vector<8x64xf32> to vector<8xf32>
    %198 = vector.shape_cast %197 : vector<8xf32> to vector<8x1xf32>
    %cst_71 = arith.constant 6.400000e+01 : f32
    %199 = vector.broadcast %cst_71 : f32 to vector<8x1xf32>
    %200 = arith.divf %198, %199 : vector<8x1xf32>
    %cst_72 = arith.constant 9.99999974E-6 : f32
    %201 = vector.broadcast %cst_72 : f32 to vector<8x1xf32>
    %202 = arith.addf %200, %201 : vector<8x1xf32>
    %203 = math.rsqrt %202 : vector<8x1xf32>
    %204 = vector.broadcast %203 : vector<8x1xf32> to vector<8x64xf32>
    %205 = arith.mulf %195, %204 : vector<8x64xf32>
    %206 = vector.broadcast %188 : vector<1x64xf32> to vector<8x64xf32>
    %207 = arith.mulf %205, %206 : vector<8x64xf32>
    %208 = vector.broadcast %189 : vector<1x64xf32> to vector<8x64xf32>
    %209 = arith.addf %207, %208 : vector<8x64xf32>
    %210 = arith.addf %1, %209 : vector<8x64xf32>
    %211 = arith.truncf %210 : vector<8x64xf32> to vector<8x64xbf16>
    %c0_73 = arith.constant 0 : index
    %c0_74 = arith.constant 0 : index
    %212 = vector.load %arg10[%c0_73, %c0_74] : memref<64x256xbf16, #tpu.memory_space<vmem>>, vector<64x256xbf16>
    %cst_75 = arith.constant dense<0.000000e+00> : vector<8x256xf32>
    %213 = tpu.matmul %211, %212, %cst_75 {dimension_numbers = #tpu.dot_dimension_numbers<[1], [0], [0], [1], [0, 0, 1, 1], [], []>} : vector<8x64xbf16>, vector<64x256xbf16>, vector<8x256xf32> -> vector<8x256xf32>
    %c0_76 = arith.constant 0 : index
    %c0_77 = arith.constant 0 : index
    %214 = vector.load %arg11[%c0_76, %c0_77] : memref<1x256xf32, #tpu.memory_space<vmem>>, vector<1x256xf32>
    %215 = vector.broadcast %214 : vector<1x256xf32> to vector<8x256xf32>
    %216 = arith.addf %213, %215 : vector<8x256xf32>
    %217 = arith.mulf %216, %216 : vector<8x256xf32>
    %218 = arith.mulf %216, %217 : vector<8x256xf32>
    %cst_78 = arith.constant 4.471500e-02 : f32
    %219 = vector.broadcast %cst_78 : f32 to vector<8x256xf32>
    %220 = arith.mulf %219, %218 : vector<8x256xf32>
    %221 = arith.addf %216, %220 : vector<8x256xf32>
    %cst_79 = arith.constant 0.797884583 : f32
    %222 = vector.broadcast %cst_79 : f32 to vector<8x256xf32>
    %223 = arith.mulf %222, %221 : vector<8x256xf32>
    %224 = math.tanh %223 : vector<8x256xf32>
    %cst_80 = arith.constant 1.000000e+00 : f32
    %225 = vector.broadcast %cst_80 : f32 to vector<8x256xf32>
    %226 = arith.addf %225, %224 : vector<8x256xf32>
    %cst_81 = arith.constant 5.000000e-01 : f32
    %227 = vector.broadcast %cst_81 : f32 to vector<8x256xf32>
    %228 = arith.mulf %227, %226 : vector<8x256xf32>
    %229 = arith.mulf %216, %228 : vector<8x256xf32>
    %230 = arith.truncf %229 : vector<8x256xf32> to vector<8x256xbf16>
    %c0_82 = arith.constant 0 : index
    %c0_83 = arith.constant 0 : index
    %231 = vector.load %arg12[%c0_82, %c0_83] : memref<256x64xbf16, #tpu.memory_space<vmem>>, vector<256x64xbf16>
    %cst_84 = arith.constant dense<0.000000e+00> : vector<8x64xf32>
    %232 = tpu.matmul %230, %231, %cst_84 {dimension_numbers = #tpu.dot_dimension_numbers<[1], [0], [0], [1], [0, 0, 1, 1], [], []>} : vector<8x256xbf16>, vector<256x64xbf16>, vector<8x64xf32> -> vector<8x64xf32>
    %c0_85 = arith.constant 0 : index
    %c0_86 = arith.constant 0 : index
    %233 = vector.load %arg13[%c0_85, %c0_86] : memref<1x64xf32, #tpu.memory_space<vmem>>, vector<1x64xf32>
    %234 = vector.broadcast %233 : vector<1x64xf32> to vector<8x64xf32>
    %235 = arith.addf %232, %234 : vector<8x64xf32>
    %c0_87 = arith.constant 0 : index
    %c0_88 = arith.constant 0 : index
    %236 = vector.load %arg14[%c0_87, %c0_88] : memref<1x64xf32, #tpu.memory_space<vmem>>, vector<1x64xf32>
    %c0_89 = arith.constant 0 : index
    %c0_90 = arith.constant 0 : index
    %237 = vector.load %arg15[%c0_89, %c0_90] : memref<1x64xf32, #tpu.memory_space<vmem>>, vector<1x64xf32>
    %cst_91 = arith.constant dense<0.000000e+00> : vector<8xf32>
    %238 = vector.multi_reduction <add>, %235, %cst_91 [1] : vector<8x64xf32> to vector<8xf32>
    %239 = vector.shape_cast %238 : vector<8xf32> to vector<8x1xf32>
    %cst_92 = arith.constant 6.400000e+01 : f32
    %240 = vector.broadcast %cst_92 : f32 to vector<8x1xf32>
    %241 = arith.divf %239, %240 : vector<8x1xf32>
    %242 = vector.broadcast %241 : vector<8x1xf32> to vector<8x64xf32>
    %243 = arith.subf %235, %242 : vector<8x64xf32>
    %244 = arith.mulf %243, %243 : vector<8x64xf32>
    %cst_93 = arith.constant dense<0.000000e+00> : vector<8xf32>
    %245 = vector.multi_reduction <add>, %244, %cst_93 [1] : vector<8x64xf32> to vector<8xf32>
    %246 = vector.shape_cast %245 : vector<8xf32> to vector<8x1xf32>
    %cst_94 = arith.constant 6.400000e+01 : f32
    %247 = vector.broadcast %cst_94 : f32 to vector<8x1xf32>
    %248 = arith.divf %246, %247 : vector<8x1xf32>
    %cst_95 = arith.constant 9.99999974E-6 : f32
    %249 = vector.broadcast %cst_95 : f32 to vector<8x1xf32>
    %250 = arith.addf %248, %249 : vector<8x1xf32>
    %251 = math.rsqrt %250 : vector<8x1xf32>
    %252 = vector.broadcast %251 : vector<8x1xf32> to vector<8x64xf32>
    %253 = arith.mulf %243, %252 : vector<8x64xf32>
    %254 = vector.broadcast %236 : vector<1x64xf32> to vector<8x64xf32>
    %255 = arith.mulf %253, %254 : vector<8x64xf32>
    %256 = vector.broadcast %237 : vector<1x64xf32> to vector<8x64xf32>
    %257 = arith.addf %255, %256 : vector<8x64xf32>
    %258 = arith.addf %210, %257 : vector<8x64xf32>
    %259 = vector.shape_cast %258 : vector<8x64xf32> to vector<2x4x64xf32>
    %c0_96 = arith.constant 0 : index
    %c0_97 = arith.constant 0 : index
    %c0_98 = arith.constant 0 : index
    %260 = vector.load %arg16[%c0_96, %c0_97, %c0_98] : memref<2x4x64xf32, #tpu.memory_space<vmem>>, vector<2x4x64xf32>
    tpu.vector_store %arg16[%c0_96, %c0_97, %c0_98], %259 {strides = array<i32>} : memref<2x4x64xf32, #tpu.memory_space<vmem>>, vector<2x4x64xf32>,
    return
  }
  func.func @transform_0(%arg0: i32) -> (i32, i32, i32) {
    %c0_i32 = arith.constant 0 : i32
    %c0_i32_0 = arith.constant 0 : i32
    %c0_i32_1 = arith.constant 0 : i32
    return %arg0, %c0_i32, %c0_i32_0 : i32, i32, i32
  }
  func.func @transform_1(%arg0: i32) -> (i32, i32) {
    %c0_i32 = arith.constant 0 : i32
    %c0_i32_0 = arith.constant 0 : i32
    %c0_i32_1 = arith.constant 0 : i32
    return %c0_i32, %c0_i32_0 : i32, i32
  }
  func.func @transform_2(%arg0: i32) -> (i32, i32) {
    %c0_i32 = arith.constant 0 : i32
    %c0_i32_0 = arith.constant 0 : i32
    %c0_i32_1 = arith.constant 0 : i32
    return %c0_i32, %c0_i32_0 : i32, i32
  }
  func.func @transform_3(%arg0: i32) -> (i32, i32) {
    %c0_i32 = arith.constant 0 : i32
    %c0_i32_0 = arith.constant 0 : i32
    %c0_i32_1 = arith.constant 0 : i32
    return %c0_i32, %c0_i32_0 : i32, i32
  }
  func.func @transform_4(%arg0: i32) -> (i32, i32) {
    %c0_i32 = arith.constant 0 : i32
    %c0_i32_0 = arith.constant 0 : i32
    %c0_i32_1 = arith.constant 0 : i32
    return %c0_i32, %c0_i32_0 : i32, i32
  }
  func.func @transform_5(%arg0: i32) -> (i32, i32, i32) {
    %c0_i32 = arith.constant 0 : i32
    %c0_i32_0 = arith.constant 0 : i32
    %c0_i32_1 = arith.constant 0 : i32
    %c0_i32_2 = arith.constant 0 : i32
    return %c0_i32, %c0_i32_0, %c0_i32_1 : i32, i32, i32
  }
  func.func @transform_6(%arg0: i32) -> (i32, i32, i32) {
    %c0_i32 = arith.constant 0 : i32
    %c0_i32_0 = arith.constant 0 : i32
    %c0_i32_1 = arith.constant 0 : i32
    %c0_i32_2 = arith.constant 0 : i32
    return %c0_i32, %c0_i32_0, %c0_i32_1 : i32, i32, i32
  }
  func.func @transform_7(%arg0: i32) -> (i32, i32) {
    %c0_i32 = arith.constant 0 : i32
    %c0_i32_0 = arith.constant 0 : i32
    %c0_i32_1 = arith.constant 0 : i32
    return %c0_i32, %c0_i32_0 : i32, i32
  }
  func.func @transform_8(%arg0: i32) -> (i32, i32) {
    %c0_i32 = arith.constant 0 : i32
    %c0_i32_0 = arith.constant 0 : i32
    %c0_i32_1 = arith.constant 0 : i32
    return %c0_i32, %c0_i32_0 : i32, i32
  }
  func.func @transform_9(%arg0: i32) -> (i32, i32) {
    %c0_i32 = arith.constant 0 : i32
    %c0_i32_0 = arith.constant 0 : i32
    %c0_i32_1 = arith.constant 0 : i32
    return %c0_i32, %c0_i32_0 : i32, i32
  }
  func.func @transform_10(%arg0: i32) -> (i32, i32) {
    %c0_i32 = arith.constant 0 : i32
    %c0_i32_0 = arith.constant 0 : i32
    %c0_i32_1 = arith.constant 0 : i32
    return %c0_i32, %c0_i32_0 : i32, i32
  }
  func.func @transform_11(%arg0: i32) -> (i32, i32) {
    %c0_i32 = arith.constant 0 : i32
    %c0_i32_0 = arith.constant 0 : i32
    %c0_i32_1 = arith.constant 0 : i32
    return %c0_i32, %c0_i32_0 : i32, i32
  }
  func.func @transform_12(%arg0: i32) -> (i32, i32) {
    %c0_i32 = arith.constant 0 : i32
    %c0_i32_0 = arith.constant 0 : i32
    %c0_i32_1 = arith.constant 0 : i32
    return %c0_i32, %c0_i32_0 : i32, i32
  }
  func.func @transform_13(%arg0: i32) -> (i32, i32) {
    %c0_i32 = arith.constant 0 : i32
    %c0_i32_0 = arith.constant 0 : i32
    %c0_i32_1 = arith.constant 0 : i32
    return %c0_i32, %c0_i32_0 : i32, i32
  }
  func.func @transform_14(%arg0: i32) -> (i32, i32) {
    %c0_i32 = arith.constant 0 : i32
    %c0_i32_0 = arith.constant 0 : i32
    %c0_i32_1 = arith.constant 0 : i32
    return %c0_i32, %c0_i32_0 : i32, i32
  }
  func.func @transform_15(%arg0: i32) -> (i32, i32, i32) {
    %c0_i32 = arith.constant 0 : i32
    %c0_i32_0 = arith.constant 0 : i32
    %c0_i32_1 = arith.constant 0 : i32
    return %arg0, %c0_i32, %c0_i32_0 : i32, i32, i32
  }
}

module attributes {stable_mosaic.version = 11 : i64} {
  func.func @_pool_classify_kernel(%arg0: memref<2x4x64xf32, #tpu.memory_space<vmem>>, %arg1: memref<64x6xbf16, #tpu.memory_space<vmem>>, %arg2: memref<1x6xf32, #tpu.memory_space<vmem>>, %arg3: memref<2x6xf32, #tpu.memory_space<vmem>>) attributes {dimension_semantics = [], scalar_prefetch = 0 : i64, scratch_operands = 0 : i64, tpu.core_type = #tpu.core_type<tc>} {
    %c0 = arith.constant 0 : index
    %c0_0 = arith.constant 0 : index
    %c0_1 = arith.constant 0 : index
    %0 = vector.load %arg0[%c0, %c0_0, %c0_1] : memref<2x4x64xf32, #tpu.memory_space<vmem>>, vector<2x4x64xf32>
    %cst = arith.constant dense<0.000000e+00> : vector<2x64xf32>
    %1 = vector.multi_reduction <add>, %0, %cst [1] : vector<2x4x64xf32> to vector<2x64xf32>
    %cst_2 = arith.constant 4.000000e+00 : f32
    %2 = vector.broadcast %cst_2 : f32 to vector<2x64xf32>
    %3 = arith.divf %1, %2 : vector<2x64xf32>
    %4 = arith.truncf %3 : vector<2x64xf32> to vector<2x64xbf16>
    %c0_3 = arith.constant 0 : index
    %c0_4 = arith.constant 0 : index
    %5 = vector.load %arg1[%c0_3, %c0_4] : memref<64x6xbf16, #tpu.memory_space<vmem>>, vector<64x6xbf16>
    %cst_5 = arith.constant dense<0.000000e+00> : vector<2x6xf32>
    %6 = tpu.matmul %4, %5, %cst_5 {dimension_numbers = #tpu.dot_dimension_numbers<[1], [0], [0], [1], [0, 0, 1, 1], [], []>} : vector<2x64xbf16>, vector<64x6xbf16>, vector<2x6xf32> -> vector<2x6xf32>
    %c0_6 = arith.constant 0 : index
    %c0_7 = arith.constant 0 : index
    %7 = vector.load %arg2[%c0_6, %c0_7] : memref<1x6xf32, #tpu.memory_space<vmem>>, vector<1x6xf32>
    %8 = vector.broadcast %7 : vector<1x6xf32> to vector<2x6xf32>
    %9 = arith.addf %6, %8 : vector<2x6xf32>
    %c0_8 = arith.constant 0 : index
    %c0_9 = arith.constant 0 : index
    %10 = vector.load %arg3[%c0_8, %c0_9] : memref<2x6xf32, #tpu.memory_space<vmem>>, vector<2x6xf32>
    tpu.vector_store %arg3[%c0_8, %c0_9], %9 {strides = array<i32>} : memref<2x6xf32, #tpu.memory_space<vmem>>, vector<2x6xf32>,
    return
  }
}

</mosaic_0001>

<bundles_post_ra>
// kernel: swinv2_classifier_forward.5
= control target key start
LH: loop header
LB: loop body
LE: loop exit
PB: predicated region body
PF: predicated region fallthrough
CT: control target
= control target key end

     0   :  { %vm42_vm0 = vcmask 130048   ;;  %vm100_vm1 = vcmask 261120   ;;  %s284_s1 = inlined_call_operand.vmem [shape: bf16[16,32], index: 1, kind: input, shape index: {}]   ;;  %s285_s0 = inlined_call_operand.vmem [shape: f32[32,16], index: 0, kind: input, shape index: {}]   ;;  %s286_s2 = inlined_call_operand.vmem [shape: f32[1,32], index: 2, kind: input, shape index: {}]   ;;  %s287_s3 = inlined_call_operand.vmem [shape: f32[1,32], index: 3, kind: input, shape index: {}]   ;;  %s288_s4 = inlined_call_operand.vmem [shape: f32[1,32], index: 4, kind: input, shape index: {}]   ;;  %s289_s5 = inlined_call_operand.vmem [shape: f32[32,32], index: 5, kind: output, shape index: {}]  }
   0x1   :  { %v197_v0 = vld [vmem:[%s284_s1] sm:$0xff]   ;;  %v22_v2 = vld [vmem:[%s285_s0 + $0x8] sm:$0xff]  ;;  %v23_v3 = vld [vmem:[%s285_s0 + $0x10] sm:$0xff] }
   0x2   :  { %v21_v1 = vld [vmem:[%s285_s0] sm:$0xff]  ;;  %191 = vmatprep.subr.bf16.mxu0 %v197_v0  ;;  %v24_v5 = vld [vmem:[%s285_s0 + $0x18] sm:$0xff] }
   0x3   :  { %v25_v4 = vpack.c.bf16 %v22_v2, %v21_v1  ;;  %192 = vmatpush3.bf16.msra.mxu0 %v197_v0  ;;  %v26_v6 = vpack.c.bf16 %v24_v5, %v23_v3  ;;  %v182_v7 = vld [vmem:[%s286_s2] ss:$0 sm:$0xff] }
   0x4   :  { %v186_v53 = vld [vmem:[%s287_s3] ss:$0 sm:$0xff] }
   0x5   :  { %193 = vmatprep.mubr.msk.bf16.mxu0 %vm42_vm0, %v25_v4  ;;  %v187_v55 = vld [vmem:[%s288_s4] ss:$0 sm:$0xff] }
   0x6   :  { %194 = vmatmul.mubr.msk.bf16.vlgmr.msra.gmra.mxu0 %vm42_vm0, %v26_v6 }
  0xc6   :  { %v195_v8 = vpop.f32.mrf.mxu0 }
  0xc7   :  { %v92_v9 = vadd.f32 %v195_v8, %v182_v7 }
  0xc8   :  { %v83_v10 = vpop.f32.mrf.mxu0 }
  0xc9   :  { %v84_v11 = vadd.f32 %v182_v7, %v83_v10  ;;  %v107_v12 = vsel %vm100_vm1, %v92_v9, 0.0 }
  0xca   :  { %108 = vadd.xlane.f32.xlu1 %v107_v12  ;;  %v196_v13 = vpop.f32.mrf.mxu0 }
  0xcb   :  { %v95_v14 = vadd.f32 %v196_v13, %v182_v7  ;;  %v101_v15 = vsel %vm100_vm1, %v84_v11, 0.0 }
  0xcc   :  { %v86_v16 = vpop.f32.mrf.mxu0  ;;  %102 = vadd.xlane.f32.xlu0 %v101_v15 }
  0xcd   :  { %v87_v17 = vadd.f32 %v182_v7, %v86_v16  ;;  %v110_v18 = vsel %vm100_vm1, %v95_v14, 0.0 }
  0xce   :  { %111 = vadd.xlane.f32.xlu1 %v110_v18 }
  0xcf   :  { %v104_v19 = vsel %vm100_vm1, %v87_v17, 0.0 }
  0xd0   :  { %105 = vadd.xlane.f32.xlu0 %v104_v19 }
 0x153   :  { %v109_v20 = vpop.xlane.xlu1 %108 }
 0x154   :  { %v116_v21 = vmul.f32 0.03125, %v109_v20 }
 0x155   :  { %v103_v22 = vpop.xlane.xlu0 %102 }
 0x156   :  { %v114_v23 = vmul.f32 0.03125, %v103_v22  ;;  %v120_v25 = vsub.f32 %v92_v9, %v116_v21 }
 0x157   :  { %v112_v24 = vpop.xlane.xlu1 %111 }
 0x158   :  { %v118_v26 = vsub.f32 %v84_v11, %v114_v23  ;;  %v117_v27 = vmul.f32 0.03125, %v112_v24  ;;  %v124_v34 = vmul.f32 %v120_v25, %v120_v25 }
 0x159   :  { %v106_v28 = vpop.xlane.xlu0 %105 }
 0x15a   :  { %v115_v29 = vmul.f32 0.03125, %v106_v28  ;;  %v122_v30 = vmul.f32 %v118_v26, %v118_v26  ;;  %v121_v31 = vsub.f32 %v95_v14, %v117_v27  ;;  %v132_v36 = vsel %vm100_vm1, %v124_v34, 0.0 }
 0x15c   :  { %v119_v32 = vsub.f32 %v87_v17, %v115_v29  ;;  %v126_v33 = vsel %vm100_vm1, %v122_v30, 0.0  ;;  %v125_v38 = vmul.f32 %v121_v31, %v121_v31 }
 0x15d   :  { %127 = vadd.xlane.f32.xlu0 %v126_v33 }
 0x15e   :  { %v123_v35 = vmul.f32 %v119_v32, %v119_v32  ;;  %v135_v39 = vsel %vm100_vm1, %v125_v38, 0.0 }
 0x160   :  { %v129_v37 = vsel %vm100_vm1, %v123_v35, 0.0 }
 0x161   :  { %133 = vadd.xlane.f32.xlu0 %v132_v36  ;;  %130 = vadd.xlane.f32.xlu1 %v129_v37 }
 0x165   :  { %136 = vadd.xlane.f32.xlu1 %v135_v39 }
 0x1e6   :  { %v128_v40 = vpop.xlane.xlu0 %127 }
 0x1e7   :  { %v138_v41 = vmul.f32 0.03125, %v128_v40 }
 0x1e9   :  { %v142_v42 = vadd.f32 1e-05, %v138_v41 }
 0x1ea   :  { %v131_v43 = vpop.xlane.xlu1 %130  ;;  %v134_v44 = vpop.xlane.xlu0 %133 }
 0x1eb   :  { %198 = vrsqrt.f32 %v142_v42  ;;  %v139_v45 = vmul.f32 0.03125, %v131_v43  ;;  %v140_v46 = vmul.f32 0.03125, %v134_v44 }
 0x1ed   :  { %v143_v47 = vadd.f32 1e-05, %v139_v45  ;;  %v144_v48 = vadd.f32 1e-05, %v140_v46 }
 0x1ee   :  { %v137_v49 = vpop.xlane.xlu1 %136 }
 0x1ef   :  { %200 = vrsqrt.f32 %v143_v47  ;;  %v141_v50 = vmul.f32 0.03125, %v137_v49 }
 0x1f0   :  { %202 = vrsqrt.f32 %v144_v48 }
 0x1f1   :  { %v145_v51 = vadd.f32 1e-05, %v141_v50 }
 0x1f3   :  { %204 = vrsqrt.f32 %v145_v51 }
 0x1f8   :  { %v199_v52 = vpop.eup %198 }
 0x1f9   :  { %v150_v54 = vmul.f32 %v199_v52, %v118_v26 }
 0x1fb   :  { %v160_v56 = vmul.f32 %v186_v53, %v150_v54 }
 0x1fc   :  { %v201_v57 = vpop.eup %200 }
 0x1fd   :  { %v203_v58 = vpop.eup %202  ;;  %v170_v59 = vadd.f32 %v187_v55, %v160_v56  ;;  %v151_v60 = vmul.f32 %v201_v57, %v119_v32 }
 0x1fe   :  { %v152_v61 = vmul.f32 %v203_v58, %v120_v25 }
 0x1ff   :  { %174 = vst.msk [vmem:[%s289_s5] sm:$0xff] %vm100_vm1, %v170_v59  ;;  %v161_v62 = vmul.f32 %v186_v53, %v151_v60 }
 0x200   :  { %v205_v63 = vpop.eup %204  ;;  %v162_v0 = vmul.f32 %v186_v53, %v152_v61 }
 0x201   :  { %v171_v1 = vadd.f32 %v187_v55, %v161_v62  ;;  %v153_v2 = vmul.f32 %v205_v63, %v121_v31 }
 0x202   :  { %v172_v3 = vadd.f32 %v187_v55, %v162_v0 }
 0x203   :  { %175 = vst.msk [vmem:[%s289_s5 + $0x8] sm:$0xff] %vm100_vm1, %v171_v1  ;;  %v163_v4 = vmul.f32 %v186_v53, %v153_v2 }
 0x204   :  { %176 = vst.msk [vmem:[%s289_s5 + $0x10] sm:$0xff] %vm100_vm1, %v172_v3 }
 0x205   :  { %v173_v5 = vadd.f32 %v187_v55, %v163_v4 }
 0x207   :  { %177 = vst.msk [vmem:[%s289_s5 + $0x18] sm:$0xff] %vm100_vm1, %v173_v5 }

// kernel: swinv2_classifier_forward.7
= control target key start
LH: loop header
LB: loop body
LE: loop exit
PB: predicated region body
PF: predicated region fallthrough
CT: control target
= control target key end

     0   :  { %v209_v1 = vmov 0.0   ;;  %vm210_vm0 = vmmov 0   ;;  %vm152_vm1 = vcmask 523264   ;;  %s272_s0 = inlined_call_operand.vmem [shape: f32[8,128], index: 0, kind: input, shape index: {}]   ;;  %s273_s3 = inlined_call_operand.vmem [shape: bf16[128,64], index: 3, kind: input, shape index: {}]   ;;  %s274_s1 = inlined_call_operand.vmem [shape: f32[1,128], index: 1, kind: input, shape index: {}]   ;;  %s275_s2 = inlined_call_operand.vmem [shape: f32[1,128], index: 2, kind: input, shape index: {}]   ;;  %s276_s4 = inlined_call_operand.vmem [shape: f32[8,64], index: 4, kind: output, shape index: {}]  }
   0x1   :  { %v18_v0 = vld [vmem:[%s272_s0] sm:$0xff]  ;;  %177 = vmatprep.subr.bf16.mxu0 %v209_v1  ;;  %v199_v2 = vld [vmem:[%s273_s3 + $0x38] sm:$0xff]   ;;  %v200_v3 = vld [vmem:[%s273_s3 + $0x30] sm:$0xff]   ;;  %193 = vmatprep.mubr.msk.bf16.mxu0 %vm210_vm0, %v209_v1 }
   0x2   :  { %21 = vadd.xlane.f32.xlu0 %v18_v0  ;;  %178 = vmatpush3.bf16.msra.mxu0 %v199_v2  ;;  %v201_v8 = vld [vmem:[%s273_s3 + $0x28] sm:$0xff]   ;;  %v202_v9 = vld [vmem:[%s273_s3 + $0x20] sm:$0xff]   ;;  %v203_v10 = vld [vmem:[%s273_s3 + $0x18] sm:$0xff]  }
   0x3   :  { %179 = vmatprep.subr.bf16.mxu0 %v209_v1  ;;  %v204_v11 = vld [vmem:[%s273_s3 + $0x10] sm:$0xff]   ;;  %v205_v12 = vld [vmem:[%s273_s3 + $0x8] sm:$0xff]   ;;  %v206_v13 = vld [vmem:[%s273_s3] sm:$0xff]  }
   0x4   :  { %v158_v18 = vld [vmem:[%s274_s1] ss:$0 sm:$0xff] }
   0x5   :  { %v159_v20 = vld [vmem:[%s275_s2] ss:$0 sm:$0xff] }
   0x6   :  { %180 = vmatpush3.bf16.msra.mxu0 %v200_v3 }
   0x7   :  { %181 = vmatprep.subr.bf16.mxu0 %v209_v1 }
   0xa   :  { %182 = vmatpush3.bf16.msra.mxu0 %v201_v8 }
   0xb   :  { %183 = vmatprep.subr.bf16.mxu0 %v209_v1 }
   0xe   :  { %184 = vmatpush3.bf16.msra.mxu0 %v202_v9 }
   0xf   :  { %185 = vmatprep.subr.bf16.mxu0 %v209_v1 }
  0x12   :  { %186 = vmatpush3.bf16.msra.mxu0 %v203_v10 }
  0x13   :  { %187 = vmatprep.subr.bf16.mxu0 %v209_v1 }
  0x16   :  { %188 = vmatpush3.bf16.msra.mxu0 %v204_v11 }
  0x17   :  { %189 = vmatprep.subr.bf16.mxu0 %v209_v1 }
  0x1a   :  { %190 = vmatpush3.bf16.msra.mxu0 %v205_v12 }
  0x1b   :  { %191 = vmatprep.subr.bf16.mxu0 %v209_v1 }
  0x1e   :  { %192 = vmatpush3.bf16.msra.mxu0 %v206_v13 }
  0x8b   :  { %v22_v4 = vpop.xlane.xlu0 %21 }
  0x8c   :  { %v24_v5 = vmul.f32 0.0078125, %v22_v4 }
  0x8e   :  { %v25_v6 = vsub.f32 %v18_v0, %v24_v5 }
  0x90   :  { %v26_v7 = vmul.f32 %v25_v6, %v25_v6 }
  0x92   :  { %27 = vadd.xlane.f32.xlu0 %v26_v7 }
 0x11b   :  { %v28_v14 = vpop.xlane.xlu0 %27 }
 0x11c   :  { %v29_v15 = vmul.f32 0.0078125, %v28_v14 }
 0x11e   :  { %v30_v16 = vadd.f32 1e-05, %v29_v15 }
 0x120   :  { %207 = vrsqrt.f32 %v30_v16 }
 0x12d   :  { %v208_v17 = vpop.eup %207 }
 0x12e   :  { %v32_v19 = vmul.f32 %v208_v17, %v25_v6 }
 0x130   :  { %v39_v21 = vmul.f32 %v158_v18, %v32_v19 }
 0x132   :  { %v46_v22 = vadd.f32 %v159_v20, %v39_v21 }
 0x134   :  { %v47_v23 = vpack.c.bf16 %v46_v22, %v46_v22 }
 0x136   :  { %194 = vmatmul.mubr.bf16.vlgmr.msra.gmra.mxu0 %v47_v23 }
 0x1f6   :  { %v146_v24 = vpop.f32.mrf.mxu0 }
 0x1f7   :  { %153 = vst.msk [vmem:[%s276_s4] sm:$0xff] %vm152_vm1, %v146_v24 }
 0x1f8   :  { %v195_v25 = vpop.f32.mrf.mxu0 }
 0x1fa   :  { %v149_v26 = vpop.f32.mrf.mxu0 }
 0x1fc   :  { %v196_v27 = vpop.f32.mrf.mxu0 }

// kernel: swinv2_classifier_forward.9
= control target key start
LH: loop header
LB: loop body
LE: loop exit
PB: predicated region body
PF: predicated region fallthrough
CT: control target
= control target key end

     0   :  { %v196_v1 = vmov 0.0   ;;  %vm197_vm0 = vmmov 0   ;;  %vm18_vm1 = vcmask 519168   ;;  %s243_s0 = inlined_call_operand.vmem [shape: f32[2,4,64], index: 0, kind: input, shape index: {}]   ;;  %s244_s1 = inlined_call_operand.vmem [shape: bf16[64,6], index: 1, kind: input, shape index: {}]   ;;  %s245_s2 = inlined_call_operand.vmem [shape: f32[1,6], index: 2, kind: input, shape index: {}]   ;;  %s246_s3 = inlined_call_operand.hbm [shape: f32[2,6], index: 3, kind: output, shape index: {}]  }
   0x1   :  { %v170_v0 = vld [vmem:[%s244_s1 + $0x18] sm:$0xff]   ;;  %155 = vmatprep.subr.bf16.mxu0 %v196_v1  ;;  %v171_v2 = vld [vmem:[%s244_s1 + $0x10] sm:$0xff]   ;;  %163 = vmatprep.mubr.msk.bf16.mxu0 %vm197_vm0, %v196_v1  ;;  %v16_v3 = vld [vmem:[%s243_s0] sm:$0xf] }
   0x2   :  { %156 = vmatpush3.bf16.msra.mxu0 %v170_v0  ;;  %v17_v4 = vld [vmem:[%s243_s0 + $0x4] sm:$0xf]  ;;  %v19_v5 = vsel %vm18_vm1, %v16_v3, 0.0 }
   0x3   :  { %157 = vmatprep.subr.bf16.mxu0 %v196_v1  ;;  %v26_v6 = vsel %vm18_vm1, %v17_v4, 0.0 }
   0x4   :  { %8 = vsyncpa [#allocation3], 0  ;;  %v172_v7 = vld [vmem:[%s244_s1 + $0x8] sm:$0xff]   ;;  %v20_v8 = vrot.slane %v19_v5, 4  ;;  %v27_v9 = vrot.slane %v26_v6, 4  ;;  %v173_v12 = vld [vmem:[%s244_s1] sm:$0xff]  }
   0x5   :  { %vm57_vm2 = vcmask 1041409   ;;  %vm84_vm3 = vcmask 523264   ;;  %v144_v29 = vld [vmem:[%s245_s2] ss:$0 sm:$0xff]  ;;  %s198_s24 = smov [#allocation2]   ;;  %vm128_vm4 = vcmask 41984  }
   0x6   :  { %158 = vmatpush3.bf16.msra.mxu0 %v171_v2  ;;  %v21_v10 = vadd.f32 %v20_v8, %v19_v5  ;;  %v28_v11 = vadd.f32 %v27_v9, %v26_v6  ;;  %s136_s25 = sshll.u32 %s198_s24, 4  ;;  %s137_s25 = int_to_ptr.vmem [resolvable:$true] %s136_s25 }
   0x7   :  { %159 = vmatprep.subr.bf16.mxu0 %v196_v1  ;;  %s174_s26 = scalar_lea.vmem %s137_s25, 32  ;;  %p179_p1 = scmp.lt.s32.totalorder %s137_s25, %s137_s25 }
   0x8   :  { %v22_v13 = vrot.slane %v21_v10, 2  ;;  %v29_v14 = vrot.slane %v28_v11, 2  ;;  %p175_p0 = scmp.ne.s32.totalorder %s137_s25, %s174_s26  ;;  %p180_p2 = scmp.lt.s32.totalorder %s174_s26, %s174_s26 }
   0xa   :  { %160 = vmatpush3.bf16.msra.mxu0 %v172_v7  ;;  %v23_v15 = vadd.f32 %v22_v13, %v21_v10  ;;  %v30_v16 = vadd.f32 %v29_v14, %v28_v11  ;;  %p181_p3 = por %p180_p2, %p179_p1 }
   0xb   :  { %161 = vmatprep.subr.bf16.mxu0 %v196_v1 }
   0xc   :  { %v24_v17 = vrot.slane %v23_v15, 1  ;;  %v31_v18 = vrot.slane %v30_v16, 1  ;;  %p182_p4 = pnand %p181_p3, %p175_p0 }
   0xe   :  { %162 = vmatpush3.bf16.msra.mxu0 %v173_v12  ;;  %v25_v19 = vadd.f32 %v24_v17, %v23_v15  ;;  %v32_v20 = vadd.f32 %v31_v18, %v30_v16 }
  0x10   :  { %v34_v21 = vmul.f32 0.25, %v25_v19  ;;  %v35_v22 = vmul.f32 0.25, %v32_v20 }
  0x12   :  { %v36_v23 = vpack.c.bf16 %v34_v21, %v34_v21  ;;  %v37_v24 = vpack.c.bf16 %v35_v22, %v35_v22 }
  0x14   :  { %v55_v25 = vunpack.c.l.b16 %v36_v23  ;;  %v56_v26 = vunpack.c.l.b16 %v37_v24 }
  0x16   :  { %v58_v27 = vsel %vm57_vm2, %v56_v26, %v55_v25 }
  0x17   :  { %v59_v28 = vpack.c.b16 %v58_v27, %v58_v27 }
  0x19   :  { %164 = vmatmul.mubr.msk.bf16.vlgmr.msra.gmra.mxu0 %vm84_vm3, %v59_v28 }
  0xd9   :  { %v122_v30 = vpop.f32.mrf.mxu0 }
  0xda   :  { %v123_v31 = vadd.f32 %v144_v29, %v122_v30 }
  0xdb   :  { %v165_v32 = vpop.f32.mrf.mxu0 }
  0xdc   :  { %129 = vst.msk [vmem:[#allocation2] sm:$0x3] %vm128_vm4, %v123_v31 }
  0xdd   :  { %v125_v33 = vpop.f32.mrf.mxu0 }
  0xde   :  { %185 = shalt.err (!%p182_p4)
}
  0xdf   :  { %139 = dma.vmem_to_hbm [thread:$0]  %s137_s25, 32, %s246_s3, [#allocation3]   ;;  %v166_v34 = vpop.f32.mrf.mxu0 }
  0xe0   :  { %194 = dma.done.wait [#allocation3], 32  }
  0xe1   :  { %195 = vsyncadd [#allocation3], 4294967264 }
  0xe2   :  { %143 = vsyncpa [#allocation3], 1 }

// kernel: swinv2_classifier_forward.6
= control target key start
LH: loop header
LB: loop body
LE: loop exit
PB: predicated region body
PF: predicated region fallthrough
CT: control target
= control target key end

     0   :  { %s3030_s18 = smov 0   ;;  %s3419_s0 = inlined_call_operand.vmem [shape: f32[8,4,32], index: 0, kind: input, shape index: {}]   ;;  %s3420_s1 = inlined_call_operand.vmem [shape: bf16[32,96], index: 1, kind: input, shape index: {}]   ;;  %s3421_s2 = inlined_call_operand.vmem [shape: f32[1,96], index: 2, kind: input, shape index: {}]   ;;  %s3422_s3 = inlined_call_operand.vmem [shape: bf16[32,32], index: 3, kind: input, shape index: {}]   ;;  %s3423_s4 = inlined_call_operand.vmem [shape: f32[1,32], index: 4, kind: input, shape index: {}]   ;;  %s3424_s5 = inlined_call_operand.vmem [shape: f32[2,1,1], index: 5, kind: input, shape index: {}]   ;;  %s3425_s6 = inlined_call_operand.vmem [shape: f32[2,4,4], index: 6, kind: input, shape index: {}]   ;;  %s3426_s7 = inlined_call_operand.vmem [shape: f32[1,32], index: 7, kind: input, shape index: {}]   ;;  %s3427_s8 = inlined_call_operand.vmem [shape: f32[1,32], index: 8, kind: input, shape index: {}]   ;;  %s3428_s9 = inlined_call_operand.vmem [shape: bf16[32,128], index: 9, kind: input, shape index: {}]   ;;  %s3429_s10 = inlined_call_operand.vmem [shape: f32[1,128], index: 10, kind: input, shape index: {}]   ;;  %s3430_s11 = inlined_call_operand.vmem [shape: bf16[128,32], index: 11, kind: input, shape index: {}]   ;;  %s3431_s12 = inlined_call_operand.vmem [shape: f32[1,32], index: 12, kind: input, shape index: {}]   ;;  %s3432_s13 = inlined_call_operand.vmem [shape: f32[1,32], index: 13, kind: input, shape index: {}]   ;;  %s3433_s14 = inlined_call_operand.vmem [shape: f32[1,32], index: 14, kind: input, shape index: {}]   ;;  %s3434_s15 = inlined_call_operand.vmem [shape: f32[8,4,32], index: 15, kind: output, shape index: {}]  }
   0x1 LB: > { %s2572_s19 = sadd.s32 4294967295, %s2939_s18   ;;  %p2576_p0 = scmp.ge.s32.totalorder %s2939_s18, 1  ;;  %s2939_s18 = sphi %s3030_s18, %s25_s18  }
   0x2   : > { %p438_p1 = scmp.lt.s32.totalorder %s2939_s18, 3 }
   0x4   : > { %p439_p2 = pnand %p2576_p0, %p438_p1 }
   0x5   : > { %s2577_s24 = sshll.u32 (!%p439_p2), %s2572_s19, 2  ;;  %s2943_s16 = smov (!%p439_p2), 96  }
   0x6   : > { %442 = sbr.rel (%p439_p2) target bundleno = 3268 (0xcc4), region = 80  ;;  %p487_p3 = scmp.lt.s32.totalorder (!%p439_p2), %s2577_s24, 7 }
   0x7   : > { %s2945_s20 = smov (!%p439_p2), 80   ;;  %s2946_s21 = smov (!%p439_p2), 112  }
   0x8   : > { %s2947_s26 = smov (!%p439_p2), 64   ;;  %s2948_s17 = smov (!%p439_p2), 48  }
   0x9   : > { %s2949_s23 = smov (!%p439_p2), 16  }
   0xb   : > { %v2837_v0 = vld [vmem:[%s3420_s1 + $0x8] sm:$0xff]   ;;  %v2941_v1 = vmov 0.0   ;;  %v2838_v2 = vld [vmem:[%s3420_s1] sm:$0xff]   ;;  %vm2942_vm0 = vmmov 0   ;;  %s3436_s24 = smov (!%p487_p3, %s2577_s24), 7  ;;  %vm535_vm1 = vcmask 261120  }
   0xc   : > { %2694 = vmatprep.subr.bf16.mxu0 %v2941_v1  ;;  %2707 = vmatprep.subr.mxu1 %v2941_v1  ;;  %s2578_s25 = sshll.u32 %s3436_s24, 2  ;;  %v2581_v10 = vld [vmem:[%s3421_s2] ss:$0 sm:$0xff]  ;;  %v2944_v22 = vmov 0   ;;  %vm590_vm2 = vcmask 125952   ;;  %vm673_vm3 = vcmask 130048  }
   0xd   : > { %2695 = vmatpush3.bf16.msra.mxu0 %v2837_v0  ;;  %2698 = vmatprep.mubr.msk.bf16.mxu0 %vm2942_vm0, %v2941_v1  ;;  %s3060_s28 = scalar_lea.vmem %s3419_s0, %s2578_s25  ;;  %v2585_v36 = vld [vmem:[%s3424_s5] ss:$0 sm:$0xff]  ;;  %vm983_vm4 = vcmask 27648   ;;  %vm1034_vm5 = vcmask 1043456   ;;  %vm1030_vm6 = vcmask 31744   ;;  %s496_s27 = scalar_lea.vmem %s3434_s15, %s2578_s25  ;;  %vm2511_vm7 = vcmask 257024  }
   0xe   : > { %2696 = vmatprep.subr.bf16.mxu0 %v2941_v1  ;;  %2709 = vmatprep.mubr.msk.f32.mxu1 %vm2942_vm0, %v2941_v1  ;;  %v499_v3 = vld [vmem:[%s3060_s28] sm:$0xf]  ;;  %v500_v4 = vld [vmem:[%s3060_s28 + $0x4] sm:$0xf]  ;;  %v501_v5 = vld [vmem:[%s3060_s28 + $0x8] sm:$0xf] }
   0xf   : > { %v502_v6 = vld [vmem:[%s3060_s28 + $0xc] sm:$0xf]  ;;  %v507_v7 = vcombine.low %v499_v3, %v500_v4  ;;  %2835 = vset.pattern.permute.xlu1 %v2944_v22  ;;  %2836 = vset.pattern.permute.xlu0 %v2944_v22 }
  0x10   : > { %v508_v8 = vcombine.low %v501_v5, %v502_v6 }
  0x11   : > { %2697 = vmatpush3.bf16.msra.mxu0 %v2838_v2 }
  0x12   : > { %2702 = vmatprep.subr.mxu0 %v2941_v1  ;;  %v511_v9 = vpack.c.bf16 %v508_v8, %v507_v7 }
  0x14   : > { %2699 = vmatmul.mubr.msk.bf16.vlgmr.msra.gmra.mxu0 %vm535_vm1, %v511_v9 }
  0x15   : > { %2704 = vmatprep.mubr.msk.f32.mxu0 %vm2942_vm0, %v2941_v1 }
  0xd4   : > { %v573_v11 = vpop.f32.mrf.mxu0 }
  0xd5   : > { %v3072_v12 = vadd.f32 %v2581_v10, %v573_v11 }
  0xd6   : > { %v2700_v13 = vpop.f32.mrf.mxu0 }
  0xd7   : > { %v3076_v14 = vmul.f32 %v3072_v12, %v3072_v12  ;;  %v3080_v15 = vcombine.high %v3072_v12, %v3072_v12 }
  0xd8   : > { %v576_v16 = vpop.f32.mrf.mxu0 }
  0xd9   : > { %v3082_v17 = vadd.f32 %v2581_v10, %v576_v16  ;;  %633 = vrot.lane.b32.xlu0 %v3076_v14, %s2943_s16  ;;  %v587_v19 = vmul.f32 %v3080_v15, %v3080_v15  ;;  %v591_v31 = vsel %vm590_vm2, %v3076_v14, 0.0 }
  0xda   : > { %v2701_v18 = vpop.f32.mrf.mxu0 }
  0xdb   : > { %v3090_v20 = vmul.f32 %v3082_v17, %v3082_v17  ;;  %v3094_v21 = vcombine.high %v3082_v17, %v3082_v17  ;;  %v594_v34 = vsel %vm590_vm2, %v587_v19, 0.0 }
  0xdd   : > { %635 = vrot.lane.b32.xlu0 %v587_v19, %s2943_s16  ;;  %637 = vrot.lane.b32.xlu1 %v3090_v20, %s2943_s16  ;;  %v589_v23 = vmul.f32 %v3094_v21, %v3094_v21  ;;  %v597_v33 = vsel %vm590_vm2, %v3090_v20, 0.0 }
  0xdf   : > { %v600_v35 = vsel %vm590_vm2, %v589_v23, 0.0 }
  0xe1   : > { %639 = vrot.lane.b32.xlu1 %v589_v23, %s2943_s16 }
 0x14b   : > { %v634_v24 = vpop.permute.xlu0 %633 }
 0x14c   : > { %v645_v25 = vsel %vm590_vm2, %v634_v24, 0.0 }
 0x14d   : > { %646 = vadd.xlane.f32.xlu0 %v645_v25 }
 0x14f   : > { %v636_v26 = vpop.permute.xlu0 %635  ;;  %v638_v27 = vpop.permute.xlu1 %637 }
 0x150   : > { %v651_v28 = vsel %vm590_vm2, %v638_v27, 0.0  ;;  %v648_v29 = vsel %vm590_vm2, %v636_v26, 0.0 }
 0x151   : > { %652 = vadd.xlane.f32.xlu0 %v651_v28  ;;  %649 = vadd.xlane.f32.xlu1 %v648_v29 }
 0x153   : > { %v640_v30 = vpop.permute.xlu1 %639 }
 0x154   : > { %v654_v32 = vsel %vm590_vm2, %v640_v30, 0.0 }
 0x155   : > { %592 = vadd.xlane.f32.xlu1 %v591_v31  ;;  %655 = vadd.xlane.f32.xlu0 %v654_v32 }
 0x159   : > { %598 = vadd.xlane.f32.xlu1 %v597_v33  ;;  %595 = vadd.xlane.f32.xlu0 %v594_v34 }
 0x15d   : > { %601 = vadd.xlane.f32.xlu0 %v600_v35 }
 0x16a   : > { %622 = vperm.xlu1 %2835, %v2585_v36  }
 0x1d6   : > { %v647_v37 = vpop.xlane.xlu0 %646 }
 0x1d7   : > { %v657_v38 = vadd.f32 1e-12, %v647_v37 }
 0x1d9   : > { %2853 = vrsqrt.f32 %v657_v38 }
 0x1da   : > { %v653_v39 = vpop.xlane.xlu0 %652  ;;  %v650_v40 = vpop.xlane.xlu1 %649 }
 0x1db   : > { %v658_v41 = vadd.f32 1e-12, %v650_v40  ;;  %v659_v42 = vadd.f32 1e-12, %v653_v39 }
 0x1dd   : > { %2855 = vrsqrt.f32 %v658_v41 }
 0x1de   : > { %v656_v43 = vpop.xlane.xlu0 %655  ;;  %2857 = vrsqrt.f32 %v659_v42  ;;  %v593_v53 = vpop.xlane.xlu1 %592 }
 0x1df   : > { %v660_v44 = vadd.f32 1e-12, %v656_v43  ;;  %v603_v55 = vadd.f32 1e-12, %v593_v53 }
 0x1e1   : > { %2859 = vrsqrt.f32 %v660_v44 }
 0x1e2   : > { %v596_v54 = vpop.xlane.xlu0 %595  ;;  %2861 = vrsqrt.f32 %v603_v55  ;;  %v599_v58 = vpop.xlane.xlu1 %598 }
 0x1e3   : > { %v604_v56 = vadd.f32 1e-12, %v596_v54  ;;  %v605_v60 = vadd.f32 1e-12, %v599_v58 }
 0x1e5   : > { %2863 = vrsqrt.f32 %v604_v56 }
 0x1e6   : > { %v2854_v45 = vpop.eup %2853  ;;  %v602_v57 = vpop.xlane.xlu0 %601 }
 0x1e7   : > { %v665_v46 = vmul.f32 %v2854_v45, %v3072_v12  ;;  %v606_v59 = vadd.f32 1e-12, %v602_v57  ;;  %v623_v63 = vpop.permute.xlu1 %622 }
 0x1e9   : > { %671 = vrot.lane.b32.xlu0 %v665_v46, %s2943_s16  ;;  %2865 = vrsqrt.f32 %v606_v59 }
 0x1ea   : > { %v2856_v47 = vpop.eup %2855  ;;  %2867 = vrsqrt.f32 %v605_v60 }
 0x1eb   : > { %v666_v48 = vmul.f32 %v2856_v47, %v3080_v15  ;;  %v2858_v49 = vpop.eup %2857 }
 0x1ec   : > { %v667_v52 = vmul.f32 %v2858_v49, %v3082_v17 }
 0x1ed   : > { %750 = vrot.lane.b32.xlu1 %v666_v48, %s2943_s16 }
 0x1ee   : > { %v2860_v50 = vpop.eup %2859 }
 0x1ef   : > { %v668_v51 = vmul.f32 %v2860_v50, %v3094_v21  ;;  %v2862_v61 = vpop.eup %2861 }
 0x1f0   : > { %v611_v62 = vmul.f32 %v2862_v61, %v3072_v12 }
 0x1f1   : > { %906 = vrot.lane.b32.xlu0 %v668_v51, %s2943_s16  ;;  %828 = vrot.lane.b32.xlu1 %v667_v52, %s2943_s16  ;;  %v2603_v52 = vld [vmem:[%s3424_s5 + $0x1] ss:$0 sm:$0xff] }
 0x1f2   : > { %v2864_v0 = vpop.eup %2863  ;;  %v625_v3 = vmul.f32 %v623_v63, %v611_v62 }
 0x1f3   : > { %v612_v5 = vmul.f32 %v2864_v0, %v3080_v15 }
 0x1f5   : > { %1391 = vrot.lane.b32.xlu0 %v587_v19, %s2945_s20  ;;  %1389 = vrot.lane.b32.xlu1 %v3076_v14, %s2945_s20  ;;  %v626_v10 = vmul.f32 %v623_v63, %v612_v5 }
 0x1f6   : > { %v2866_v4 = vpop.eup %2865 }
 0x1f7   : > { %v2868_v6 = vpop.eup %2867  ;;  %v614_v8 = vmul.f32 %v2866_v4, %v3094_v21 }
 0x1f8   : > { %v613_v9 = vmul.f32 %v2868_v6, %v3082_v17 }
 0x1f9   : > { %1340 = vrot.lane.b32.xlu0 %v587_v19, %s2946_s21  ;;  %1338 = vrot.lane.b32.xlu1 %v3076_v14, %s2946_s21  ;;  %v628_v14 = vmul.f32 %v623_v63, %v614_v8  ;;  %v669_v19 = vld [vmem:[%s3425_s6] sm:$0xf] }
 0x1fa   : > { %v627_v16 = vmul.f32 %v623_v63, %v613_v9 }
 0x1fd   : > { %1395 = vrot.lane.b32.xlu0 %v589_v23, %s2945_s20  ;;  %1393 = vrot.lane.b32.xlu1 %v3090_v20, %s2945_s20 }
 0x201   : > { %1344 = vrot.lane.b32.xlu0 %v589_v23, %s2946_s21  ;;  %1342 = vrot.lane.b32.xlu1 %v3090_v20, %s2946_s21 }
 0x25b   : > { %v672_v2 = vpop.permute.xlu0 %671 }
 0x25c   : > { %2703 = vmatpush3.xpose.msk.msra.mxu0 %vm673_vm3, %v672_v2 }
 0x25d   : > { %2717 = vmatprep.subr.mxu0 %v2941_v1 }
 0x25f   : > { %2705 = vmatmul.mubr.msk.f32.vlgmr.msra.gmra.mxu0 %vm673_vm3, %v625_v3  ;;  %v751_v7 = vpop.permute.xlu1 %750 }
 0x260   : > { %2719 = vmatprep.mubr.msk.f32.mxu0 %vm2942_vm0, %v2941_v1  ;;  %2708 = vmatpush3.xpose.msk.msra.mxu1 %vm673_vm3, %v751_v7 }
 0x261   : > { %2712 = vmatprep.subr.mxu1 %v2941_v1 }
 0x263   : > { %v907_v11 = vpop.permute.xlu0 %906  ;;  %2710 = vmatmul.mubr.msk.f32.vlgmr.msra.gmra.mxu1 %vm673_vm3, %v626_v10  ;;  %v829_v13 = vpop.permute.xlu1 %828 }
 0x264   : > { %2718 = vmatpush3.xpose.msk.msra.mxu0 %vm673_vm3, %v907_v11  ;;  %2713 = vmatpush3.xpose.msk.msra.mxu1 %vm673_vm3, %v829_v13 }
 0x265   : > { %2714 = vmatprep.mubr.msk.f32.mxu1 %vm2942_vm0, %v2941_v1  ;;  %2722 = vmatprep.subr.mxu1 %v2941_v1 }
 0x266   : > { %2727 = vmatprep.subr.mxu0 %v2941_v1 }
 0x267   : > { %2720 = vmatmul.mubr.msk.f32.vlgmr.msra.gmra.mxu0 %vm673_vm3, %v628_v14  ;;  %2715 = vmatmul.mubr.msk.f32.vlgmr.msra.gmra.mxu1 %vm673_vm3, %v627_v16  ;;  %v1392_v18 = vpop.permute.xlu0 %1391  ;;  %v1390_v28 = vpop.permute.xlu1 %1389 }
 0x268   : > { %2729 = vmatprep.mubr.msk.f32.mxu0 %vm2942_vm0, %v2941_v1  ;;  %2724 = vmatprep.mubr.msk.f32.mxu1 %vm2942_vm0, %v2941_v1  ;;  %v1404_v30 = vsel %vm590_vm2, %v1392_v18, 0.0  ;;  %v1401_v43 = vsel %vm590_vm2, %v1390_v28, 0.0 }
 0x26b   : > { %v1341_v25 = vpop.permute.xlu0 %1340  ;;  %v1339_v40 = vpop.permute.xlu1 %1338 }
 0x26c   : > { %v1353_v38 = vsel %vm590_vm2, %v1341_v25, 0.0  ;;  %v1350_v47 = vsel %vm590_vm2, %v1339_v40, 0.0 }
 0x26f   : > { %v1396_v34 = vpop.permute.xlu0 %1395  ;;  %v1394_v44 = vpop.permute.xlu1 %1393 }
 0x270   : > { %v1410_v41 = vsel %vm590_vm2, %v1396_v34, 0.0  ;;  %v1407_v49 = vsel %vm590_vm2, %v1394_v44, 0.0 }
 0x273   : > { %v1345_v42 = vpop.permute.xlu0 %1344  ;;  %v1343_v50 = vpop.permute.xlu1 %1342 }
 0x274   : > { %v1359_v46 = vsel %vm590_vm2, %v1345_v42, 0.0  ;;  %v1356_v51 = vsel %vm590_vm2, %v1343_v50, 0.0 }
 0x31f   : > { %v745_v20 = vpop.f32.mrf.mxu0 }
 0x320   : > { %v3162_v22 = vadd.f32 %v745_v20, %v669_v19 }
 0x321   : > { %v2706_v23 = vpop.f32.mrf.mxu0 }
 0x322   : > { %v984_v24 = vsel %vm983_vm4, %v3162_v22, -inf }
 0x323   : > { %985 = vmax.xlane.f32.xlu1 %v984_v24  ;;  %v823_v26 = vpop.f32.mrf.mxu1 }
 0x324   : > { %v3166_v27 = vadd.f32 %v823_v26, %v669_v19 }
 0x325   : > { %v2711_v29 = vpop.f32.mrf.mxu1 }
 0x326   : > { %v987_v31 = vsel %vm983_vm4, %v3166_v27, -inf }
 0x327   : > { %1405 = vadd.xlane.f32.xlu1 %v1404_v30  ;;  %v979_v32 = vpop.f32.mrf.mxu0  ;;  %v901_v33 = vpop.f32.mrf.mxu1  ;;  %988 = vmax.xlane.f32.xlu0 %v987_v31 }
 0x328   : > { %v3171_v35 = vadd.f32 %v901_v33, %v669_v19  ;;  %v3178_v45 = vadd.f32 %v979_v32, %v669_v19 }
 0x329   : > { %v2721_v36 = vpop.f32.mrf.mxu0  ;;  %v2716_v37 = vpop.f32.mrf.mxu1 }
 0x32a   : > { %v990_v39 = vsel %vm983_vm4, %v3171_v35, -inf  ;;  %v993_v48 = vsel %vm983_vm4, %v3178_v45, -inf }
 0x32b   : > { %1354 = vadd.xlane.f32.xlu1 %v1353_v38  ;;  %991 = vmax.xlane.f32.xlu0 %v990_v39 }
 0x32f   : > { %1411 = vadd.xlane.f32.xlu1 %v1410_v41  ;;  %1402 = vadd.xlane.f32.xlu0 %v1401_v43 }
 0x333   : > { %1360 = vadd.xlane.f32.xlu1 %v1359_v46  ;;  %1351 = vadd.xlane.f32.xlu0 %v1350_v47 }
 0x337   : > { %994 = vmax.xlane.f32.xlu1 %v993_v48  ;;  %1408 = vadd.xlane.f32.xlu0 %v1407_v49 }
 0x33b   : > { %1357 = vadd.xlane.f32.xlu0 %v1356_v51 }
 0x348   : > { %1028 = vrot.lane.b32.xlu1 %v3072_v12, %s2947_s26 }
 0x34c   : > { %1107 = vrot.lane.b32.xlu1 %v3080_v15, %s2947_s26 }
 0x350   : > { %1184 = vrot.lane.b32.xlu1 %v3082_v17, %s2947_s26 }
 0x351   : > { %1382 = vperm.xlu0 %2836, %v2603_v52  }
 0x354   : > { %1261 = vrot.lane.b32.xlu1 %v3094_v21, %s2947_s26 }
 0x3ac   : > { %v986_v53 = vpop.xlane.xlu1 %985 }
 0x3ad   : > { %v996_v36 = vsub.f32 %v3162_v22, %v986_v53 }
 0x3af   : > { %v1000_v37 = vmul.f32 1.442695, %v996_v36 }
 0x3b0   : > { %v1406_v54 = vpop.xlane.xlu1 %1405  ;;  %v989_v55 = vpop.xlane.xlu0 %988 }
 0x3b1   : > { %v1414_v56 = vadd.f32 1e-12, %v1406_v54  ;;  %v997_v38 = vsub.f32 %v3166_v27, %v989_v55 }
 0x3b3   : > { %2869 = vrsqrt.f32 %v1414_v56  ;;  %v1002_v39 = vmul.f32 1.442695, %v997_v38 }
 0x3b4   : > { %v1355_v57 = vpop.xlane.xlu1 %1354  ;;  %v992_v58 = vpop.xlane.xlu0 %991 }
 0x3b5   : > { %v1363_v59 = vadd.f32 1e-12, %v1355_v57  ;;  %v998_v40 = vsub.f32 %v3171_v35, %v992_v58 }
 0x3b7   : > { %2871 = vrsqrt.f32 %v1363_v59  ;;  %v1004_v41 = vmul.f32 1.442695, %v998_v40 }
 0x3b8   : > { %v1412_v60 = vpop.xlane.xlu1 %1411  ;;  %v1403_v61 = vpop.xlane.xlu0 %1402 }
 0x3b9   : > { %v1413_v62 = vadd.f32 1e-12, %v1403_v61  ;;  %v1416_v2 = vadd.f32 1e-12, %v1412_v60 }
 0x3bb   : > { %2873 = vrsqrt.f32 %v1413_v62 }
 0x3bc   : > { %v1361_v63 = vpop.xlane.xlu1 %1360  ;;  %v1352_v0 = vpop.xlane.xlu0 %1351 }
 0x3bd   : > { %v1362_v3 = vadd.f32 1e-12, %v1352_v0  ;;  %v1365_v22 = vadd.f32 1e-12, %v1361_v63 }
 0x3bf   : > { %2875 = vrsqrt.f32 %v1362_v3 }
 0x3c0   : > { %v2870_v4 = vpop.eup %2869  ;;  %v995_v5 = vpop.xlane.xlu1 %994  ;;  %2877 = vrsqrt.f32 %v1416_v2 }
 0x3c1   : > { %v1409_v6 = vpop.xlane.xlu0 %1408  ;;  %v1422_v7 = vmul.f32 %v2870_v4, %v3080_v15  ;;  %v999_v42 = vsub.f32 %v3178_v45, %v995_v5 }
 0x3c2   : > { %v1415_v8 = vadd.f32 1e-12, %v1409_v6 }
 0x3c3   : > { %1511 = vrot.lane.b32.xlu1 %v1422_v7, %s2945_s20  ;;  %v1006_v43 = vmul.f32 1.442695, %v999_v42 }
 0x3c4   : > { %2879 = vrsqrt.f32 %v1415_v8  ;;  %v1029_v9 = vpop.permute.xlu1 %1028  ;;  %v2872_v13 = vpop.eup %2871 }
 0x3c5   : > { %v1358_v10 = vpop.xlane.xlu0 %1357  ;;  %2723 = vmatpush3.msk.msra.mxu1 %vm1034_vm5, %v1029_v9  ;;  %v1371_v19 = vmul.f32 %v2872_v13, %v3080_v15 }
 0x3c6   : > { %v1364_v11 = vadd.f32 1e-12, %v1358_v10  ;;  %2732 = vmatprep.subr.mxu1 %v2941_v1 }
 0x3c8   : > { %2881 = vrsqrt.f32 %v1364_v11  ;;  %v1108_v14 = vpop.permute.xlu1 %1107  ;;  %v2874_v16 = vpop.eup %2873 }
 0x3c9   : > { %2728 = vmatpush3.msk.msra.mxu0 %vm1034_vm5, %v1108_v14  ;;  %v1421_v18 = vmul.f32 %v2874_v16, %v3072_v12  ;;  %2883 = vpow2.f32 %v1000_v37 }
 0x3ca   : > { %2737 = vmatprep.subr.mxu0 %v2941_v1  ;;  %2885 = vpow2.f32 %v1002_v39 }
 0x3cb   : > { %1431 = vrot.lane.b32.xlu0 %v1421_v18, %s2945_s20  ;;  %2887 = vpow2.f32 %v1004_v41 }
 0x3cc   : > { %v2876_v20 = vpop.eup %2875  ;;  %v1383_v23 = vpop.permute.xlu0 %1382  ;;  %2889 = vpow2.f32 %v1006_v43 }
 0x3cd   : > { %v1386_v24 = vmul.f32 %v1383_v23, %v1371_v19  ;;  %v1370_v25 = vmul.f32 %v2876_v20, %v3072_v12  ;;  %v2878_v26 = vpop.eup %2877  ;;  %2891 = vrsqrt.f32 %v1365_v22  ;;  %v1185_v53 = vpop.permute.xlu1 %1184 }
 0x3ce   : > { %v1424_v30 = vmul.f32 %v2878_v26, %v3094_v21 }
 0x3cf   : > { %1508 = vrot.lane.b32.xlu1 %v1386_v24, %s2946_s21  ;;  %v1385_v28 = vmul.f32 %v1383_v23, %v1370_v25 }
 0x3d1   : > { %v2880_v29 = vpop.eup %2879  ;;  %1428 = vrot.lane.b32.xlu0 %v1385_v28, %s2946_s21  ;;  %v1262_v54 = vpop.permute.xlu1 %1261 }
 0x3d2   : > { %v1423_v31 = vmul.f32 %v2880_v29, %v3082_v17 }
 0x3d3   : > { %1671 = vrot.lane.b32.xlu1 %v1424_v30, %s2945_s20 }
 0x3d5   : > { %v2882_v32 = vpop.eup %2881  ;;  %1591 = vrot.lane.b32.xlu0 %v1423_v31, %s2945_s20 }
 0x3d6   : > { %v1372_v33 = vmul.f32 %v2882_v32, %v3082_v17  ;;  %v2884_v44 = vpop.eup %2883 }
 0x3d7   : > { %v1008_v46 = vsel %vm983_vm4, %v2884_v44, 0.0  ;;  %v2886_v47 = vpop.eup %2885 }
 0x3d8   : > { %v1387_v34 = vmul.f32 %v1383_v23, %v1372_v33  ;;  %v1011_v48 = vsel %vm983_vm4, %v2886_v47, 0.0  ;;  %v2888_v27 = vpop.eup %2887 }
 0x3d9   : > { %v1014_v35 = vsel %vm983_vm4, %v2888_v27, 0.0  ;;  %v2890_v49 = vpop.eup %2889 }
 0x3da   : > { %1588 = vrot.lane.b32.xlu0 %v1387_v34, %s2946_s21  ;;  %v1017_v45 = vsel %vm983_vm4, %v2890_v49, 0.0  ;;  %v2892_v50 = vpop.eup %2891 }
 0x3db   : > { %v1373_v51 = vmul.f32 %v2892_v50, %v3094_v21 }
 0x3dd   : > { %v1388_v52 = vmul.f32 %v1383_v23, %v1373_v51  ;;  %v2604_v23 = vld [vmem:[%s3425_s6 + $0x4] sm:$0xf] }
 0x3f7   : > { %1009 = vadd.xlane.f32.xlu1 %v1008_v46 }
 0x3fb   : > { %1012 = vadd.xlane.f32.xlu1 %v1011_v48 }
 0x3ff   : > { %1015 = vadd.xlane.f32.xlu1 %v1014_v35 }
 0x403   : > { %1018 = vadd.xlane.f32.xlu1 %v1017_v45 }
 0x414   : > { %1668 = vrot.lane.b32.xlu1 %v1388_v52, %s2946_s21 }
 0x435   : > { %v1512_v55 = vpop.permute.xlu1 %1511 }
 0x43d   : > { %v1432_v0 = vpop.permute.xlu0 %1431 }
 0x441   : > { %v1509_v56 = vpop.permute.xlu1 %1508 }
 0x443   : > { %v1429_v4 = vpop.permute.xlu0 %1428 }
 0x445   : > { %v1672_v57 = vpop.permute.xlu1 %1671 }
 0x447   : > { %v1592_v8 = vpop.permute.xlu0 %1591 }
 0x44c   : > { %v1589_v10 = vpop.permute.xlu0 %1588 }
 0x480   : > { %v1010_v58 = vpop.xlane.xlu1 %1009 }
 0x481   : > { %2893 = vrcp.f32 %v1010_v58 }
 0x484   : > { %v1013_v59 = vpop.xlane.xlu1 %1012 }
 0x485   : > { %2895 = vrcp.f32 %v1013_v59 }
 0x488   : > { %v1016_v60 = vpop.xlane.xlu1 %1015 }
 0x489   : > { %2897 = vrcp.f32 %v1016_v60 }
 0x48c   : > { %v1019_v61 = vpop.xlane.xlu1 %1018 }
 0x48d   : > { %2899 = vrcp.f32 %v1019_v61 }
 0x48e   : > { %v2894_v62 = vpop.eup %2893 }
 0x48f   : > { %v1021_v63 = vmul.f32 %v2894_v62, %v2884_v44 }
 0x490   : > { %v1669_v11 = vpop.permute.xlu1 %1668 }
 0x491   : > { %2725 = vmatmul.mubr.msk.f32.vlgmr.msra.gmra.mxu1 %vm1030_vm6, %v1021_v63 }
 0x492   : > { %v2896_v2 = vpop.eup %2895  ;;  %2733 = vmatpush3.msk.msra.mxu1 %vm1034_vm5, %v1185_v53  ;;  %2734 = vmatprep.mubr.msk.f32.mxu1 %vm2942_vm0, %v2941_v1 }
 0x493   : > { %v1023_v3 = vmul.f32 %v2896_v2, %v2886_v47  ;;  %2742 = vmatprep.subr.mxu1 %v2941_v1 }
 0x495   : > { %2730 = vmatmul.mubr.msk.f32.vlgmr.msra.gmra.mxu0 %vm1030_vm6, %v1023_v3 }
 0x496   : > { %v2898_v5 = vpop.eup %2897  ;;  %2738 = vmatpush3.msk.msra.mxu0 %vm1034_vm5, %v1262_v54  ;;  %2739 = vmatprep.mubr.msk.f32.mxu0 %vm2942_vm0, %v2941_v1 }
 0x497   : > { %v1025_v6 = vmul.f32 %v2898_v5, %v2888_v27  ;;  %2747 = vmatprep.subr.mxu0 %v2941_v1 }
 0x499   : > { %2735 = vmatmul.mubr.msk.f32.vlgmr.msra.gmra.mxu1 %vm1030_vm6, %v1025_v6 }
 0x49a   : > { %v2900_v7 = vpop.eup %2899  ;;  %2743 = vmatpush3.xpose.msk.msra.mxu1 %vm673_vm3, %v1432_v0  ;;  %2744 = vmatprep.mubr.msk.f32.mxu1 %vm2942_vm0, %v2941_v1 }
 0x49b   : > { %2752 = vmatprep.subr.mxu1 %v2941_v1  ;;  %v1027_v9 = vmul.f32 %v2900_v7, %v2890_v49 }
 0x49d   : > { %2740 = vmatmul.mubr.msk.f32.vlgmr.msra.gmra.mxu0 %vm1030_vm6, %v1027_v9  ;;  %2745 = vmatmul.mubr.msk.f32.vlgmr.msra.gmra.mxu1 %vm673_vm3, %v1429_v4 }
 0x49e   : > { %2748 = vmatpush3.xpose.msk.msra.mxu0 %vm673_vm3, %v1512_v55  ;;  %2753 = vmatpush3.xpose.msk.msra.mxu1 %vm673_vm3, %v1592_v8 }
 0x49f   : > { %2749 = vmatprep.mubr.msk.f32.mxu0 %vm2942_vm0, %v2941_v1  ;;  %2754 = vmatprep.mubr.msk.f32.mxu1 %vm2942_vm0, %v2941_v1 }
 0x4a0   : > { %2757 = vmatprep.subr.mxu0 %v2941_v1  ;;  %2762 = vmatprep.subr.mxu1 %v2941_v1 }
 0x4a1   : > { %2750 = vmatmul.mubr.msk.f32.vlgmr.msra.gmra.mxu0 %vm673_vm3, %v1509_v56  ;;  %2755 = vmatmul.mubr.msk.f32.vlgmr.msra.gmra.mxu1 %vm673_vm3, %v1589_v10  ;;  %v2841_v10 = vld [vmem:[%s3422_s3 + $0x8] sm:$0xff]  }
 0x4a2   : > { %2758 = vmatpush3.xpose.msk.msra.mxu0 %vm673_vm3, %v1672_v57  ;;  %2759 = vmatprep.mubr.msk.f32.mxu0 %vm2942_vm0, %v2941_v1 }
 0x4a3   : > { %2767 = vmatprep.subr.mxu0 %v2941_v1  ;;  %2764 = vmatprep.mubr.msk.f32.mxu1 %vm2942_vm0, %v2941_v1 }
 0x4a5   : > { %2760 = vmatmul.mubr.msk.f32.vlgmr.msra.gmra.mxu0 %vm673_vm3, %v1669_v11  ;;  %v2842_v11 = vld [vmem:[%s3422_s3] sm:$0xff]  }
 0x4a6   : > { %2769 = vmatprep.mubr.msk.f32.mxu0 %vm2942_vm0, %v2941_v1 }
 0x551   : > { %v3257_v13 = vpop.f32.mrf.mxu1 }
 0x553   : > { %v2726_v14 = vpop.f32.mrf.mxu1 }
 0x555   : > { %v3259_v16 = vpop.f32.mrf.mxu0 }
 0x557   : > { %v2731_v18 = vpop.f32.mrf.mxu0 }
 0x559   : > { %v3261_v19 = vpop.f32.mrf.mxu1 }
 0x55b   : > { %v2736_v20 = vpop.f32.mrf.mxu1 }
 0x55d   : > { %v3266_v24 = vpop.f32.mrf.mxu0  ;;  %v1503_v25 = vpop.f32.mrf.mxu1 }
 0x55e   : > { %v1504_v26 = vadd.f32 %v2604_v23, %v1503_v25 }
 0x55f   : > { %v2741_v28 = vpop.f32.mrf.mxu0  ;;  %v2746_v29 = vpop.f32.mrf.mxu1 }
 0x560   : > { %v1747_v30 = vsel %vm983_vm4, %v1504_v26, -inf }
 0x561   : > { %1748 = vmax.xlane.f32.xlu0 %v1747_v30  ;;  %v1583_v31 = vpop.f32.mrf.mxu0  ;;  %v1663_v32 = vpop.f32.mrf.mxu1 }
 0x562   : > { %v1584_v33 = vadd.f32 %v2604_v23, %v1583_v31  ;;  %v1664_v34 = vadd.f32 %v2604_v23, %v1663_v32 }
 0x563   : > { %v2751_v36 = vpop.f32.mrf.mxu0  ;;  %v2756_v37 = vpop.f32.mrf.mxu1 }
 0x564   : > { %v1753_v38 = vsel %vm983_vm4, %v1664_v34, -inf  ;;  %v1750_v39 = vsel %vm983_vm4, %v1584_v33, -inf }
 0x565   : > { %1754 = vmax.xlane.f32.xlu0 %v1753_v38  ;;  %1751 = vmax.xlane.f32.xlu1 %v1750_v39  ;;  %v1743_v40 = vpop.f32.mrf.mxu0 }
 0x566   : > { %v1744_v41 = vadd.f32 %v2604_v23, %v1743_v40 }
 0x567   : > { %v2761_v42 = vpop.f32.mrf.mxu0 }
 0x568   : > { %v1756_v43 = vsel %vm983_vm4, %v1744_v41, -inf }
 0x569   : > { %1757 = vmax.xlane.f32.xlu0 %v1756_v43 }
 0x576   : > { %1791 = vrot.lane.b32.xlu1 %v3072_v12, %s2948_s17 }
 0x5ea   : > { %v1749_v44 = vpop.xlane.xlu0 %1748 }
 0x5eb   : > { %v1759_v46 = vsub.f32 %v1504_v26, %v1749_v44 }
 0x5ed   : > { %v1763_v47 = vmul.f32 1.442695, %v1759_v46 }
 0x5ee   : > { %v1755_v22 = vpop.xlane.xlu0 %1754  ;;  %v1752_v48 = vpop.xlane.xlu1 %1751 }
 0x5ef   : > { %2901 = vpow2.f32 %v1763_v47  ;;  %v1761_v27 = vsub.f32 %v1664_v34, %v1755_v22  ;;  %v1760_v35 = vsub.f32 %v1584_v33, %v1752_v48 }
 0x5f1   : > { %v1767_v49 = vmul.f32 1.442695, %v1761_v27  ;;  %v1765_v45 = vmul.f32 1.442695, %v1760_v35 }
 0x5f2   : > { %v1792_v50 = vpop.permute.xlu1 %1791  ;;  %v1758_v51 = vpop.xlane.xlu0 %1757 }
 0x5f3   : > { %2903 = vpow2.f32 %v1767_v49  ;;  %v1762_v52 = vsub.f32 %v1744_v41, %v1758_v51  ;;  %2763 = vmatpush3.msk.msra.mxu1 %vm1034_vm5, %v1792_v50 }
 0x5f4   : > { %2905 = vpow2.f32 %v1765_v45  ;;  %2772 = vmatprep.subr.mxu1 %v2941_v1 }
 0x5f5   : > { %v1769_v12 = vmul.f32 1.442695, %v1762_v52 }
 0x5f7   : > { %2907 = vpow2.f32 %v1769_v12 }
 0x5fc   : > { %v2902_v53 = vpop.eup %2901 }
 0x5fd   : > { %v1771_v54 = vsel %vm983_vm4, %v2902_v53, 0.0 }
 0x5fe   : > { %1772 = vadd.xlane.f32.xlu1 %v1771_v54  ;;  %v2844_v54 = vld [vmem:[%s3428_s9] sm:$0xff]  }
 0x600   : > { %v2904_v55 = vpop.eup %2903 }
 0x601   : > { %v2906_v56 = vpop.eup %2905  ;;  %v1777_v57 = vsel %vm983_vm4, %v2904_v55, 0.0 }
 0x602   : > { %1778 = vadd.xlane.f32.xlu1 %v1777_v57  ;;  %v1774_v58 = vsel %vm983_vm4, %v2906_v56, 0.0 }
 0x603   : > { %1775 = vadd.xlane.f32.xlu0 %v1774_v58 }
 0x604   : > { %v2908_v59 = vpop.eup %2907 }
 0x605   : > { %v1780_v60 = vsel %vm983_vm4, %v2908_v59, 0.0 }
 0x607   : > { %1781 = vadd.xlane.f32.xlu0 %v1780_v60 }
 0x613   : > { %1945 = vrot.lane.b32.xlu1 %v3082_v17, %s2948_s17 }
 0x617   : > { %2022 = vrot.lane.b32.xlu1 %v3094_v21, %s2948_s17 }
 0x61d   : > { %1868 = vrot.lane.b32.xlu0 %v3080_v15, %s2948_s17 }
 0x687   : > { %v1773_v61 = vpop.xlane.xlu1 %1772 }
 0x688   : > { %2909 = vrcp.f32 %v1773_v61 }
 0x68b   : > { %v1779_v62 = vpop.xlane.xlu1 %1778 }
 0x68c   : > { %2911 = vrcp.f32 %v1779_v62  ;;  %v1776_v63 = vpop.xlane.xlu0 %1775  ;;  %v2625_v62 = vld [vmem:[%s3426_s7] ss:$0 sm:$0xff] }
 0x68d   : > { %2913 = vrcp.f32 %v1776_v63 }
 0x68f   : > { %v1946_v17 = vpop.permute.xlu1 %1945 }
 0x690   : > { %v1782_v0 = vpop.xlane.xlu0 %1781 }
 0x691   : > { %2915 = vrcp.f32 %v1782_v0  ;;  %v2626_v0 = vld [vmem:[%s3427_s8] ss:$0 sm:$0xff] }
 0x693   : > { %v2023_v7 = vpop.permute.xlu1 %2022 }
 0x694   : > { %v1869_v2 = vpop.permute.xlu0 %1868 }
 0x695   : > { %v2910_v3 = vpop.eup %2909  ;;  %2768 = vmatpush3.msk.msra.mxu0 %vm1034_vm5, %v1869_v2 }
 0x696   : > { %v1784_v4 = vmul.f32 %v2910_v3, %v2902_v53  ;;  %2777 = vmatprep.subr.mxu0 %v2941_v1  ;;  %v2843_v53 = vld [vmem:[%s3428_s9 + $0x8] sm:$0xff]  }
 0x698   : > { %2765 = vmatmul.mubr.msk.f32.vlgmr.msra.gmra.mxu1 %vm1030_vm6, %v1784_v4 }
 0x699   : > { %v2912_v21 = vpop.eup %2911  ;;  %2773 = vmatpush3.msk.msra.mxu1 %vm1034_vm5, %v1946_v17  ;;  %2774 = vmatprep.mubr.msk.f32.mxu1 %vm2942_vm0, %v2941_v1 }
 0x69a   : > { %v2914_v15 = vpop.eup %2913  ;;  %v1788_v5 = vmul.f32 %v2912_v21, %v2904_v55  ;;  %2798 = vmatprep.subr.bf16.mxu1 %v2941_v1 }
 0x69b   : > { %v1786_v6 = vmul.f32 %v2914_v15, %v2906_v56 }
 0x69c   : > { %2775 = vmatmul.mubr.msk.f32.vlgmr.msra.gmra.mxu1 %vm1030_vm6, %v1788_v5 }
 0x69d   : > { %2770 = vmatmul.mubr.msk.f32.vlgmr.msra.gmra.mxu0 %vm1030_vm6, %v1786_v6  ;;  %2814 = vmatprep.mubr.msk.bf16.mxu1 %vm2942_vm0, %v2941_v1 }
 0x69e   : > { %v2916_v8 = vpop.eup %2915  ;;  %2778 = vmatpush3.msk.msra.mxu0 %vm1034_vm5, %v2023_v7  ;;  %2779 = vmatprep.mubr.msk.f32.mxu0 %vm2942_vm0, %v2941_v1  ;;  %v2929_v7 = vld [vmem:[%s3060_s28 + $0x4] sm:$0xf] }
 0x69f   : > { %v1790_v9 = vmul.f32 %v2916_v8, %v2908_v59  ;;  %2782 = vmatprep.subr.bf16.mxu0 %v2941_v1 }
 0x6a1   : > { %2780 = vmatmul.mubr.msk.f32.vlgmr.msra.gmra.mxu0 %vm1030_vm6, %v1790_v9  ;;  %v2930_v9 = vld [vmem:[%s3060_s28] sm:$0xf] }
 0x6a2   : > { %2786 = vmatprep.mubr.msk.bf16.mxu0 %vm2942_vm0, %v2941_v1  ;;  %2783 = vmatpush3.bf16.msra.mxu0 %v2841_v10 }
 0x6a3   : > { %2784 = vmatprep.subr.bf16.mxu0 %v2941_v1 }
 0x6a6   : > { %2785 = vmatpush3.bf16.msra.mxu0 %v2842_v11  ;;  %v2931_v11 = vld [vmem:[%s3060_s28 + $0x8] sm:$0xf] }
 0x6a7   : > { %2790 = vmatprep.subr.bf16.mxu0 %v2941_v1 }
 0x758   : > { %v1864_v14 = vpop.f32.mrf.mxu1 }
 0x759   : > { %2103 = vrot.lane.b32.xlu0 %v1864_v14, %s2949_s23 }
 0x75a   : > { %v2766_v18 = vpop.f32.mrf.mxu1 }
 0x75b   : > { %v2932_v18 = vld [vmem:[%s3060_s28 + $0xc] sm:$0xf] }
 0x75c   : > { %v2018_v20 = vpop.f32.mrf.mxu1 }
 0x75d   : > { %v1941_v23 = vpop.f32.mrf.mxu0  ;;  %2107 = vrot.lane.b32.xlu0 %v2018_v20, %s2949_s23 }
 0x75e   : > { %2105 = vrot.lane.b32.xlu1 %v1941_v23, %s2949_s23  ;;  %v2776_v25 = vpop.f32.mrf.mxu1 }
 0x75f   : > { %v2771_v26 = vpop.f32.mrf.mxu0 }
 0x761   : > { %v2095_v28 = vpop.f32.mrf.mxu0 }
 0x762   : > { %2109 = vrot.lane.b32.xlu1 %v2095_v28, %s2949_s23  ;;  %v2845_v28 = vld [vmem:[%s3430_s11 + $0x38] sm:$0xff]  }
 0x763   : > { %v2781_v29 = vpop.f32.mrf.mxu0  ;;  %2799 = vmatpush3.bf16.msra.mxu1 %v2845_v28  ;;  %v2640_v28 = vld [vmem:[%s3432_s13] ss:$0 sm:$0xff] }
 0x764   : > { %2800 = vmatprep.subr.bf16.mxu1 %v2941_v1  ;;  %v2846_v29 = vld [vmem:[%s3430_s11 + $0x30] sm:$0xff]  }
 0x767   : > { %2801 = vmatpush3.bf16.msra.mxu1 %v2846_v29 }
 0x768   : > { %2802 = vmatprep.subr.bf16.mxu1 %v2941_v1 }
 0x7cb   : > { %v2104_v30 = vpop.permute.xlu0 %2103 }
 0x7cc   : > { %v2115_v36 = vsel %vm673_vm3, %v3257_v13, %v2104_v30  ;;  %v2847_v30 = vld [vmem:[%s3430_s11 + $0x28] sm:$0xff]  }
 0x7cd   : > { %2803 = vmatpush3.bf16.msra.mxu1 %v2847_v30  ;;  %v2641_v30 = vld [vmem:[%s3433_s14] ss:$0 sm:$0xff] }
 0x7ce   : > { %2804 = vmatprep.subr.bf16.mxu1 %v2941_v1 }
 0x7cf   : > { %v2108_v32 = vpop.permute.xlu0 %2107 }
 0x7d0   : > { %v2106_v31 = vpop.permute.xlu1 %2105  ;;  %v2117_v37 = vsel %vm673_vm3, %v3261_v19, %v2108_v32  ;;  %v2849_v32 = vld [vmem:[%s3430_s11 + $0x18] sm:$0xff]  }
 0x7d1   : > { %v2116_v33 = vsel %vm673_vm3, %v3259_v16, %v2106_v31  ;;  %v2621_v16 = vld [vmem:[%s3423_s4] ss:$0 sm:$0xff] }
 0x7d2   : > { %v2123_v39 = vcombine.low %v2115_v36, %v2116_v33  ;;  %v2848_v31 = vld [vmem:[%s3430_s11 + $0x20] sm:$0xff]   ;;  %v2850_v33 = vld [vmem:[%s3430_s11 + $0x10] sm:$0xff]  }
 0x7d3   : > { %2805 = vmatpush3.bf16.msra.mxu1 %v2848_v31  ;;  %v2852_v36 = vld [vmem:[%s3430_s11] sm:$0xff]  }
 0x7d4   : > { %v2110_v34 = vpop.permute.xlu1 %2109  ;;  %2806 = vmatprep.subr.bf16.mxu1 %v2941_v1 }
 0x7d5   : > { %v2118_v38 = vsel %vm673_vm3, %v3266_v24, %v2110_v34  ;;  %v2851_v34 = vld [vmem:[%s3430_s11 + $0x8] sm:$0xff]  }
 0x7d6   : > { %v2124_v40 = vcombine.low %v2117_v37, %v2118_v38  ;;  %v2627_v37 = vld [vmem:[%s3429_s10] ss:$0 sm:$0xff] }
 0x7d7   : > { %2807 = vmatpush3.bf16.msra.mxu1 %v2849_v32 }
 0x7d8   : > { %v2127_v41 = vpack.c.bf16 %v2124_v40, %v2123_v39  ;;  %2808 = vmatprep.subr.bf16.mxu1 %v2941_v1 }
 0x7da   : > { %2787 = vmatmul.mubr.msk.bf16.vlgmr.msra.gmra.mxu0 %vm535_vm1, %v2127_v41 }
 0x7db   : > { %2794 = vmatprep.mubr.msk.bf16.mxu0 %vm2942_vm0, %v2941_v1  ;;  %2791 = vmatpush3.bf16.msra.mxu0 %v2843_v53 }
 0x7dc   : > { %2792 = vmatprep.subr.bf16.mxu0 %v2941_v1  ;;  %2809 = vmatpush3.bf16.msra.mxu1 %v2850_v33 }
 0x7dd   : > { %2810 = vmatprep.subr.bf16.mxu1 %v2941_v1 }
 0x7df   : > { %2793 = vmatpush3.bf16.msra.mxu0 %v2844_v54  ;;  %v2631_v54 = vld [vmem:[%s3431_s12] ss:$0 sm:$0xff] }
 0x7e0   : > { %2811 = vmatpush3.bf16.msra.mxu1 %v2851_v34 }
 0x7e1   : > { %2812 = vmatprep.subr.bf16.mxu1 %v2941_v1 }
 0x7e4   : > { %2813 = vmatpush3.bf16.msra.mxu1 %v2852_v36 }
 0x89a   : > { %v2188_v42 = vpop.f32.mrf.mxu0 }
 0x89b   : > { %v2189_v13 = vadd.f32 %v2621_v16, %v2188_v42 }
 0x89c   : > { %v2788_v43 = vpop.f32.mrf.mxu0 }
 0x89d   : > { %v2197_v19 = vsel %vm535_vm1, %v2189_v13, 0.0 }
 0x89e   : > { %2198 = vadd.xlane.f32.xlu0 %v2197_v19  ;;  %v2191_v44 = vpop.f32.mrf.mxu0 }
 0x89f   : > { %v2192_v24 = vadd.f32 %v2621_v16, %v2191_v44 }
 0x8a0   : > { %v2789_v46 = vpop.f32.mrf.mxu0 }
 0x8a1   : > { %v2200_v47 = vsel %vm535_vm1, %v2192_v24, 0.0 }
 0x8a2   : > { %2201 = vadd.xlane.f32.xlu1 %v2200_v47 }
 0x927   : > { %v2199_v22 = vpop.xlane.xlu0 %2198 }
 0x928   : > { %v2204_v48 = vmul.f32 0.03125, %v2199_v22 }
 0x92a   : > { %v2206_v27 = vsub.f32 %v2189_v13, %v2204_v48 }
 0x92b   : > { %v2202_v35 = vpop.xlane.xlu1 %2201 }
 0x92c   : > { %v2205_v49 = vmul.f32 0.03125, %v2202_v35  ;;  %v2208_v45 = vmul.f32 %v2206_v27, %v2206_v27 }
 0x92e   : > { %v2207_v50 = vsub.f32 %v2192_v24, %v2205_v49  ;;  %v2210_v51 = vsel %vm535_vm1, %v2208_v45, 0.0 }
 0x92f   : > { %2211 = vadd.xlane.f32.xlu0 %v2210_v51 }
 0x930   : > { %v2209_v52 = vmul.f32 %v2207_v50, %v2207_v50 }
 0x932   : > { %v2213_v12 = vsel %vm535_vm1, %v2209_v52, 0.0 }
 0x933   : > { %2214 = vadd.xlane.f32.xlu0 %v2213_v12 }
 0x9b8   : > { %v2212_v55 = vpop.xlane.xlu0 %2211 }
 0x9b9   : > { %v2216_v56 = vmul.f32 0.03125, %v2212_v55 }
 0x9bb   : > { %v2218_v57 = vadd.f32 1e-05, %v2216_v56 }
 0x9bc   : > { %v2215_v58 = vpop.xlane.xlu0 %2214 }
 0x9bd   : > { %2917 = vrsqrt.f32 %v2218_v57  ;;  %v2217_v59 = vmul.f32 0.03125, %v2215_v58 }
 0x9bf   : > { %v2219_v60 = vadd.f32 1e-05, %v2217_v59 }
 0x9c1   : > { %2919 = vrsqrt.f32 %v2219_v60 }
 0x9ca   : > { %v2918_v61 = vpop.eup %2917 }
 0x9cb   : > { %v2222_v63 = vmul.f32 %v2918_v61, %v2206_v27 }
 0x9cd   : > { %v2230_v2 = vmul.f32 %v2625_v62, %v2222_v63 }
 0x9ce   : > { %v2920_v3 = vpop.eup %2919 }
 0x9cf   : > { %v2223_v4 = vmul.f32 %v2920_v3, %v2207_v50  ;;  %v2238_v17 = vadd.f32 %v2626_v0, %v2230_v2 }
 0x9d1   : > { %v2231_v21 = vmul.f32 %v2625_v62, %v2223_v4  ;;  %v2242_v15 = vcombine.high %v2238_v17, %v2238_v17  ;;  %v3347_v10 = vadd.f32 %v2930_v9, %v2238_v17 }
 0x9d3   : > { %v2239_v5 = vadd.f32 %v2626_v0, %v2231_v21  ;;  %v3344_v8 = vadd.f32 %v2929_v7, %v2242_v15 }
 0x9d5   : > { %v2243_v6 = vcombine.high %v2239_v5, %v2239_v5  ;;  %v3350_v14 = vadd.f32 %v2931_v11, %v2239_v5  ;;  %v2254_v23 = vcombine.low %v3347_v10, %v3344_v8 }
 0x9d7   : > { %v3353_v20 = vadd.f32 %v2932_v18, %v2243_v6 }
 0x9d9   : > { %v2255_v25 = vcombine.low %v3350_v14, %v3353_v20 }
 0x9db   : > { %v2258_v26 = vpack.c.bf16 %v2255_v25, %v2254_v23 }
 0x9dd   : > { %2795 = vmatmul.mubr.msk.bf16.vlgmr.msra.gmra.mxu0 %vm535_vm1, %v2258_v26 }
 0xa9d   : > { %v2319_v38 = vpop.f32.mrf.mxu0 }
 0xa9e   : > { %v2320_v39 = vadd.f32 %v2627_v37, %v2319_v38 }
 0xa9f   : > { %v2796_v40 = vpop.f32.mrf.mxu0 }
 0xaa0   : > { %v2326_v41 = vmul.f32 %v2320_v39, %v2320_v39 }
 0xaa1   : > { %v2322_v16 = vpop.f32.mrf.mxu0 }
 0xaa2   : > { %v2328_v42 = vmul.f32 %v2326_v41, %v2320_v39  ;;  %v2323_v13 = vadd.f32 %v2627_v37, %v2322_v16 }
 0xaa3   : > { %v2797_v43 = vpop.f32.mrf.mxu0 }
 0xaa4   : > { %v2330_v19 = vmul.f32 0.044715, %v2328_v42  ;;  %v2327_v44 = vmul.f32 %v2323_v13, %v2323_v13 }
 0xaa6   : > { %v2332_v1 = vadd.f32 %v2330_v19, %v2320_v39  ;;  %v2329_v24 = vmul.f32 %v2327_v44, %v2323_v13 }
 0xaa8   : > { %v2334_v46 = vmul.f32 0.7978846, %v2332_v1  ;;  %v2331_v47 = vmul.f32 0.044715, %v2329_v24 }
 0xaaa   : > { %2921 = vtanh.f32 %v2334_v46  ;;  %v2333_v22 = vadd.f32 %v2331_v47, %v2323_v13 }
 0xaac   : > { %v2335_v48 = vmul.f32 0.7978846, %v2333_v22 }
 0xaae   : > { %2923 = vtanh.f32 %v2335_v48 }
 0xab7   : > { %v2922_v27 = vpop.eup %2921 }
 0xab8   : > { %v2338_v35 = vadd.f32 1.0, %v2922_v27 }
 0xaba   : > { %v2340_v45 = vmul.f32 0.5, %v2338_v35 }
 0xabb   : > { %v2924_v49 = vpop.eup %2923 }
 0xabc   : > { %v2339_v50 = vadd.f32 1.0, %v2924_v49  ;;  %v2342_v52 = vmul.f32 %v2340_v45, %v2320_v39 }
 0xabe   : > { %v2341_v51 = vmul.f32 0.5, %v2339_v50 }
 0xac0   : > { %v2343_v12 = vmul.f32 %v2341_v51, %v2323_v13 }
 0xac2   : > { %v2344_v53 = vpack.c.bf16 %v2343_v12, %v2342_v52 }
 0xac4   : > { %2815 = vmatmul.mubr.bf16.vlgmr.msra.gmra.mxu1 %v2344_v53 }
 0xb84   : > { %v2450_v55 = vpop.f32.mrf.mxu1 }
 0xb85   : > { %v2451_v56 = vadd.f32 %v2631_v54, %v2450_v55 }
 0xb86   : > { %v2816_v57 = vpop.f32.mrf.mxu1 }
 0xb87   : > { %v2459_v58 = vsel %vm535_vm1, %v2451_v56, 0.0 }
 0xb88   : > { %2460 = vadd.xlane.f32.xlu1 %v2459_v58  ;;  %v2453_v59 = vpop.f32.mrf.mxu1 }
 0xb89   : > { %v2454_v60 = vadd.f32 %v2631_v54, %v2453_v59 }
 0xb8a   : > { %v2817_v61 = vpop.f32.mrf.mxu1 }
 0xb8b   : > { %v2462_v62 = vsel %vm535_vm1, %v2454_v60, 0.0 }
 0xb8c   : > { %2463 = vadd.xlane.f32.xlu0 %v2462_v62 }
 0xc11   : > { %v2461_v63 = vpop.xlane.xlu1 %2460 }
 0xc12   : > { %v2465_v0 = vmul.f32 0.03125, %v2461_v63 }
 0xc14   : > { %v2467_v2 = vsub.f32 %v2451_v56, %v2465_v0 }
 0xc15   : > { %v2464_v3 = vpop.xlane.xlu0 %2463 }
 0xc16   : > { %v2466_v4 = vmul.f32 0.03125, %v2464_v3  ;;  %v2469_v17 = vmul.f32 %v2467_v2, %v2467_v2 }
 0xc18   : > { %v2468_v21 = vsub.f32 %v2454_v60, %v2466_v4  ;;  %v2471_v15 = vsel %vm535_vm1, %v2469_v17, 0.0 }
 0xc19   : > { %2472 = vadd.xlane.f32.xlu1 %v2471_v15 }
 0xc1a   : > { %v2470_v5 = vmul.f32 %v2468_v21, %v2468_v21 }
 0xc1c   : > { %v2474_v6 = vsel %vm535_vm1, %v2470_v5, 0.0 }
 0xc1d   : > { %2475 = vadd.xlane.f32.xlu0 %v2474_v6 }
 0xca2   : > { %v2473_v7 = vpop.xlane.xlu1 %2472 }
 0xca3   : > { %v2477_v9 = vmul.f32 0.03125, %v2473_v7 }
 0xca5   : > { %v2479_v11 = vadd.f32 1e-05, %v2477_v9 }
 0xca6   : > { %v2476_v18 = vpop.xlane.xlu0 %2475 }
 0xca7   : > { %2925 = vrsqrt.f32 %v2479_v11  ;;  %v2478_v23 = vmul.f32 0.03125, %v2476_v18 }
 0xca9   : > { %v2480_v25 = vadd.f32 1e-05, %v2478_v23 }
 0xcab   : > { %2927 = vrsqrt.f32 %v2480_v25 }
 0xcb4   : > { %v2926_v26 = vpop.eup %2925 }
 0xcb5   : > { %v2483_v29 = vmul.f32 %v2926_v26, %v2467_v2 }
 0xcb7   : > { %v2491_v31 = vmul.f32 %v2640_v28, %v2483_v29 }
 0xcb8   : > { %v2928_v32 = vpop.eup %2927 }
 0xcb9   : > { %v2499_v33 = vadd.f32 %v2641_v30, %v2491_v31  ;;  %v2484_v34 = vmul.f32 %v2928_v32, %v2468_v21 }
 0xcbb   : > { %v2503_v36 = vcombine.high %v2499_v33, %v2499_v33  ;;  %v2507_v37 = vadd.f32 %v2499_v33, %v3347_v10  ;;  %v2492_v38 = vmul.f32 %v2640_v28, %v2484_v34 }
 0xcbd   : > { %v2508_v39 = vadd.f32 %v2503_v36, %v3344_v8  ;;  %2512 = vst.msk [vmem:[%s496_s27] sm:$0xf] %vm2511_vm7, %v2507_v37  ;;  %v2500_v40 = vadd.f32 %v2641_v30, %v2492_v38 }
 0xcbf   : > { %2513 = vst.msk [vmem:[%s496_s27 + $0x4] sm:$0xf] %vm2511_vm7, %v2508_v39  ;;  %v2504_v41 = vcombine.high %v2500_v40, %v2500_v40  ;;  %v2509_v16 = vadd.f32 %v2500_v40, %v3350_v14 }
 0xcc1   : > { %v2510_v42 = vadd.f32 %v2504_v41, %v3353_v20  ;;  %2514 = vst.msk [vmem:[%s496_s27 + $0x8] sm:$0xf] %vm2511_vm7, %v2509_v16 }
 0xcc3   : > { %2515 = vst.msk [vmem:[%s496_s27 + $0xc] sm:$0xf] %vm2511_vm7, %v2510_v42 }
 0xcc4 PF: > { %s25_s18 = sadd.s32 1, %s2939_s18  }
 0xcc5   : > { %p22_p4 = scmp.ge.s32.totalorder %s25_s18, 4  }
 0xcc7   :  { %24 = sbr.rel (!%p22_p4) target bundleno = 1 (0x1), region = 112 }

// kernel: swinv2_classifier_forward.8
= control target key start
LH: loop header
LB: loop body
LE: loop exit
PB: predicated region body
PF: predicated region fallthrough
CT: control target
= control target key end

     0   :  { %v2577_v1 = vmov 0   ;;  %vm118_vm0 = vcmask 523264   ;;  %v68_v13 = vlaneseq  ;;  %vm170_vm1 = vcmask 125952   ;;  %s2582_s27 = smov 112   ;;  %s2583_s17 = smov 96   ;;  %s3111_s1 = inlined_call_operand.vmem [shape: bf16[64,192], index: 1, kind: input, shape index: {}]   ;;  %s3112_s0 = inlined_call_operand.vmem [shape: f32[2,4,64], index: 0, kind: input, shape index: {}]   ;;  %s3113_s2 = inlined_call_operand.vmem [shape: f32[1,192], index: 2, kind: input, shape index: {}]   ;;  %s3114_s5 = inlined_call_operand.vmem [shape: f32[4,1,1], index: 5, kind: input, shape index: {}]   ;;  %s3115_s6 = inlined_call_operand.vmem [shape: f32[4,4,4], index: 6, kind: input, shape index: {}]   ;;  %s3116_s3 = inlined_call_operand.vmem [shape: bf16[64,64], index: 3, kind: input, shape index: {}]   ;;  %s3117_s4 = inlined_call_operand.vmem [shape: f32[1,64], index: 4, kind: input, shape index: {}]   ;;  %s3118_s9 = inlined_call_operand.vmem [shape: bf16[64,256], index: 9, kind: input, shape index: {}]   ;;  %s3119_s7 = inlined_call_operand.vmem [shape: f32[1,64], index: 7, kind: input, shape index: {}]   ;;  %s3120_s8 = inlined_call_operand.vmem [shape: f32[1,64], index: 8, kind: input, shape index: {}]   ;;  %s3121_s11 = inlined_call_operand.vmem [shape: bf16[256,64], index: 11, kind: input, shape index: {}]   ;;  %s3122_s10 = inlined_call_operand.vmem [shape: f32[1,256], index: 10, kind: input, shape index: {}]   ;;  %s3123_s12 = inlined_call_operand.vmem [shape: f32[1,64], index: 12, kind: input, shape index: {}]   ;;  %s3124_s13 = inlined_call_operand.vmem [shape: f32[1,64], index: 13, kind: input, shape index: {}]   ;;  %s3125_s14 = inlined_call_operand.vmem [shape: f32[1,64], index: 14, kind: input, shape index: {}]   ;;  %s3126_s15 = inlined_call_operand.vmem [shape: f32[2,4,64], index: 15, kind: output, shape index: {}]  }
   0x1   :  { %v2458_v0 = vld [vmem:[%s3111_s1 + $0x34] ss:$8 sps:$4 sm:$0xff]   ;;  %154 = vmatprep.mubr.bf16.mxu0 %v2577_v1  ;;  %2456 = vset.pattern.permute.xlu1 %v2577_v1  ;;  %v2460_v2 = vld [vmem:[%s3111_s1 + $0x30] ss:$8 sps:$4 sm:$0xff]   ;;  %v2461_v3 = vld [vmem:[%s3111_s1 + $0x24] ss:$8 sps:$4 sm:$0xff]  }
   0x2   :  { %2457 = vset.pattern.permute.xlu0 %v2577_v1  ;;  %130 = vmatprep.subr.bf16.mxu0 %v2458_v0  ;;  %v2463_v4 = vld [vmem:[%s3111_s1 + $0x20] ss:$8 sps:$4 sm:$0xff]   ;;  %v2464_v5 = vld [vmem:[%s3111_s1 + $0x14] ss:$8 sps:$4 sm:$0xff]   ;;  %v2466_v6 = vld [vmem:[%s3111_s1 + $0x10] ss:$8 sps:$4 sm:$0xff]  }
   0x3   :  { %131 = vmatpush1.bf16.msra.mxu0 %v2460_v2  ;;  %v51_v7 = vld [vmem:[%s3112_s0] sm:$0xf]  ;;  %v52_v8 = vld [vmem:[%s3112_s0 + $0x4] sm:$0xf]  ;;  %v2701_v14 = vshrl.u32 %v68_v13, 7  ;;  %v2580_v33 = vmov 0.0  }
   0x4   :  { %132 = vmatprep.subr.bf16.mxu0 %v2461_v3  ;;  %v2467_v9 = vld [vmem:[%s3111_s1 + $0x4] ss:$8 sps:$4 sm:$0xff]   ;;  %v55_v10 = vcombine.low %v51_v7, %v52_v8  ;;  %v2469_v11 = vld [vmem:[%s3111_s1] ss:$8 sps:$4 sm:$0xff]   ;;  %s2578_s1 = smov 64   ;;  %2354 = vmatprep.subr.mxu1 %v2580_v33  ;;  %vm2581_vm2 = vmmov 0  }
   0x5   :  { %v70_v15 = vsub.s32 0, %v2701_v14  ;;  %v2707_v16 = vld [vmem:[%s3113_s2] sm:$0x3]  ;;  %s2579_s2 = smov 48   ;;  %2356 = vmatprep.mubr.msk.f32.mxu1 %vm2581_vm2, %v2580_v33  ;;  %vm219_vm3 = vcmask 130048   ;;  %v74_v49 = vsub.s32 1, %v2701_v14 }
   0x6   :  { %v57_v12 = vpack.c.bf16 %v55_v10, %v55_v10  ;;  %v2217_v32 = vld [vmem:[%s3114_s5] ss:$0 sm:$0xff]  ;;  %vm400_vm4 = vcmask 1043456   ;;  %vm373_vm5 = vcmask 27648   ;;  %s2584_s18 = smov 32   ;;  %vm396_vm6 = vcmask 31744  }
   0x7   :  { %133 = vmatpush1.bf16.msra.mxu0 %v2463_v4  ;;  %v71_v17 = vrot.slane %v2707_v16, %v70_v15  ;;  %v75_v54 = vrot.slane %v2707_v16, %v74_v49  ;;  %v215_v58 = vld [vmem:[%s3115_s6] sm:$0xf]  ;;  %s2585_s23 = smov 16   ;;  %s2586_s24 = smov 80   ;;  %vm1735_vm7 = vcmask 261120   ;;  %vm1738_vm8 = vcmask 392192  }
   0x8   :  { %134 = vmatprep.subr.bf16.mxu0 %v2464_v5  ;;  %vm2201_vm9 = vcmask 519168  }
   0xb   :  { %135 = vmatpush1.bf16.msra.mxu0 %v2466_v6 }
   0xc   :  { %136 = vmatprep.subr.bf16.mxu0 %v2467_v9 }
   0xf   :  { %137 = vmatpush1.bf16.msra.mxu0 %v2469_v11 }
  0x10   :  { %2379 = vmatprep.subr.mxu0 %v2580_v33 }
  0x12   :  { %2216 = vmatmul.mubr.msk.bf16.vlgmr.msra.gmra.mxu0 %vm118_vm0, %v57_v12  ;;  %v2227_v12 = vld [vmem:[%s3114_s5 + $0x1] ss:$0 sm:$0xff] }
  0x13   :  { %2381 = vmatprep.mubr.msk.f32.mxu0 %vm2581_vm2, %v2580_v33 }
  0xd2   :  { %v156_v18 = vpop.f32.mrf.mxu0 }
  0xd3   :  { %v2712_v19 = vadd.f32 %v156_v18, %v71_v17 }
  0xd4   :  { %v2714_v20 = vpop.f32.mrf.mxu0 }
  0xd5   :  { %v2718_v21 = vcombine.high %v2712_v19, %v2712_v19  ;;  %v2722_v22 = vmul.f32 %v2712_v19, %v2712_v19  ;;  %v2773_v57 = vadd.f32 %v2714_v20, %v75_v54 }
  0xd6   :  { %v160_v23 = vpop.f32.mrf.mxu0 }
  0xd7   :  { %197 = vrot.lane.b32.xlu0 %v2722_v22, %s2578_s1  ;;  %v2728_v25 = vmul.f32 %v2718_v21, %v2718_v21  ;;  %v171_v26 = vsel %vm170_vm1, %v2722_v22, 0.0 }
  0xd8   :  { %v161_v24 = vpop.f32.mrf.mxu0 }
  0xd9   :  { %v174_v31 = vsel %vm170_vm1, %v2728_v25, 0.0 }
  0xdb   :  { %199 = vrot.lane.b32.xlu0 %v2728_v25, %s2578_s1 }
  0xfa   :  { %172 = vadd.xlane.f32.xlu0 %v171_v26 }
 0x110   :  { %581 = vrot.lane.b32.xlu0 %v2728_v25, %s2579_s2 }
 0x149   :  { %v198_v27 = vpop.permute.xlu0 %197 }
 0x14a   :  { %v203_v28 = vsel %vm170_vm1, %v198_v27, 0.0 }
 0x14b   :  { %204 = vadd.xlane.f32.xlu1 %v203_v28 }
 0x14d   :  { %v200_v29 = vpop.permute.xlu0 %199 }
 0x14e   :  { %v206_v30 = vsel %vm170_vm1, %v200_v29, 0.0 }
 0x14f   :  { %207 = vadd.xlane.f32.xlu1 %v206_v30 }
 0x153   :  { %175 = vadd.xlane.f32.xlu1 %v174_v31 }
 0x164   :  { %190 = vperm.xlu1 %2456, %v2217_v32  }
 0x183   :  { %v173_v42 = vpop.xlane.xlu0 %172 }
 0x184   :  { %v177_v44 = vadd.f32 1e-12, %v173_v42 }
 0x187   :  { %v582_v7 = vpop.permute.xlu0 %581 }
 0x188   :  { %v588_v8 = vsel %vm170_vm1, %v582_v7, 0.0 }
 0x1d4   :  { %v205_v34 = vpop.xlane.xlu1 %204 }
 0x1d5   :  { %v209_v35 = vadd.f32 1e-12, %v205_v34 }
 0x1d7   :  { %2503 = vrsqrt.f32 %v209_v35 }
 0x1d8   :  { %v208_v36 = vpop.xlane.xlu1 %207 }
 0x1d9   :  { %v210_v37 = vadd.f32 1e-12, %v208_v36 }
 0x1db   :  { %2505 = vrsqrt.f32 %v210_v37 }
 0x1dc   :  { %v176_v43 = vpop.xlane.xlu1 %175  ;;  %2507 = vrsqrt.f32 %v177_v44 }
 0x1dd   :  { %v178_v45 = vadd.f32 1e-12, %v176_v43 }
 0x1df   :  { %2509 = vrsqrt.f32 %v178_v45 }
 0x1e0   :  { %v191_v46 = vpop.permute.xlu1 %190 }
 0x1e4   :  { %v2504_v38 = vpop.eup %2503 }
 0x1e5   :  { %v213_v39 = vmul.f32 %v2504_v38, %v2712_v19 }
 0x1e7   :  { %217 = vrot.lane.b32.xlu1 %v213_v39, %s2578_s1 }
 0x1e8   :  { %v2506_v40 = vpop.eup %2505 }
 0x1e9   :  { %v214_v41 = vmul.f32 %v2506_v40, %v2718_v21  ;;  %v2508_v47 = vpop.eup %2507 }
 0x1ea   :  { %v181_v50 = vmul.f32 %v2508_v47, %v2712_v19 }
 0x1eb   :  { %296 = vrot.lane.b32.xlu1 %v214_v41, %s2578_s1 }
 0x1ec   :  { %v2510_v48 = vpop.eup %2509  ;;  %v193_v53 = vmul.f32 %v191_v46, %v181_v50 }
 0x1ed   :  { %v182_v52 = vmul.f32 %v2510_v48, %v2718_v21 }
 0x1ef   :  { %579 = vrot.lane.b32.xlu1 %v2722_v22, %s2579_s2  ;;  %v194_v56 = vmul.f32 %v191_v46, %v182_v52 }
 0x1f3   :  { %548 = vrot.lane.b32.xlu1 %v2722_v22, %s2582_s27 }
 0x1f7   :  { %550 = vrot.lane.b32.xlu1 %v2728_v25, %s2582_s27 }
 0x259   :  { %v218_v51 = vpop.permute.xlu1 %217 }
 0x25a   :  { %2355 = vmatpush3.xpose.msk.msra.mxu1 %vm219_vm3, %v218_v51 }
 0x25b   :  { %2359 = vmatprep.subr.mxu1 %v2580_v33 }
 0x25d   :  { %2357 = vmatmul.mubr.msk.f32.vlgmr.msra.gmra.mxu1 %vm219_vm3, %v193_v53  ;;  %v297_v55 = vpop.permute.xlu1 %296 }
 0x25e   :  { %2360 = vmatpush3.xpose.msk.msra.mxu1 %vm219_vm3, %v297_v55  ;;  %2361 = vmatprep.mubr.msk.f32.mxu1 %vm2581_vm2, %v2580_v33 }
 0x25f   :  { %2364 = vmatprep.subr.mxu1 %v2580_v33 }
 0x261   :  { %2362 = vmatmul.mubr.msk.f32.vlgmr.msra.gmra.mxu1 %vm219_vm3, %v194_v56  ;;  %v580_v59 = vpop.permute.xlu1 %579 }
 0x262   :  { %2365 = vmatpush3.msk.msra.mxu1 %vm400_vm4, %v2773_v57  ;;  %2366 = vmatprep.mubr.msk.f32.mxu1 %vm2581_vm2, %v2580_v33  ;;  %v585_v6 = vsel %vm170_vm1, %v580_v59, 0.0  ;;  %v2818_v59 = vcombine.high %v2773_v57, %v2773_v57 }
 0x263   :  { %2369 = vmatprep.subr.mxu1 %v2580_v33 }
 0x265   :  { %v549_v3 = vpop.permute.xlu1 %548 }
 0x266   :  { %v554_v9 = vsel %vm170_vm1, %v549_v3, 0.0 }
 0x269   :  { %v551_v10 = vpop.permute.xlu1 %550 }
 0x26a   :  { %v557_v11 = vsel %vm170_vm1, %v551_v10, 0.0 }
 0x31d   :  { %v291_v60 = vpop.f32.mrf.mxu1 }
 0x31e   :  { %v292_v61 = vadd.f32 %v291_v60, %v215_v58 }
 0x31f   :  { %v2358_v62 = vpop.f32.mrf.mxu1 }
 0x320   :  { %v374_v63 = vsel %vm373_vm5, %v292_v61, -inf  ;;  %v2228_v62 = vld [vmem:[%s3115_s6 + $0x4] sm:$0xf] }
 0x321   :  { %375 = vmax.xlane.f32.xlu1 %v374_v63  ;;  %v369_v0 = vpop.f32.mrf.mxu1 }
 0x322   :  { %v370_v2 = vadd.f32 %v369_v0, %v215_v58 }
 0x323   :  { %v2363_v4 = vpop.f32.mrf.mxu1 }
 0x324   :  { %v377_v5 = vsel %vm373_vm5, %v370_v2, -inf }
 0x325   :  { %378 = vmax.xlane.f32.xlu0 %v377_v5  ;;  %586 = vadd.xlane.f32.xlu1 %v585_v6 }
 0x329   :  { %589 = vadd.xlane.f32.xlu1 %v588_v8  ;;  %555 = vadd.xlane.f32.xlu0 %v554_v9 }
 0x32d   :  { %558 = vadd.xlane.f32.xlu1 %v557_v11 }
 0x33f   :  { %574 = vperm.xlu0 %2457, %v2227_v12  }
 0x343   :  { %935 = vrot.lane.b32.xlu0 %v2722_v22, %s2583_s17 }
 0x3aa   :  { %v376_v13 = vpop.xlane.xlu1 %375 }
 0x3ab   :  { %v380_v36 = vsub.f32 %v292_v61, %v376_v13 }
 0x3ad   :  { %v382_v37 = vmul.f32 1.442695, %v380_v36 }
 0x3ae   :  { %v379_v16 = vpop.xlane.xlu0 %378  ;;  %v587_v17 = vpop.xlane.xlu1 %586 }
 0x3af   :  { %v591_v18 = vadd.f32 1e-12, %v587_v17  ;;  %v381_v38 = vsub.f32 %v370_v2, %v379_v16 }
 0x3b1   :  { %2511 = vrsqrt.f32 %v591_v18  ;;  %v384_v39 = vmul.f32 1.442695, %v381_v38  ;;  %v2238_v18 = vld [vmem:[%s3114_s5 + $0x2] ss:$0 sm:$0xff] }
 0x3b2   :  { %v556_v20 = vpop.xlane.xlu0 %555  ;;  %v590_v23 = vpop.xlane.xlu1 %589 }
 0x3b3   :  { %v560_v24 = vadd.f32 1e-12, %v556_v20  ;;  %v592_v26 = vadd.f32 1e-12, %v590_v23 }
 0x3b5   :  { %2513 = vrsqrt.f32 %v560_v24 }
 0x3b6   :  { %2515 = vrsqrt.f32 %v592_v26  ;;  %v559_v40 = vpop.xlane.xlu1 %558 }
 0x3b7   :  { %2517 = vpow2.f32 %v382_v37  ;;  %v561_v41 = vadd.f32 1e-12, %v559_v40 }
 0x3b8   :  { %2519 = vpow2.f32 %v384_v39 }
 0x3b9   :  { %2521 = vrsqrt.f32 %v561_v41 }
 0x3ba   :  { %v575_v34 = vpop.permute.xlu0 %574 }
 0x3be   :  { %v2512_v27 = vpop.eup %2511  ;;  %v936_v4 = vpop.permute.xlu0 %935 }
 0x3bf   :  { %v595_v28 = vmul.f32 %v2512_v27, %v2712_v19  ;;  %v941_v5 = vsel %vm170_vm1, %v936_v4, 0.0 }
 0x3c1   :  { %603 = vrot.lane.b32.xlu1 %v595_v28, %s2579_s2 }
 0x3c2   :  { %v2514_v29 = vpop.eup %2513 }
 0x3c3   :  { %v2516_v30 = vpop.eup %2515  ;;  %v564_v31 = vmul.f32 %v2514_v29, %v2712_v19 }
 0x3c4   :  { %v596_v32 = vmul.f32 %v2516_v30, %v2718_v21  ;;  %v2518_v42 = vpop.eup %2517 }
 0x3c5   :  { %v577_v35 = vmul.f32 %v575_v34, %v564_v31  ;;  %v386_v43 = vsel %vm373_vm5, %v2518_v42, 0.0  ;;  %v2520_v44 = vpop.eup %2519 }
 0x3c6   :  { %683 = vrot.lane.b32.xlu1 %v596_v32, %s2579_s2  ;;  %v389_v45 = vsel %vm373_vm5, %v2520_v44, 0.0  ;;  %v2522_v46 = vpop.eup %2521 }
 0x3c7   :  { %v565_v47 = vmul.f32 %v2522_v46, %v2718_v21 }
 0x3c9   :  { %v578_v48 = vmul.f32 %v575_v34, %v565_v47 }
 0x3ca   :  { %600 = vrot.lane.b32.xlu1 %v577_v35, %s2582_s27 }
 0x3ee   :  { %387 = vadd.xlane.f32.xlu1 %v386_v43 }
 0x3f2   :  { %390 = vadd.xlane.f32.xlu1 %v389_v45 }
 0x403   :  { %680 = vrot.lane.b32.xlu1 %v578_v48, %s2582_s27 }
 0x407   :  { %966 = vrot.lane.b32.xlu1 %v2722_v22, %s2584_s18 }
 0x40b   :  { %968 = vrot.lane.b32.xlu1 %v2728_v25, %s2584_s18 }
 0x40f   :  { %937 = vrot.lane.b32.xlu1 %v2728_v25, %s2583_s17 }
 0x433   :  { %v604_v50 = vpop.permute.xlu1 %603 }
 0x438   :  { %v684_v51 = vpop.permute.xlu1 %683 }
 0x439   :  { %2380 = vmatpush3.xpose.msk.msra.mxu0 %vm219_vm3, %v684_v51 }
 0x43a   :  { %2389 = vmatprep.subr.mxu0 %v2580_v33 }
 0x43c   :  { %v601_v52 = vpop.permute.xlu1 %600 }
 0x477   :  { %v388_v53 = vpop.xlane.xlu1 %387 }
 0x478   :  { %2523 = vrcp.f32 %v388_v53 }
 0x47b   :  { %v391_v54 = vpop.xlane.xlu1 %390 }
 0x47c   :  { %2525 = vrcp.f32 %v391_v54 }
 0x47f   :  { %v681_v55 = vpop.permute.xlu1 %680 }
 0x480   :  { %2382 = vmatmul.mubr.msk.f32.vlgmr.msra.gmra.mxu0 %vm219_vm3, %v681_v55 }
 0x481   :  { %2391 = vmatprep.mubr.msk.f32.mxu0 %vm2581_vm2, %v2580_v33 }
 0x483   :  { %v967_v10 = vpop.permute.xlu1 %966 }
 0x484   :  { %v972_v20 = vsel %vm170_vm1, %v967_v10, 0.0 }
 0x485   :  { %v2524_v56 = vpop.eup %2523 }
 0x486   :  { %v393_v58 = vmul.f32 %v2524_v56, %v2518_v42 }
 0x487   :  { %v969_v17 = vpop.permute.xlu1 %968 }
 0x488   :  { %2367 = vmatmul.mubr.msk.f32.vlgmr.msra.gmra.mxu1 %vm396_vm6, %v393_v58  ;;  %v975_v23 = vsel %vm170_vm1, %v969_v17, 0.0 }
 0x489   :  { %v2526_v60 = vpop.eup %2525  ;;  %2370 = vmatpush3.msk.msra.mxu1 %vm400_vm4, %v2818_v59  ;;  %2371 = vmatprep.mubr.msk.f32.mxu1 %vm2581_vm2, %v2580_v33 }
 0x48a   :  { %2374 = vmatprep.subr.mxu1 %v2580_v33  ;;  %v395_v61 = vmul.f32 %v2526_v60, %v2520_v44 }
 0x48b   :  { %v938_v24 = vpop.permute.xlu1 %937 }
 0x48c   :  { %2372 = vmatmul.mubr.msk.f32.vlgmr.msra.gmra.mxu1 %vm396_vm6, %v395_v61  ;;  %v944_v26 = vsel %vm170_vm1, %v938_v24, 0.0 }
 0x48d   :  { %2375 = vmatpush3.xpose.msk.msra.mxu1 %vm219_vm3, %v604_v50  ;;  %2376 = vmatprep.mubr.msk.f32.mxu1 %vm2581_vm2, %v2580_v33 }
 0x48e   :  { %2384 = vmatprep.subr.mxu1 %v2580_v33 }
 0x490   :  { %2377 = vmatmul.mubr.msk.f32.vlgmr.msra.gmra.mxu1 %vm219_vm3, %v601_v52 }
 0x491   :  { %2386 = vmatprep.mubr.msk.f32.mxu1 %vm2581_vm2, %v2580_v33 }
 0x540   :  { %v755_v63 = vpop.f32.mrf.mxu0 }
 0x541   :  { %v756_v0 = vadd.f32 %v2228_v62, %v755_v63 }
 0x542   :  { %v2383_v2 = vpop.f32.mrf.mxu0 }
 0x543   :  { %v762_v3 = vsel %vm373_vm5, %v756_v0, -inf }
 0x544   :  { %763 = vmax.xlane.f32.xlu1 %v762_v3 }
 0x548   :  { %v2839_v6 = vpop.f32.mrf.mxu1  ;;  %942 = vadd.xlane.f32.xlu1 %v941_v5 }
 0x54a   :  { %v2368_v7 = vpop.f32.mrf.mxu1 }
 0x54c   :  { %v2841_v8 = vpop.f32.mrf.mxu1 }
 0x54e   :  { %v2373_v9 = vpop.f32.mrf.mxu1 }
 0x550   :  { %v675_v11 = vpop.f32.mrf.mxu1 }
 0x551   :  { %v676_v12 = vadd.f32 %v2228_v62, %v675_v11  ;;  %v2239_v11 = vld [vmem:[%s3115_s6 + $0x8] sm:$0xf] }
 0x552   :  { %v2378_v13 = vpop.f32.mrf.mxu1 }
 0x553   :  { %v759_v16 = vsel %vm373_vm5, %v676_v12, -inf }
 0x554   :  { %760 = vmax.xlane.f32.xlu0 %v759_v16 }
 0x558   :  { %973 = vadd.xlane.f32.xlu0 %v972_v20 }
 0x559   :  { %961 = vperm.xlu1 %2456, %v2238_v18  }
 0x55c   :  { %976 = vadd.xlane.f32.xlu0 %v975_v23 }
 0x55d   :  { %858 = vrot.lane.b32.xlu1 %v2818_v59, %s2582_s27 }
 0x560   :  { %945 = vadd.xlane.f32.xlu0 %v944_v26 }
 0x5cd   :  { %v764_v27 = vpop.xlane.xlu1 %763 }
 0x5ce   :  { %v766_v28 = vsub.f32 %v756_v0, %v764_v27 }
 0x5d0   :  { %v769_v29 = vmul.f32 1.442695, %v766_v28 }
 0x5d1   :  { %v943_v30 = vpop.xlane.xlu1 %942 }
 0x5d2   :  { %2527 = vpow2.f32 %v769_v29  ;;  %v947_v40 = vadd.f32 1e-12, %v943_v30 }
 0x5d5   :  { %v962_v31 = vpop.permute.xlu1 %961 }
 0x5d9   :  { %v859_v32 = vpop.permute.xlu1 %858 }
 0x5da   :  { %2390 = vmatpush3.msk.msra.mxu0 %vm400_vm4, %v859_v32 }
 0x5db   :  { %2399 = vmatprep.subr.mxu0 %v2580_v33 }
 0x5dd   :  { %v761_v34 = vpop.xlane.xlu0 %760 }
 0x5de   :  { %v765_v35 = vsub.f32 %v676_v12, %v761_v34 }
 0x5df   :  { %v2528_v36 = vpop.eup %2527 }
 0x5e0   :  { %v767_v37 = vmul.f32 1.442695, %v765_v35  ;;  %v774_v38 = vsel %vm373_vm5, %v2528_v36, 0.0 }
 0x5e1   :  { %v974_v39 = vpop.xlane.xlu0 %973  ;;  %775 = vadd.xlane.f32.xlu0 %v774_v38 }
 0x5e2   :  { %2529 = vpow2.f32 %v767_v37  ;;  %v978_v41 = vadd.f32 1e-12, %v974_v39  ;;  %v2249_v37 = vld [vmem:[%s3114_s5 + $0x3] ss:$0 sm:$0xff] }
 0x5e4   :  { %2531 = vrsqrt.f32 %v978_v41 }
 0x5e5   :  { %v977_v42 = vpop.xlane.xlu0 %976  ;;  %2533 = vrsqrt.f32 %v947_v40 }
 0x5e6   :  { %v979_v43 = vadd.f32 1e-12, %v977_v42 }
 0x5e8   :  { %2535 = vrsqrt.f32 %v979_v43 }
 0x5e9   :  { %v946_v44 = vpop.xlane.xlu0 %945 }
 0x5ea   :  { %v948_v48 = vadd.f32 1e-12, %v946_v44 }
 0x5ec   :  { %2537 = vrsqrt.f32 %v948_v48 }
 0x5ef   :  { %v2530_v45 = vpop.eup %2529 }
 0x5f0   :  { %v771_v46 = vsel %vm373_vm5, %v2530_v45, 0.0 }
 0x5f1   :  { %v2532_v47 = vpop.eup %2531  ;;  %772 = vadd.xlane.f32.xlu0 %v771_v46 }
 0x5f2   :  { %v982_v50 = vmul.f32 %v2532_v47, %v2712_v19  ;;  %v2534_v51 = vpop.eup %2533 }
 0x5f3   :  { %v951_v53 = vmul.f32 %v2534_v51, %v2712_v19 }
 0x5f4   :  { %990 = vrot.lane.b32.xlu1 %v982_v50, %s2584_s18 }
 0x5f5   :  { %v2536_v52 = vpop.eup %2535  ;;  %v964_v55 = vmul.f32 %v962_v31, %v951_v53 }
 0x5f6   :  { %v983_v54 = vmul.f32 %v2536_v52, %v2718_v21 }
 0x5f8   :  { %1070 = vrot.lane.b32.xlu1 %v983_v54, %s2584_s18 }
 0x5f9   :  { %v2538_v56 = vpop.eup %2537 }
 0x5fa   :  { %v952_v58 = vmul.f32 %v2538_v56, %v2718_v21 }
 0x5fc   :  { %987 = vrot.lane.b32.xlu1 %v964_v55, %s2583_s17  ;;  %v965_v60 = vmul.f32 %v962_v31, %v952_v58 }
 0x600   :  { %1353 = vrot.lane.b32.xlu1 %v2722_v22, %s2585_s23 }
 0x604   :  { %1322 = vrot.lane.b32.xlu1 %v2722_v22, %s2586_s24 }
 0x607   :  { %781 = vrot.lane.b32.xlu0 %v2773_v57, %s2582_s27 }
 0x60b   :  { %1067 = vrot.lane.b32.xlu0 %v965_v60, %s2583_s17 }
 0x60f   :  { %1355 = vrot.lane.b32.xlu0 %v2728_v25, %s2585_s23 }
 0x613   :  { %1324 = vrot.lane.b32.xlu0 %v2728_v25, %s2586_s24 }
 0x666   :  { %v991_v62 = vpop.permute.xlu1 %990 }
 0x66a   :  { %v776_v61 = vpop.xlane.xlu0 %775  ;;  %v1071_v2 = vpop.permute.xlu1 %1070 }
 0x66b   :  { %2539 = vrcp.f32 %v776_v61 }
 0x66e   :  { %v988_v7 = vpop.permute.xlu1 %987 }
 0x672   :  { %v1354_v16 = vpop.permute.xlu1 %1353 }
 0x673   :  { %v1359_v20 = vsel %vm170_vm1, %v1354_v16, 0.0 }
 0x676   :  { %v1323_v23 = vpop.permute.xlu1 %1322 }
 0x677   :  { %v1328_v27 = vsel %vm170_vm1, %v1323_v23, 0.0 }
 0x678   :  { %v2540_v63 = vpop.eup %2539 }
 0x679   :  { %v780_v0 = vmul.f32 %v2540_v63, %v2528_v36 }
 0x67a   :  { %v773_v22 = vpop.xlane.xlu0 %772 }
 0x67b   :  { %2541 = vrcp.f32 %v773_v22  ;;  %2392 = vmatmul.mubr.msk.f32.vlgmr.msra.gmra.mxu0 %vm396_vm6, %v780_v0 }
 0x67c   :  { %2400 = vmatpush3.xpose.msk.msra.mxu0 %vm219_vm3, %v1071_v2  ;;  %2401 = vmatprep.mubr.msk.f32.mxu0 %vm2581_vm2, %v2580_v33 }
 0x67d   :  { %2409 = vmatprep.subr.mxu0 %v2580_v33 }
 0x67e   :  { %v782_v3 = vpop.permute.xlu0 %781 }
 0x67f   :  { %2385 = vmatpush3.msk.msra.mxu1 %vm400_vm4, %v782_v3 }
 0x680   :  { %2394 = vmatprep.subr.mxu1 %v2580_v33 }
 0x682   :  { %v1068_v25 = vpop.permute.xlu0 %1067 }
 0x683   :  { %2402 = vmatmul.mubr.msk.f32.vlgmr.msra.gmra.mxu0 %vm219_vm3, %v1068_v25 }
 0x684   :  { %2411 = vmatprep.mubr.msk.f32.mxu0 %vm2581_vm2, %v2580_v33 }
 0x686   :  { %v1356_v30 = vpop.permute.xlu0 %1355 }
 0x687   :  { %v1362_v34 = vsel %vm170_vm1, %v1356_v30, 0.0 }
 0x688   :  { %v2542_v4 = vpop.eup %2541 }
 0x689   :  { %v778_v5 = vmul.f32 %v2542_v4, %v2530_v45 }
 0x68a   :  { %v1325_v35 = vpop.permute.xlu0 %1324 }
 0x68b   :  { %2387 = vmatmul.mubr.msk.f32.vlgmr.msra.gmra.mxu1 %vm396_vm6, %v778_v5  ;;  %v1331_v36 = vsel %vm170_vm1, %v1325_v35, 0.0 }
 0x68c   :  { %2395 = vmatpush3.xpose.msk.msra.mxu1 %vm219_vm3, %v991_v62  ;;  %2396 = vmatprep.mubr.msk.f32.mxu1 %vm2581_vm2, %v2580_v33 }
 0x68d   :  { %2404 = vmatprep.subr.mxu1 %v2580_v33 }
 0x68f   :  { %2397 = vmatmul.mubr.msk.f32.vlgmr.msra.gmra.mxu1 %vm219_vm3, %v988_v7 }
 0x690   :  { %2406 = vmatprep.mubr.msk.f32.mxu1 %vm2581_vm2, %v2580_v33 }
 0x73b   :  { %v2892_v9 = vpop.f32.mrf.mxu0 }
 0x73d   :  { %v2393_v10 = vpop.f32.mrf.mxu0 }
 0x743   :  { %v1142_v12 = vpop.f32.mrf.mxu0 }
 0x744   :  { %v1143_v13 = vadd.f32 %v2239_v11, %v1142_v12 }
 0x745   :  { %v2403_v17 = vpop.f32.mrf.mxu0 }
 0x746   :  { %v1149_v18 = vsel %vm373_vm5, %v1143_v13, -inf }
 0x747   :  { %1150 = vmax.xlane.f32.xlu0 %v1149_v18 }
 0x74b   :  { %v2899_v24 = vpop.f32.mrf.mxu1  ;;  %1360 = vadd.xlane.f32.xlu0 %v1359_v20 }
 0x74d   :  { %v2388_v26 = vpop.f32.mrf.mxu1 }
 0x74f   :  { %v1062_v28 = vpop.f32.mrf.mxu1  ;;  %1329 = vadd.xlane.f32.xlu0 %v1328_v27  ;;  %v2250_v27 = vld [vmem:[%s3115_s6 + $0xc] sm:$0xf] }
 0x750   :  { %v1063_v29 = vadd.f32 %v2239_v11, %v1062_v28 }
 0x751   :  { %v2398_v31 = vpop.f32.mrf.mxu1 }
 0x752   :  { %v1146_v32 = vsel %vm373_vm5, %v1063_v29, -inf }
 0x753   :  { %1147 = vmax.xlane.f32.xlu1 %v1146_v32 }
 0x757   :  { %1363 = vadd.xlane.f32.xlu1 %v1362_v34 }
 0x75b   :  { %1332 = vadd.xlane.f32.xlu1 %v1331_v36 }
 0x765   :  { %1348 = vperm.xlu0 %2457, %v2249_v37  }
 0x769   :  { %1245 = vrot.lane.b32.xlu0 %v2818_v59, %s2583_s17 }
 0x7d0   :  { %v1151_v38 = vpop.xlane.xlu0 %1150 }
 0x7d1   :  { %v1153_v39 = vsub.f32 %v1143_v13, %v1151_v38 }
 0x7d3   :  { %v1156_v40 = vmul.f32 1.442695, %v1153_v39 }
 0x7d4   :  { %v1361_v41 = vpop.xlane.xlu0 %1360 }
 0x7d5   :  { %2543 = vpow2.f32 %v1156_v40  ;;  %v1365_v42 = vadd.f32 1e-12, %v1361_v41 }
 0x7d7   :  { %2545 = vrsqrt.f32 %v1365_v42 }
 0x7d8   :  { %v1330_v43 = vpop.xlane.xlu0 %1329 }
 0x7d9   :  { %v1334_v44 = vadd.f32 1e-12, %v1330_v43 }
 0x7db   :  { %2547 = vrsqrt.f32 %v1334_v44 }
 0x7dc   :  { %v1148_v45 = vpop.xlane.xlu1 %1147 }
 0x7dd   :  { %v1152_v62 = vsub.f32 %v1063_v29, %v1148_v45 }
 0x7df   :  { %v1154_v63 = vmul.f32 1.442695, %v1152_v62 }
 0x7e0   :  { %v1349_v46 = vpop.permute.xlu0 %1348  ;;  %v1364_v47 = vpop.xlane.xlu1 %1363 }
 0x7e1   :  { %v1366_v50 = vadd.f32 1e-12, %v1364_v47 }
 0x7e2   :  { %v2544_v48 = vpop.eup %2543 }
 0x7e3   :  { %v1161_v51 = vsel %vm373_vm5, %v2544_v48, 0.0  ;;  %2549 = vrsqrt.f32 %v1366_v50 }
 0x7e4   :  { %v2546_v52 = vpop.eup %2545  ;;  %1162 = vadd.xlane.f32.xlu1 %v1161_v51  ;;  %v1246_v53 = vpop.permute.xlu0 %1245  ;;  %2551 = vpow2.f32 %v1154_v63 }
 0x7e5   :  { %2410 = vmatpush3.msk.msra.mxu0 %vm400_vm4, %v1246_v53  ;;  %v1369_v54 = vmul.f32 %v2546_v52, %v2712_v19  ;;  %v1333_v0 = vpop.xlane.xlu1 %1332 }
 0x7e6   :  { %2419 = vmatprep.subr.mxu0 %v2580_v33  ;;  %v1335_v22 = vadd.f32 1e-12, %v1333_v0 }
 0x7e7   :  { %1377 = vrot.lane.b32.xlu0 %v1369_v54, %s2585_s23  ;;  %v2471_v54 = vld [vmem:[%s3116_s3 + $0x18] sm:$0xff]  }
 0x7e8   :  { %v2548_v55 = vpop.eup %2547  ;;  %2553 = vrsqrt.f32 %v1335_v22 }
 0x7e9   :  { %v1338_v56 = vmul.f32 %v2548_v55, %v2712_v19  ;;  %v2472_v55 = vld [vmem:[%s3116_s3 + $0x10] sm:$0xff]  }
 0x7eb   :  { %v1351_v58 = vmul.f32 %v1349_v46, %v1338_v56  ;;  %v2473_v56 = vld [vmem:[%s3116_s3 + $0x8] sm:$0xff]  }
 0x7ed   :  { %1374 = vrot.lane.b32.xlu0 %v1351_v58, %s2586_s24 }
 0x7f0   :  { %v2550_v60 = vpop.eup %2549 }
 0x7f1   :  { %v1370_v61 = vmul.f32 %v2550_v60, %v2718_v21  ;;  %v2552_v2 = vpop.eup %2551  ;;  %v2474_v60 = vld [vmem:[%s3116_s3] sm:$0xff]  }
 0x7f2   :  { %v1158_v19 = vsel %vm373_vm5, %v2552_v2, 0.0 }
 0x7f5   :  { %1168 = vrot.lane.b32.xlu1 %v2773_v57, %s2583_s17  ;;  %v2554_v3 = vpop.eup %2553 }
 0x7f6   :  { %v1339_v25 = vmul.f32 %v2554_v3, %v2718_v21 }
 0x7f8   :  { %v1352_v4 = vmul.f32 %v1349_v46, %v1339_v25 }
 0x7f9   :  { %1457 = vrot.lane.b32.xlu1 %v1370_v61, %s2585_s23 }
 0x81d   :  { %1159 = vadd.xlane.f32.xlu1 %v1158_v19 }
 0x82e   :  { %1454 = vrot.lane.b32.xlu1 %v1352_v4, %s2586_s24 }
 0x859   :  { %v1378_v18 = vpop.permute.xlu0 %1377 }
 0x85f   :  { %v1375_v20 = vpop.permute.xlu0 %1374 }
 0x86d   :  { %v1163_v5 = vpop.xlane.xlu1 %1162 }
 0x86e   :  { %2555 = vrcp.f32 %v1163_v5 }
 0x871   :  { %v1169_v7 = vpop.permute.xlu1 %1168 }
 0x872   :  { %2405 = vmatpush3.msk.msra.mxu1 %vm400_vm4, %v1169_v7 }
 0x873   :  { %2414 = vmatprep.subr.mxu1 %v2580_v33 }
 0x875   :  { %v1458_v12 = vpop.permute.xlu1 %1457 }
 0x87b   :  { %v2556_v10 = vpop.eup %2555 }
 0x87c   :  { %v1167_v11 = vmul.f32 %v2556_v10, %v2544_v48 }
 0x87e   :  { %2412 = vmatmul.mubr.msk.f32.vlgmr.msra.gmra.mxu0 %vm396_vm6, %v1167_v11 }
 0x87f   :  { %2420 = vmatpush3.xpose.msk.msra.mxu0 %vm219_vm3, %v1458_v12  ;;  %2421 = vmatprep.mubr.msk.f32.mxu0 %vm2581_vm2, %v2580_v33 }
 0x880   :  { %2429 = vmatprep.subr.mxu0 %v2580_v33 }
 0x8a6   :  { %v1160_v21 = vpop.xlane.xlu1 %1159 }
 0x8a7   :  { %2557 = vrcp.f32 %v1160_v21 }
 0x8aa   :  { %v1455_v13 = vpop.permute.xlu1 %1454 }
 0x8ab   :  { %2422 = vmatmul.mubr.msk.f32.vlgmr.msra.gmra.mxu0 %vm219_vm3, %v1455_v13  ;;  %v2259_v13 = vld [vmem:[%s3117_s4] ss:$0 sm:$0xff] }
 0x8ac   :  { %2431 = vmatprep.mubr.msk.f32.mxu0 %vm2581_vm2, %v2580_v33 }
 0x8b4   :  { %v2558_v16 = vpop.eup %2557 }
 0x8b5   :  { %v1165_v17 = vmul.f32 %v2558_v16, %v2552_v2 }
 0x8b7   :  { %2407 = vmatmul.mubr.msk.f32.vlgmr.msra.gmra.mxu1 %vm396_vm6, %v1165_v17 }
 0x8b8   :  { %2415 = vmatpush3.xpose.msk.msra.mxu1 %vm219_vm3, %v1378_v18  ;;  %2416 = vmatprep.mubr.msk.f32.mxu1 %vm2581_vm2, %v2580_v33 }
 0x8b9   :  { %2424 = vmatprep.subr.mxu1 %v2580_v33 }
 0x8bb   :  { %2417 = vmatmul.mubr.msk.f32.vlgmr.msra.gmra.mxu1 %vm219_vm3, %v1375_v20 }
 0x8bc   :  { %2426 = vmatprep.mubr.msk.f32.mxu1 %vm2581_vm2, %v2580_v33 }
 0x93e   :  { %v1318_v23 = vpop.f32.mrf.mxu0 }
 0x940   :  { %v2413_v26 = vpop.f32.mrf.mxu0 }
 0x96b   :  { %v1529_v28 = vpop.f32.mrf.mxu0 }
 0x96c   :  { %v1530_v29 = vadd.f32 %v2250_v27, %v1529_v28 }
 0x96d   :  { %v2423_v30 = vpop.f32.mrf.mxu0 }
 0x96e   :  { %v1536_v31 = vsel %vm373_vm5, %v1530_v29, -inf  ;;  %v2475_v30 = vld [vmem:[%s3118_s9 + $0x30] ss:$8 sps:$4 sm:$0xff]  }
 0x96f   :  { %1537 = vmax.xlane.f32.xlu1 %v1536_v31  ;;  %v2480_v31 = vld [vmem:[%s3118_s9 + $0x24] ss:$8 sps:$4 sm:$0xff]  }
 0x977   :  { %v1241_v32 = vpop.f32.mrf.mxu1 }
 0x979   :  { %v2408_v34 = vpop.f32.mrf.mxu1 }
 0x97a   :  { %v2483_v34 = vld [vmem:[%s3118_s9 + $0x14] ss:$8 sps:$4 sm:$0xff]  }
 0x97b   :  { %v1449_v35 = vpop.f32.mrf.mxu1 }
 0x97c   :  { %v1450_v36 = vadd.f32 %v2250_v27, %v1449_v35  ;;  %v2481_v35 = vld [vmem:[%s3118_s9 + $0x10] ss:$8 sps:$4 sm:$0xff]  }
 0x97d   :  { %v2418_v37 = vpop.f32.mrf.mxu1 }
 0x97e   :  { %v1533_v38 = vsel %vm373_vm5, %v1450_v36, -inf  ;;  %v2484_v37 = vld [vmem:[%s3118_s9] ss:$8 sps:$4 sm:$0xff]  }
 0x97f   :  { %1534 = vmax.xlane.f32.xlu0 %v1533_v38 }
 0x980   :  { %1555 = vrot.lane.b32.xlu1 %v2773_v57, %s2586_s24 }
 0x984   :  { %1711 = vrot.lane.b32.xlu1 %v2899_v24, %s2585_s23 }
 0x988   :  { %1713 = vrot.lane.b32.xlu1 %v2892_v9, %s2585_s23 }
 0x98c   :  { %1721 = vrot.lane.b32.xlu1 %v1318_v23, %s2584_s18 }
 0x9f8   :  { %v1538_v39 = vpop.xlane.xlu1 %1537 }
 0x9f9   :  { %v1540_v40 = vsub.f32 %v1530_v29, %v1538_v39 }
 0x9fb   :  { %v1543_v41 = vmul.f32 1.442695, %v1540_v40 }
 0x9fc   :  { %v1556_v42 = vpop.permute.xlu1 %1555 }
 0x9fd   :  { %2559 = vpow2.f32 %v1543_v41  ;;  %2425 = vmatpush3.msk.msra.mxu1 %vm400_vm4, %v1556_v42  ;;  %v2265_v42 = vld [vmem:[%s3119_s7] ss:$0 sm:$0xff] }
 0xa00   :  { %v1712_v0 = vpop.permute.xlu1 %1711 }
 0xa01   :  { %v1733_v3 = vsel %vm219_vm3, %v2839_v6, %v1712_v0  ;;  %v2498_v0 = vld [vmem:[%s3121_s11 + $0x10] sm:$0xff]  }
 0xa04   :  { %v1714_v22 = vpop.permute.xlu1 %1713 }
 0xa05   :  { %v1734_v25 = vsel %vm219_vm3, %v2841_v8, %v1714_v22  ;;  %v2499_v22 = vld [vmem:[%s3121_s11 + $0x48] sm:$0xff]  }
 0xa08   :  { %v1535_v43 = vpop.xlane.xlu0 %1534  ;;  %v1722_v2 = vpop.permute.xlu1 %1721 }
 0xa09   :  { %v1539_v44 = vsub.f32 %v1450_v36, %v1535_v43  ;;  %v1737_v4 = vsel %vm1735_vm7, %v1734_v25, %v1722_v2  ;;  %v2486_v36 = vld [vmem:[%s3118_s9 + $0x4] ss:$8 sps:$4 sm:$0xff]  }
 0xa0a   :  { %v2560_v45 = vpop.eup %2559  ;;  %v2500_v2 = vld [vmem:[%s3121_s11 + $0x8] sm:$0xff]  }
 0xa0b   :  { %v1541_v46 = vmul.f32 1.442695, %v1539_v44  ;;  %v1548_v57 = vsel %vm373_vm5, %v2560_v45, 0.0  ;;  %v2266_v44 = vld [vmem:[%s3120_s8] ss:$0 sm:$0xff] }
 0xa0c   :  { %1549 = vadd.xlane.f32.xlu0 %v1548_v57 }
 0xa0d   :  { %2561 = vpow2.f32 %v1541_v46 }
 0xa1a   :  { %v2562_v24 = vpop.eup %2561 }
 0xa1b   :  { %v1545_v9 = vsel %vm373_vm5, %v2562_v24, 0.0 }
 0xa1c   :  { %1546 = vadd.xlane.f32.xlu0 %v1545_v9 }
 0xa32   :  { %1632 = vrot.lane.b32.xlu0 %v2818_v59, %s2586_s24 }
 0xa36   :  { %1719 = vrot.lane.b32.xlu0 %v1241_v32, %s2584_s18  ;;  %v2478_v32 = vld [vmem:[%s3118_s9 + $0x20] ss:$8 sps:$4 sm:$0xff]  }
 0xa95   :  { %v1550_v47 = vpop.xlane.xlu0 %1549 }
 0xa96   :  { %2563 = vrcp.f32 %v1550_v47  ;;  %v2576_v47 = vld [vmem:[%s3112_s0 + $0x4] sm:$0xf] }
 0xaa3   :  { %v2564_v50 = vpop.eup %2563 }
 0xaa4   :  { %v1554_v52 = vmul.f32 %v2564_v50, %v2560_v45 }
 0xaa5   :  { %v1547_v48 = vpop.xlane.xlu0 %1546 }
 0xaa6   :  { %2565 = vrcp.f32 %v1547_v48 }
 0xaa9   :  { %v1633_v51 = vpop.permute.xlu0 %1632 }
 0xaaa   :  { %2430 = vmatpush3.msk.msra.mxu0 %vm400_vm4, %v1633_v51 }
 0xaab   :  { %2432 = vmatmul.mubr.msk.f32.vlgmr.msra.gmra.mxu0 %vm396_vm6, %v1554_v52  ;;  %2434 = vmatprep.subr.bf16.mxu0 %v2580_v33  ;;  %v2487_v52 = vld [vmem:[%s3121_s11 + $0x78] sm:$0xff]  }
 0xaac   :  { %2442 = vmatprep.mubr.msk.bf16.mxu0 %vm2581_vm2, %v2580_v33  ;;  %2435 = vmatpush3.bf16.msra.mxu0 %v2471_v54  ;;  %v2490_v54 = vld [vmem:[%s3121_s11 + $0x30] sm:$0xff]  }
 0xaad   :  { %2436 = vmatprep.subr.bf16.mxu0 %v2580_v33  ;;  %v1720_v19 = vpop.permute.xlu0 %1719  ;;  %2332 = vmatprep.subr.bf16.mxu1 %v2487_v52  ;;  %v2293_v52 = vld [vmem:[%s3124_s13] ss:$0 sm:$0xff] }
 0xaae   :  { %v1736_v5 = vsel %vm1735_vm7, %v1733_v3, %v1720_v19  ;;  %v2501_v19 = vld [vmem:[%s3121_s11 + $0x40] sm:$0xff]  }
 0xaaf   :  { %v1876_v3 = vld [vmem:[%s3122_s10] sm:$0x3] }
 0xab0   :  { %2437 = vmatpush3.bf16.msra.mxu0 %v2472_v55  ;;  %v2491_v55 = vld [vmem:[%s3121_s11 + $0x68] sm:$0xff]   ;;  %v1881_v25 = vrot.slane %v1876_v3, %v70_v15 }
 0xab1   :  { %2438 = vmatprep.subr.bf16.mxu0 %v2580_v33 }
 0xab3   :  { %v2566_v53 = vpop.eup %2565 }
 0xab4   :  { %v1552_v59 = vmul.f32 %v2566_v53, %v2562_v24  ;;  %2439 = vmatpush3.bf16.msra.mxu0 %v2473_v56  ;;  %v2575_v24 = vld [vmem:[%s3112_s0] sm:$0xf]  ;;  %v2488_v53 = vld [vmem:[%s3121_s11 + $0x38] sm:$0xff]   ;;  %v2492_v56 = vld [vmem:[%s3121_s11 + $0x28] sm:$0xff]  }
 0xab5   :  { %2440 = vmatprep.subr.bf16.mxu0 %v2580_v33 }
 0xab6   :  { %2427 = vmatmul.mubr.msk.f32.vlgmr.msra.gmra.mxu1 %vm396_vm6, %v1552_v59  ;;  %v2489_v59 = vld [vmem:[%s3121_s11 + $0x70] sm:$0xff]  }
 0xab7   :  { %2333 = vmatpush3.bf16.msra.mxu1 %v2488_v53 }
 0xab8   :  { %2441 = vmatpush3.bf16.msra.mxu0 %v2474_v60  ;;  %2334 = vmatprep.subr.bf16.mxu1 %v2489_v59  ;;  %v2494_v60 = vld [vmem:[%s3121_s11 + $0x20] sm:$0xff]  }
 0xab9   :  { %v2294_v59 = vld [vmem:[%s3125_s14] ss:$0 sm:$0xff] }
 0xabb   :  { %2335 = vmatpush3.bf16.msra.mxu1 %v2490_v54 }
 0xabc   :  { %2336 = vmatprep.subr.bf16.mxu1 %v2491_v55 }
 0xabf   :  { %2337 = vmatpush3.bf16.msra.mxu1 %v2492_v56 }
 0xb6b   :  { %v1705_v58 = vpop.f32.mrf.mxu0 }
 0xb6c   :  { %1729 = vrot.lane.b32.xlu1 %v1705_v58, %s2579_s2  ;;  %v2493_v58 = vld [vmem:[%s3121_s11 + $0x60] sm:$0xff]  }
 0xb6d   :  { %v2433_v61 = vpop.f32.mrf.mxu0  ;;  %2338 = vmatprep.subr.bf16.mxu1 %v2493_v58 }
 0xb6e   :  { %v2495_v61 = vld [vmem:[%s3121_s11 + $0x58] sm:$0xff]   ;;  %2339 = vmatpush3.bf16.msra.mxu1 %v2494_v60 }
 0xb6f   :  { %2340 = vmatprep.subr.bf16.mxu1 %v2495_v61 }
 0xb76   :  { %v1628_v62 = vpop.f32.mrf.mxu1 }
 0xb77   :  { %1727 = vrot.lane.b32.xlu0 %v1628_v62, %s2579_s2  ;;  %v2496_v62 = vld [vmem:[%s3121_s11 + $0x18] sm:$0xff]  }
 0xb78   :  { %v2428_v63 = vpop.f32.mrf.mxu1  ;;  %2341 = vmatpush3.bf16.msra.mxu1 %v2496_v62 }
 0xb79   :  { %v2497_v63 = vld [vmem:[%s3121_s11 + $0x50] sm:$0xff]  }
 0xb7a   :  { %2342 = vmatprep.subr.bf16.mxu1 %v2497_v63 }
 0xb7c   :  { %2343 = vmatpush3.bf16.msra.mxu1 %v2498_v0 }
 0xb7d   :  { %2344 = vmatprep.subr.bf16.mxu1 %v2499_v22 }
 0xb80   :  { %2345 = vmatpush3.bf16.msra.mxu1 %v2500_v2 }
 0xb81   :  { %2346 = vmatprep.subr.bf16.mxu1 %v2501_v19 }
 0xbde   :  { %v1730_v33 = vpop.permute.xlu1 %1729 }
 0xbdf   :  { %v1740_v10 = vsel %vm1738_vm8, %v1737_v4, %v1730_v33  ;;  %v2502_v33 = vld [vmem:[%s3121_s11] sm:$0xff]   ;;  %v1885_v4 = vrot.slane %v1876_v3, %v74_v49 }
 0xbe0   :  { %2347 = vmatpush3.bf16.msra.mxu1 %v2502_v33 }
 0xbe9   :  { %v1728_v7 = vpop.permute.xlu0 %1727 }
 0xbea   :  { %v1739_v11 = vsel %vm1738_vm8, %v1736_v5, %v1728_v7 }
 0xbeb   :  { %v1743_v12 = vcombine.low %v1739_v11, %v1740_v10 }
 0xbed   :  { %v1745_v21 = vpack.c.bf16 %v1743_v12, %v1743_v12 }
 0xbef   :  { %2443 = vmatmul.mubr.msk.bf16.vlgmr.msra.gmra.mxu0 %vm118_vm0, %v1745_v21 }
 0xbf0   :  { %1963 = vmatprep.mubr.bf16.mxu0 %v2577_v1  ;;  %v2477_v1 = vld [vmem:[%s3118_s9 + $0x34] ss:$8 sps:$4 sm:$0xff]  }
 0xbf1   :  { %1939 = vmatprep.subr.bf16.mxu0 %v2477_v1 }
 0xbf2   :  { %1940 = vmatpush1.bf16.msra.mxu0 %v2475_v30 }
 0xbf3   :  { %1941 = vmatprep.subr.bf16.mxu0 %v2480_v31 }
 0xbf6   :  { %1942 = vmatpush1.bf16.msra.mxu0 %v2478_v32 }
 0xbf7   :  { %1943 = vmatprep.subr.bf16.mxu0 %v2483_v34 }
 0xbfa   :  { %1944 = vmatpush1.bf16.msra.mxu0 %v2481_v35 }
 0xbfb   :  { %1945 = vmatprep.subr.bf16.mxu0 %v2486_v36 }
 0xbfe   :  { %1946 = vmatpush1.bf16.msra.mxu0 %v2484_v37  ;;  %v2276_v37 = vld [vmem:[%s3123_s12] ss:$0 sm:$0xff] }
 0xcaf   :  { %v1822_v16 = vpop.f32.mrf.mxu0 }
 0xcb0   :  { %v1823_v6 = vadd.f32 %v2259_v13, %v1822_v16 }
 0xcb1   :  { %v2444_v17 = vpop.f32.mrf.mxu0 }
 0xcb2   :  { %v1830_v8 = vsel %vm118_vm0, %v1823_v6, 0.0 }
 0xcb3   :  { %1831 = vadd.xlane.f32.xlu0 %v1830_v8  ;;  %v1825_v18 = vpop.f32.mrf.mxu0 }
 0xcb5   :  { %v2445_v20 = vpop.f32.mrf.mxu0 }
 0xd3c   :  { %v1832_v23 = vpop.xlane.xlu0 %1831 }
 0xd3d   :  { %v1834_v26 = vmul.f32 0.015625, %v1832_v23 }
 0xd3f   :  { %v1835_v27 = vsub.f32 %v1823_v6, %v1834_v26 }
 0xd41   :  { %v1836_v28 = vmul.f32 %v1835_v27, %v1835_v27 }
 0xd43   :  { %v1837_v29 = vsel %vm118_vm0, %v1836_v28, 0.0 }
 0xd44   :  { %1838 = vadd.xlane.f32.xlu1 %v1837_v29 }
 0xdcd   :  { %v1839_v38 = vpop.xlane.xlu1 %1838 }
 0xdce   :  { %v1840_v39 = vmul.f32 0.015625, %v1839_v38 }
 0xdd0   :  { %v1841_v40 = vadd.f32 1e-05, %v1840_v39 }
 0xdd2   :  { %2567 = vrsqrt.f32 %v1841_v40 }
 0xddf   :  { %v2568_v41 = vpop.eup %2567 }
 0xde0   :  { %v1843_v43 = vmul.f32 %v2568_v41, %v1835_v27 }
 0xde2   :  { %v1850_v45 = vmul.f32 %v2265_v42, %v1843_v43 }
 0xde4   :  { %v1857_v46 = vadd.f32 %v2266_v44, %v1850_v45 }
 0xde6   :  { %v1859_v57 = vcombine.high %v1857_v46, %v1857_v46  ;;  %v3027_v9 = vadd.f32 %v2575_v24, %v1857_v46 }
 0xde8   :  { %v3032_v48 = vadd.f32 %v2576_v47, %v1859_v57 }
 0xdea   :  { %v1865_v50 = vcombine.low %v3027_v9, %v3032_v48 }
 0xdec   :  { %v1867_v51 = vpack.c.bf16 %v1865_v50, %v1865_v50 }
 0xdee   :  { %2275 = vmatmul.mubr.msk.bf16.vlgmr.msra.gmra.mxu0 %vm118_vm0, %v1867_v51 }
 0xeae   :  { %v1965_v5 = vpop.f32.mrf.mxu0 }
 0xeaf   :  { %v1966_v7 = vadd.f32 %v1965_v5, %v1881_v25 }
 0xeb0   :  { %v1967_v10 = vpop.f32.mrf.mxu0 }
 0xeb1   :  { %v1972_v11 = vmul.f32 %v1966_v7, %v1966_v7  ;;  %v1968_v12 = vadd.f32 %v1967_v10, %v1885_v4 }
 0xeb2   :  { %v1969_v21 = vpop.f32.mrf.mxu0 }
 0xeb3   :  { %v1974_v13 = vmul.f32 %v1972_v11, %v1966_v7  ;;  %v1973_v16 = vmul.f32 %v1968_v12, %v1968_v12 }
 0xeb4   :  { %v1970_v6 = vpop.f32.mrf.mxu0 }
 0xeb5   :  { %v1976_v17 = vmul.f32 0.044715, %v1974_v13  ;;  %v1975_v8 = vmul.f32 %v1973_v16, %v1968_v12 }
 0xeb7   :  { %v1978_v18 = vadd.f32 %v1976_v17, %v1966_v7  ;;  %v1977_v20 = vmul.f32 0.044715, %v1975_v8 }
 0xeb9   :  { %v1980_v23 = vmul.f32 0.7978846, %v1978_v18  ;;  %v1979_v26 = vadd.f32 %v1977_v20, %v1968_v12 }
 0xebb   :  { %2569 = vtanh.f32 %v1980_v23  ;;  %v1981_v15 = vmul.f32 0.7978846, %v1979_v26 }
 0xebd   :  { %2571 = vtanh.f32 %v1981_v15 }
 0xec8   :  { %v2570_v14 = vpop.eup %2569 }
 0xec9   :  { %v1984_v49 = vadd.f32 1.0, %v2570_v14 }
 0xeca   :  { %v2572_v27 = vpop.eup %2571 }
 0xecb   :  { %v1985_v28 = vadd.f32 1.0, %v2572_v27  ;;  %v1986_v29 = vmul.f32 0.5, %v1984_v49 }
 0xecd   :  { %v1987_v1 = vmul.f32 0.5, %v1985_v28  ;;  %v1988_v30 = vmul.f32 %v1986_v29, %v1966_v7 }
 0xecf   :  { %v1989_v31 = vmul.f32 %v1987_v1, %v1968_v12  ;;  %v1990_v34 = vpack.c.bf16 %v1988_v30, %v1988_v30 }
 0xed1   :  { %v1991_v32 = vpack.c.bf16 %v1989_v31, %v1989_v31 }
 0xed3   :  { %2159 = vmatprep.mubr.bf16.mxu1 %v1991_v32 }
 0xed4   :  { %2160 = vmatmul.mubr.bf16.vlgmr.msra.gmra.mxu1 %v1990_v34 }
 0xf94   :  { %v2348_v35 = vpop.f32.mrf.mxu1 }
 0xf96   :  { %v2349_v36 = vpop.f32.mrf.mxu1 }
 0xf97   :  { %v2350_v38 = vadd.f32 %v2349_v36, %v2348_v35 }
 0xf98   :  { %v2351_v39 = vpop.f32.mrf.mxu1 }
 0xf99   :  { %v2162_v40 = vadd.f32 %v2350_v38, %v2276_v37 }
 0xf9a   :  { %v2352_v41 = vpop.f32.mrf.mxu1 }
 0xf9b   :  { %v2169_v42 = vsel %vm118_vm0, %v2162_v40, 0.0 }
 0xf9c   :  { %2170 = vadd.xlane.f32.xlu0 %v2169_v42 }
0x1025   :  { %v2171_v43 = vpop.xlane.xlu0 %2170 }
0x1026   :  { %v2172_v44 = vmul.f32 0.015625, %v2171_v43 }
0x1028   :  { %v2173_v45 = vsub.f32 %v2162_v40, %v2172_v44 }
0x102a   :  { %v2174_v46 = vmul.f32 %v2173_v45, %v2173_v45 }
0x102c   :  { %v2175_v57 = vsel %vm118_vm0, %v2174_v46, 0.0 }
0x102d   :  { %2176 = vadd.xlane.f32.xlu0 %v2175_v57 }
0x10b6   :  { %v2177_v24 = vpop.xlane.xlu0 %2176 }
0x10b7   :  { %v2178_v47 = vmul.f32 0.015625, %v2177_v24 }
0x10b9   :  { %v2179_v50 = vadd.f32 1e-05, %v2178_v47 }
0x10bb   :  { %2573 = vrsqrt.f32 %v2179_v50 }
0x10c8   :  { %v2574_v51 = vpop.eup %2573 }
0x10c9   :  { %v2181_v53 = vmul.f32 %v2574_v51, %v2173_v45 }
0x10cb   :  { %v2188_v54 = vmul.f32 %v2293_v52, %v2181_v53 }
0x10cd   :  { %v2195_v55 = vadd.f32 %v2294_v59, %v2188_v54 }
0x10cf   :  { %v2197_v56 = vcombine.high %v2195_v55, %v2195_v55  ;;  %v2199_v58 = vadd.f32 %v2195_v55, %v3027_v9 }
0x10d1   :  { %v2200_v60 = vadd.f32 %v2197_v56, %v3032_v48  ;;  %2202 = vst.msk [vmem:[%s3126_s15] sm:$0xf] %vm2201_vm9, %v2199_v58 }
0x10d3   :  { %2203 = vst.msk [vmem:[%s3126_s15 + $0x4] sm:$0xf] %vm2201_vm9, %v2200_v60 }

</bundles_post_ra>
